<compile_context>
chip_gen: v6e
topology: v6e:2x2x1
jax: 0.10.0
libtpu: 0.0.40
codegen_flags: <defaults>
</compile_context>

<pallas_src>
import functools

import numpy as np
import jax
import jax.numpy as jnp
from jax.experimental import pallas as pl
from jax.experimental.pallas import tpu as pltpu

# ---- constants from ShortTimeObjectiveIntelligibility.__init__ -----------------
FS = 16000
NUM_BANDS_INIT = 15
CENTER_FREQ = 150
FFT_SIZE = 512
FFT_IN_FRAME = 256
HOP = 128
NUM_FRAMES = 30
BETA = 1.0 + 10.0 ** (15.0 / 20.0)
FFT_PAD = (FFT_SIZE - FFT_IN_FRAME) // 2
ROWS = FFT_SIZE // 2 + 1          # 257 (torch keeps the Nyquist bin)
KBINS = FFT_SIZE // 2             # 256: the Nyquist column of the octave mat is all-zero
SUBFRAMES = FFT_SIZE // HOP       # 4 hop-rows per 512-sample analysis frame


def _round_up(x, m):
    return ((x + m - 1) // m) * m


# ---- deterministic parameter construction (mirrors the torch __init__) ----------
def _get_octave_mat(fs, nfft, num_bands, mn):
    f = np.linspace(0, fs, nfft + 1)
    f = f[: int(nfft / 2) + 1]
    k = np.arange(float(num_bands))
    cf = 2 ** (k / 3) * mn
    fl = np.sqrt(2.0 ** (k / 3) * mn * 2 ** ((k - 1.0) / 3) * mn)
    fr = np.sqrt(2.0 ** (k / 3) * mn * 2 ** ((k + 1.0) / 3) * mn)
    A = np.zeros((num_bands, len(f)))
    for i in range(len(cf)):
        b = np.argmin((f - fl[i]) ** 2)
        fl[i] = f[b]
        fl_ii = b
        b = np.argmin((f - fr[i]) ** 2)
        fr[i] = f[b]
        fr_ii = b
        A[i, np.arange(fl_ii, fr_ii)] = 1
    rnk = np.sum(A, axis=1)
    num_bands = np.where((rnk[1:] >= rnk[:-1]) & (rnk[1:] != 0))[-1][-1] + 1
    A = A[: num_bands + 1, :]
    return A


def _build_weights():
    window = np.hanning(FFT_IN_FRAME)
    window = np.concatenate([np.zeros(FFT_PAD), window, np.zeros(FFT_PAD)])
    fftm = np.fft.fft(np.eye(FFT_SIZE))
    f_real = np.real(fftm[:ROWS, :]) * window            # (257, 512)
    f_imag = np.imag(fftm[:ROWS, :]) * window            # (257, 512)
    oct_full = _get_octave_mat(FS, FFT_SIZE, NUM_BANDS_INIT, CENTER_FREQ)  # (NB, 257)
    # Octave bands end far below Nyquist -> dropping bin 256 keeps everything
    # 128-lane aligned with zero numerical effect.
    assert not oct_full[:, KBINS:].any()
    # fused DFT weight: frames @ W gives [real_bins(256) | imag_bins(256)]
    w_fused = np.concatenate([f_real[:KBINS, :].T, f_imag[:KBINS, :].T], axis=1)  # (512, 512)
    # stacked octave weight: (real^2 + imag^2) @ oct.T  ==  stft^2 @ oct2
    oct_t = oct_full[:, :KBINS].T                         # (256, NB)
    oct2 = np.concatenate([oct_t, oct_t], axis=0)         # (512, NB)
    return (w_fused.astype(np.float32), oct2.astype(np.float32),
            f_real.astype(np.float32), f_imag.astype(np.float32),
            oct_full.astype(np.float32))


W_FUSED_NP, OCT2_NP, F_REAL_NP, F_IMAG_NP, OCT_FULL_NP = _build_weights()
NB = OCT2_NP.shape[1]


# ---- fused kernel: STFT + third-octave bands + sliding-window correlation --------
def _stoi_kernel(x_sig_ref, y_sig_ref, w_ref, oct2_ref, out_ref, xb_ref, yb_ref,
                 *, tm, num_tiles, num_seg):
    # x_sig_ref / y_sig_ref : (n_hops, HOP) padded signal, 128 samples per row
    # w_ref                 : (FFT_SIZE, 2*KBINS) fused [Re | Im] windowed DFT
    # oct2_ref              : (2*KBINS, NB) stacked third-octave matrix
    # out_ref               : (1, NB) per-(band) sum over segments of sum_t(xn*yn)
    # xb_ref / yb_ref       : (tp, NB) VMEM scratch band features (target / prediction)

    def compute_bands(sig_ref, bands_ref):
        def tile_body(l, carry):
            base = pl.multiple_of(l * tm, 8)
            # frame t spans hop-rows [t, t+4); build (tm, 512) frames from 4 shifted slabs.
            slabs = [sig_ref[pl.ds(base + j, tm), :] for j in range(SUBFRAMES)]
            frames = jnp.concatenate(slabs, axis=1)                       # (tm, 512)
            stft = jnp.dot(frames, w_ref[...],
                           preferred_element_type=jnp.float32)            # (tm, 512) = [re|im]
            power = stft * stft                                           # re^2 / im^2
            bands = jnp.dot(power, oct2_ref[...],
                            preferred_element_type=jnp.float32)           # (tm, NB)
            bands_ref[pl.ds(base, tm), :] = jnp.sqrt(bands)
            return carry

        jax.lax.fori_loop(0, num_tiles, tile_body, 0, unroll=num_tiles <= 2)

    compute_bands(x_sig_ref, xb_ref)   # x <- target
    compute_bands(y_sig_ref, yb_ref)   # y <- prediction

    nb = out_ref.shape[-1]

    # torch loop: for m in range(num_frames, T) -> windows [m-30, m), i.e. starts 0..T-31.
    def seg_body(s, acc):
        x_seg = xb_ref[pl.ds(s, NUM_FRAMES), :]      # (30, NB)
        y_seg = yb_ref[pl.ds(s, NUM_FRAMES), :]
        ex = jnp.sum(x_seg * x_seg, axis=0, keepdims=True)
        ey = jnp.sum(y_seg * y_seg, axis=0, keepdims=True)
        alpha = jnp.sqrt(ex) * jax.lax.rsqrt(ey + 1e-7)
        y_p = jnp.minimum(alpha * y_seg, BETA * x_seg)
        xm = x_seg - jnp.mean(x_seg, axis=0, keepdims=True)
        ym = y_p - jnp.mean(y_p, axis=0, keepdims=True)
        xn = xm * jax.lax.rsqrt(jnp.sum(xm * xm, axis=0, keepdims=True))
        yn = ym * jax.lax.rsqrt(jnp.sum(ym * ym, axis=0, keepdims=True))
        return acc + jnp.sum(xn * yn, axis=0, keepdims=True)

    acc = jax.lax.fori_loop(0, num_seg, seg_body,
                            jnp.zeros((1, nb), jnp.float32),
                            unroll=num_seg <= 8)
    out_ref[...] = acc


# ---- full forward -----------------------------------------------------------------
def stoi_forward(prediction, target, interference=None):
    # interference is accepted but unused, exactly like the PyTorch forward.
    del interference
    target = jnp.asarray(target, jnp.float32)
    prediction = jnp.asarray(prediction, jnp.float32)
    B, L = target.shape
    assert prediction.shape == (B, L)

    # conv1d(stride=HOP, padding=FFT_PAD) frame count
    T = (L + 2 * FFT_PAD - FFT_SIZE) // HOP + 1
    num_seg = T - NUM_FRAMES
    assert num_seg >= 1, "sequence too short: need at least NUM_FRAMES+1 STFT frames"

    tm = min(256, _round_up(T, 8))                 # MXU rows per STFT tile
    num_tiles = pl.cdiv(T, tm)
    tp = tm * num_tiles                            # padded frame count (scratch rows)
    n_hops = _round_up(tp + SUBFRAMES - 1, 8)      # hop-rows needed (frame t reads rows t..t+3)
    pad_right = n_hops * HOP - FFT_PAD - L

    def as_hops(sig):
        sig = jnp.pad(sig, ((0, 0), (FFT_PAD, pad_right)))
        return sig.reshape(B, n_hops, HOP)

    x_sig = as_hops(target)        # x <- target     (matches torch naming)
    y_sig = as_hops(prediction)    # y <- prediction

    w = jnp.asarray(W_FUSED_NP)
    oct2 = jnp.asarray(OCT2_NP)
    nb = oct2.shape[1]

    kernel = functools.partial(_stoi_kernel, tm=tm, num_tiles=num_tiles, num_seg=num_seg)

    acc = pl.pallas_call(
        kernel,
        out_shape=jax.ShapeDtypeStruct((B, 1, nb), jnp.float32),
        grid_spec=pltpu.PrefetchScalarGridSpec(
            num_scalar_prefetch=0,
            grid=(B,),
            in_specs=[
                pl.BlockSpec((pl.Squeezed(), n_hops, HOP), lambda b: (b, 0, 0)),
                pl.BlockSpec((pl.Squeezed(), n_hops, HOP), lambda b: (b, 0, 0)),
                pl.BlockSpec((FFT_SIZE, 2 * KBINS), lambda b: (0, 0)),
                pl.BlockSpec((2 * KBINS, nb), lambda b: (0, 0)),
            ],
            out_specs=pl.BlockSpec((pl.Squeezed(), 1, nb), lambda b: (b, 0, 0)),
            scratch_shapes=[pltpu.VMEM((tp, nb), jnp.float32),
                            pltpu.VMEM((tp, nb), jnp.float32)],
        ),
        compiler_params=pltpu.CompilerParams(dimension_semantics=("parallel",)),
    )(x_sig, y_sig, w, oct2)

    # torch: corr = sum_seg mean_{b,band}(sum_t xn*yn);  loss = -corr / num_seg
    return -jnp.mean(acc) / num_seg


# ---- pure-JAX reference mirroring the torch module (for validation only) ----------
def _stoi_reference(prediction, target):
    hi = jax.lax.Precision.HIGHEST
    f_real = jnp.asarray(F_REAL_NP)      # (257, 512)
    f_imag = jnp.asarray(F_IMAG_NP)
    octm = jnp.asarray(OCT_FULL_NP)      # (NB, 257)

    def bands(sig):
        _, L = sig.shape
        p = jnp.pad(sig.astype(jnp.float32), ((0, 0), (FFT_PAD, FFT_PAD)))
        T = (L + 2 * FFT_PAD - FFT_SIZE) // HOP + 1
        idx = np.arange(T)[:, None] * HOP + np.arange(FFT_SIZE)[None, :]
        fr = p[:, idx]                                         # (B, T, 512)
        re = jnp.matmul(fr, f_real.T, precision=hi)
        im = jnp.matmul(fr, f_imag.T, precision=hi)
        mag = jnp.sqrt(re * re + im * im)
        return jnp.sqrt(jnp.matmul(mag ** 2, octm.T, precision=hi))  # (B, T, NB)

    x = bands(target)
    y = bands(prediction)
    T = x.shape[1]
    corr = 0.0
    for s in range(T - NUM_FRAMES):
        xs = x[:, s:s + NUM_FRAMES, :]
        ys = y[:, s:s + NUM_FRAMES, :]
        alpha = jnp.sqrt(jnp.sum(xs ** 2, 1, keepdims=True) /
                         (jnp.sum(ys ** 2, 1, keepdims=True) + 1e-7))
        yp = jnp.minimum(alpha * ys, BETA * xs)
        xn = xs - jnp.mean(xs, 1, keepdims=True)
        xn = xn / jnp.sqrt(jnp.sum(xn ** 2, 1, keepdims=True))
        yn = yp - jnp.mean(yp, 1, keepdims=True)
        yn = yn / jnp.sqrt(jnp.sum(yn ** 2, 1, keepdims=True))
        corr = corr + jnp.mean(jnp.sum(xn * yn, axis=1))
    return -corr / (T - NUM_FRAMES)


if __name__ == "__main__":
    key = jax.random.PRNGKey(0)
    k1, k2, k3 = jax.random.split(key, 3)
    B = 2
    # L chosen so the STFT yields T = 34 frames -> 4 sliding-window segments.
    L = FFT_IN_FRAME + HOP * 33  # 4480
    prediction = jax.random.normal(k1, (B, L), dtype=jnp.float32)
    target = jax.random.normal(k2, (B, L), dtype=jnp.float32)
    interference = jax.random.normal(k3, (B, L), dtype=jnp.float32)

    loss = stoi_forward(prediction, target, interference)
    jax.block_until_ready(loss)
    assert bool(jnp.isfinite(loss))

    # Sanity check against a plain-JAX transcription of the torch module.
    # Tolerance is loose to accommodate MXU f32 multi-pass vs XLA-dot rounding.
    ref = _stoi_reference(prediction, target)
    np.testing.assert_allclose(np.asarray(loss), np.asarray(ref), rtol=1e-2, atol=1e-2)

    print("KERNEL_OK")
</pallas_src>

<mosaic_0001>
module attributes {stable_mosaic.version = 11 : i64} {
  func.func @_stoi_kernel(%arg0: i32, %arg1: memref<1x48x128xf32, #tpu.memory_space<vmem>>, %arg2: memref<1x48x128xf32, #tpu.memory_space<vmem>>, %arg3: memref<512x512xf32, #tpu.memory_space<vmem>>, %arg4: memref<512x15xf32, #tpu.memory_space<vmem>>, %arg5: memref<1x1x15xf32, #tpu.memory_space<vmem>>, %arg6: memref<40x15xf32, #tpu.memory_space<vmem>>, %arg7: memref<40x15xf32, #tpu.memory_space<vmem>>) attributes {dimension_semantics = [#tpu.dimension_semantics<parallel>], iteration_bounds = array<i64: 2>, scalar_prefetch = 0 : i64, scratch_operands = 2 : i64, tpu.core_type = #tpu.core_type<tc>, window_params = [{transform_indices = @transform_0, window_bounds = array<i64: 1, 48, 128>}, {transform_indices = @transform_1, window_bounds = array<i64: 1, 48, 128>}, {pipeline_mode = #tpu.pipeline_mode<synchronous>, transform_indices = @transform_2, window_bounds = array<i64: 512, 512>}, {pipeline_mode = #tpu.pipeline_mode<synchronous>, transform_indices = @transform_3, window_bounds = array<i64: 512, 15>}, {transform_indices = @transform_4, window_bounds = array<i64: 1, 1, 15>}]} {
    %c0_i32 = arith.constant 0 : i32
    %c40_i32 = arith.constant 40 : i32
    %0 = arith.muli %c0_i32, %c40_i32 : i32
    %1 = tpu.assume_multiple %0, 8 : i32
    %c0_i32_0 = arith.constant 0 : i32
    %2 = arith.addi %1, %c0_i32_0 : i32
    %c0 = arith.constant 0 : index
    %3 = arith.index_cast %2 : i32 to index
    %c0_1 = arith.constant 0 : index
    %4 = vector.load %arg1[%c0, %3, %c0_1] : memref<1x48x128xf32, #tpu.memory_space<vmem>>, vector<1x40x128xf32>
    %5 = vector.shape_cast %4 : vector<1x40x128xf32> to vector<40x128xf32>
    %c1_i32 = arith.constant 1 : i32
    %6 = arith.addi %1, %c1_i32 : i32
    %c0_2 = arith.constant 0 : index
    %7 = arith.index_cast %6 : i32 to index
    %c0_3 = arith.constant 0 : index
    %8 = vector.load %arg1[%c0_2, %7, %c0_3] : memref<1x48x128xf32, #tpu.memory_space<vmem>>, vector<1x40x128xf32>
    %9 = vector.shape_cast %8 : vector<1x40x128xf32> to vector<40x128xf32>
    %c2_i32 = arith.constant 2 : i32
    %10 = arith.addi %1, %c2_i32 : i32
    %c0_4 = arith.constant 0 : index
    %11 = arith.index_cast %10 : i32 to index
    %c0_5 = arith.constant 0 : index
    %12 = vector.load %arg1[%c0_4, %11, %c0_5] : memref<1x48x128xf32, #tpu.memory_space<vmem>>, vector<1x40x128xf32>
    %13 = vector.shape_cast %12 : vector<1x40x128xf32> to vector<40x128xf32>
    %c3_i32 = arith.constant 3 : i32
    %14 = arith.addi %1, %c3_i32 : i32
    %c0_6 = arith.constant 0 : index
    %15 = arith.index_cast %14 : i32 to index
    %c0_7 = arith.constant 0 : index
    %16 = vector.load %arg1[%c0_6, %15, %c0_7] : memref<1x48x128xf32, #tpu.memory_space<vmem>>, vector<1x40x128xf32>
    %17 = vector.shape_cast %16 : vector<1x40x128xf32> to vector<40x128xf32>
    %18 = tpu.concatenate %5, %9, %13, %17 in 1 : vector<40x128xf32>, vector<40x128xf32>, vector<40x128xf32>, vector<40x128xf32> -> vector<40x512xf32>
    %c0_8 = arith.constant 0 : index
    %c0_9 = arith.constant 0 : index
    %19 = vector.load %arg3[%c0_8, %c0_9] : memref<512x512xf32, #tpu.memory_space<vmem>>, vector<512x512xf32>
    %cst = arith.constant dense<0.000000e+00> : vector<40x512xf32>
    %20 = tpu.matmul %18, %19, %cst {dimension_numbers = #tpu.dot_dimension_numbers<[1], [0], [0], [1], [0, 0, 1, 1], [], []>} : vector<40x512xf32>, vector<512x512xf32>, vector<40x512xf32> -> vector<40x512xf32>
    %21 = arith.mulf %20, %20 : vector<40x512xf32>
    %c0_10 = arith.constant 0 : index
    %c0_11 = arith.constant 0 : index
    %22 = vector.load %arg4[%c0_10, %c0_11] : memref<512x15xf32, #tpu.memory_space<vmem>>, vector<512x15xf32>
    %cst_12 = arith.constant dense<0.000000e+00> : vector<40x15xf32>
    %23 = tpu.matmul %21, %22, %cst_12 {dimension_numbers = #tpu.dot_dimension_numbers<[1], [0], [0], [1], [0, 0, 1, 1], [], []>} : vector<40x512xf32>, vector<512x15xf32>, vector<40x15xf32> -> vector<40x15xf32>
    %24 = math.sqrt %23 : vector<40x15xf32>
    %25 = arith.index_cast %1 : i32 to index
    %c0_13 = arith.constant 0 : index
    %26 = vector.load %arg6[%25, %c0_13] : memref<40x15xf32, #tpu.memory_space<vmem>>, vector<40x15xf32>
    tpu.vector_store %arg6[%25, %c0_13], %24 {strides = array<i32>} : memref<40x15xf32, #tpu.memory_space<vmem>>, vector<40x15xf32>,
    %c1_i32_14 = arith.constant 1 : i32
    %c0_i32_15 = arith.constant 0 : i32
    %c40_i32_16 = arith.constant 40 : i32
    %27 = arith.muli %c0_i32_15, %c40_i32_16 : i32
    %28 = tpu.assume_multiple %27, 8 : i32
    %c0_i32_17 = arith.constant 0 : i32
    %29 = arith.addi %28, %c0_i32_17 : i32
    %c0_18 = arith.constant 0 : index
    %30 = arith.index_cast %29 : i32 to index
    %c0_19 = arith.constant 0 : index
    %31 = vector.load %arg2[%c0_18, %30, %c0_19] : memref<1x48x128xf32, #tpu.memory_space<vmem>>, vector<1x40x128xf32>
    %32 = vector.shape_cast %31 : vector<1x40x128xf32> to vector<40x128xf32>
    %c1_i32_20 = arith.constant 1 : i32
    %33 = arith.addi %28, %c1_i32_20 : i32
    %c0_21 = arith.constant 0 : index
    %34 = arith.index_cast %33 : i32 to index
    %c0_22 = arith.constant 0 : index
    %35 = vector.load %arg2[%c0_21, %34, %c0_22] : memref<1x48x128xf32, #tpu.memory_space<vmem>>, vector<1x40x128xf32>
    %36 = vector.shape_cast %35 : vector<1x40x128xf32> to vector<40x128xf32>
    %c2_i32_23 = arith.constant 2 : i32
    %37 = arith.addi %28, %c2_i32_23 : i32
    %c0_24 = arith.constant 0 : index
    %38 = arith.index_cast %37 : i32 to index
    %c0_25 = arith.constant 0 : index
    %39 = vector.load %arg2[%c0_24, %38, %c0_25] : memref<1x48x128xf32, #tpu.memory_space<vmem>>, vector<1x40x128xf32>
    %40 = vector.shape_cast %39 : vector<1x40x128xf32> to vector<40x128xf32>
    %c3_i32_26 = arith.constant 3 : i32
    %41 = arith.addi %28, %c3_i32_26 : i32
    %c0_27 = arith.constant 0 : index
    %42 = arith.index_cast %41 : i32 to index
    %c0_28 = arith.constant 0 : index
    %43 = vector.load %arg2[%c0_27, %42, %c0_28] : memref<1x48x128xf32, #tpu.memory_space<vmem>>, vector<1x40x128xf32>
    %44 = vector.shape_cast %43 : vector<1x40x128xf32> to vector<40x128xf32>
    %45 = tpu.concatenate %32, %36, %40, %44 in 1 : vector<40x128xf32>, vector<40x128xf32>, vector<40x128xf32>, vector<40x128xf32> -> vector<40x512xf32>
    %c0_29 = arith.constant 0 : index
    %c0_30 = arith.constant 0 : index
    %46 = vector.load %arg3[%c0_29, %c0_30] : memref<512x512xf32, #tpu.memory_space<vmem>>, vector<512x512xf32>
    %cst_31 = arith.constant dense<0.000000e+00> : vector<40x512xf32>
    %47 = tpu.matmul %45, %46, %cst_31 {dimension_numbers = #tpu.dot_dimension_numbers<[1], [0], [0], [1], [0, 0, 1, 1], [], []>} : vector<40x512xf32>, vector<512x512xf32>, vector<40x512xf32> -> vector<40x512xf32>
    %48 = arith.mulf %47, %47 : vector<40x512xf32>
    %c0_32 = arith.constant 0 : index
    %c0_33 = arith.constant 0 : index
    %49 = vector.load %arg4[%c0_32, %c0_33] : memref<512x15xf32, #tpu.memory_space<vmem>>, vector<512x15xf32>
    %cst_34 = arith.constant dense<0.000000e+00> : vector<40x15xf32>
    %50 = tpu.matmul %48, %49, %cst_34 {dimension_numbers = #tpu.dot_dimension_numbers<[1], [0], [0], [1], [0, 0, 1, 1], [], []>} : vector<40x512xf32>, vector<512x15xf32>, vector<40x15xf32> -> vector<40x15xf32>
    %51 = math.sqrt %50 : vector<40x15xf32>
    %52 = arith.index_cast %28 : i32 to index
    %c0_35 = arith.constant 0 : index
    %53 = vector.load %arg7[%52, %c0_35] : memref<40x15xf32, #tpu.memory_space<vmem>>, vector<40x15xf32>
    tpu.vector_store %arg7[%52, %c0_35], %51 {strides = array<i32>} : memref<40x15xf32, #tpu.memory_space<vmem>>, vector<40x15xf32>,
    %c1_i32_36 = arith.constant 1 : i32
    %cst_37 = arith.constant 0.000000e+00 : f32
    %54 = vector.broadcast %cst_37 : f32 to vector<1x15xf32>
    %c0_i32_38 = arith.constant 0 : i32
    %55 = arith.index_cast %c0_i32_38 : i32 to index
    %c0_39 = arith.constant 0 : index
    %56 = vector.load %arg6[%55, %c0_39] : memref<40x15xf32, #tpu.memory_space<vmem>>, vector<30x15xf32>
    %57 = arith.index_cast %c0_i32_38 : i32 to index
    %c0_40 = arith.constant 0 : index
    %58 = vector.load %arg7[%57, %c0_40] : memref<40x15xf32, #tpu.memory_space<vmem>>, vector<30x15xf32>
    %59 = arith.mulf %56, %56 : vector<30x15xf32>
    %cst_41 = arith.constant dense<0.000000e+00> : vector<15xf32>
    %60 = vector.multi_reduction <add>, %59, %cst_41 [0] : vector<30x15xf32> to vector<15xf32>
    %61 = vector.shape_cast %60 : vector<15xf32> to vector<1x15xf32>
    %62 = arith.mulf %58, %58 : vector<30x15xf32>
    %cst_42 = arith.constant dense<0.000000e+00> : vector<15xf32>
    %63 = vector.multi_reduction <add>, %62, %cst_42 [0] : vector<30x15xf32> to vector<15xf32>
    %64 = vector.shape_cast %63 : vector<15xf32> to vector<1x15xf32>
    %65 = math.sqrt %61 : vector<1x15xf32>
    %cst_43 = arith.constant 1.000000e-07 : f32
    %66 = vector.broadcast %cst_43 : f32 to vector<1x15xf32>
    %67 = arith.addf %64, %66 : vector<1x15xf32>
    %68 = math.rsqrt %67 : vector<1x15xf32>
    %69 = arith.mulf %65, %68 : vector<1x15xf32>
    %70 = vector.broadcast %69 : vector<1x15xf32> to vector<30x15xf32>
    %71 = arith.mulf %70, %58 : vector<30x15xf32>
    %cst_44 = arith.constant 6.62341309 : f32
    %72 = vector.broadcast %cst_44 : f32 to vector<30x15xf32>
    %73 = arith.mulf %72, %56 : vector<30x15xf32>
    %74 = arith.minimumf %71, %73 : vector<30x15xf32>
    %cst_45 = arith.constant dense<0.000000e+00> : vector<15xf32>
    %75 = vector.multi_reduction <add>, %56, %cst_45 [0] : vector<30x15xf32> to vector<15xf32>
    %76 = vector.shape_cast %75 : vector<15xf32> to vector<1x15xf32>
    %cst_46 = arith.constant 3.000000e+01 : f32
    %77 = vector.broadcast %cst_46 : f32 to vector<1x15xf32>
    %78 = arith.divf %76, %77 : vector<1x15xf32>
    %79 = vector.broadcast %78 : vector<1x15xf32> to vector<30x15xf32>
    %80 = arith.subf %56, %79 : vector<30x15xf32>
    %cst_47 = arith.constant dense<0.000000e+00> : vector<15xf32>
    %81 = vector.multi_reduction <add>, %74, %cst_47 [0] : vector<30x15xf32> to vector<15xf32>
    %82 = vector.shape_cast %81 : vector<15xf32> to vector<1x15xf32>
    %cst_48 = arith.constant 3.000000e+01 : f32
    %83 = vector.broadcast %cst_48 : f32 to vector<1x15xf32>
    %84 = arith.divf %82, %83 : vector<1x15xf32>
    %85 = vector.broadcast %84 : vector<1x15xf32> to vector<30x15xf32>
    %86 = arith.subf %74, %85 : vector<30x15xf32>
    %87 = arith.mulf %80, %80 : vector<30x15xf32>
    %cst_49 = arith.constant dense<0.000000e+00> : vector<15xf32>
    %88 = vector.multi_reduction <add>, %87, %cst_49 [0] : vector<30x15xf32> to vector<15xf32>
    %89 = vector.shape_cast %88 : vector<15xf32> to vector<1x15xf32>
    %90 = math.rsqrt %89 : vector<1x15xf32>
    %91 = vector.broadcast %90 : vector<1x15xf32> to vector<30x15xf32>
    %92 = arith.mulf %80, %91 : vector<30x15xf32>
    %93 = arith.mulf %86, %86 : vector<30x15xf32>
    %cst_50 = arith.constant dense<0.000000e+00> : vector<15xf32>
    %94 = vector.multi_reduction <add>, %93, %cst_50 [0] : vector<30x15xf32> to vector<15xf32>
    %95 = vector.shape_cast %94 : vector<15xf32> to vector<1x15xf32>
    %96 = math.rsqrt %95 : vector<1x15xf32>
    %97 = vector.broadcast %96 : vector<1x15xf32> to vector<30x15xf32>
    %98 = arith.mulf %86, %97 : vector<30x15xf32>
    %99 = arith.mulf %92, %98 : vector<30x15xf32>
    %cst_51 = arith.constant dense<0.000000e+00> : vector<15xf32>
    %100 = vector.multi_reduction <add>, %99, %cst_51 [0] : vector<30x15xf32> to vector<15xf32>
    %101 = vector.shape_cast %100 : vector<15xf32> to vector<1x15xf32>
    %102 = arith.addf %54, %101 : vector<1x15xf32>
    %c1_i32_52 = arith.constant 1 : i32
    %103 = arith.index_cast %c1_i32_52 : i32 to index
    %c0_53 = arith.constant 0 : index
    %104 = vector.load %arg6[%103, %c0_53] : memref<40x15xf32, #tpu.memory_space<vmem>>, vector<30x15xf32>
    %105 = arith.index_cast %c1_i32_52 : i32 to index
    %c0_54 = arith.constant 0 : index
    %106 = vector.load %arg7[%105, %c0_54] : memref<40x15xf32, #tpu.memory_space<vmem>>, vector<30x15xf32>
    %107 = arith.mulf %104, %104 : vector<30x15xf32>
    %cst_55 = arith.constant dense<0.000000e+00> : vector<15xf32>
    %108 = vector.multi_reduction <add>, %107, %cst_55 [0] : vector<30x15xf32> to vector<15xf32>
    %109 = vector.shape_cast %108 : vector<15xf32> to vector<1x15xf32>
    %110 = arith.mulf %106, %106 : vector<30x15xf32>
    %cst_56 = arith.constant dense<0.000000e+00> : vector<15xf32>
    %111 = vector.multi_reduction <add>, %110, %cst_56 [0] : vector<30x15xf32> to vector<15xf32>
    %112 = vector.shape_cast %111 : vector<15xf32> to vector<1x15xf32>
    %113 = math.sqrt %109 : vector<1x15xf32>
    %cst_57 = arith.constant 1.000000e-07 : f32
    %114 = vector.broadcast %cst_57 : f32 to vector<1x15xf32>
    %115 = arith.addf %112, %114 : vector<1x15xf32>
    %116 = math.rsqrt %115 : vector<1x15xf32>
    %117 = arith.mulf %113, %116 : vector<1x15xf32>
    %118 = vector.broadcast %117 : vector<1x15xf32> to vector<30x15xf32>
    %119 = arith.mulf %118, %106 : vector<30x15xf32>
    %cst_58 = arith.constant 6.62341309 : f32
    %120 = vector.broadcast %cst_58 : f32 to vector<30x15xf32>
    %121 = arith.mulf %120, %104 : vector<30x15xf32>
    %122 = arith.minimumf %119, %121 : vector<30x15xf32>
    %cst_59 = arith.constant dense<0.000000e+00> : vector<15xf32>
    %123 = vector.multi_reduction <add>, %104, %cst_59 [0] : vector<30x15xf32> to vector<15xf32>
    %124 = vector.shape_cast %123 : vector<15xf32> to vector<1x15xf32>
    %cst_60 = arith.constant 3.000000e+01 : f32
    %125 = vector.broadcast %cst_60 : f32 to vector<1x15xf32>
    %126 = arith.divf %124, %125 : vector<1x15xf32>
    %127 = vector.broadcast %126 : vector<1x15xf32> to vector<30x15xf32>
    %128 = arith.subf %104, %127 : vector<30x15xf32>
    %cst_61 = arith.constant dense<0.000000e+00> : vector<15xf32>
    %129 = vector.multi_reduction <add>, %122, %cst_61 [0] : vector<30x15xf32> to vector<15xf32>
    %130 = vector.shape_cast %129 : vector<15xf32> to vector<1x15xf32>
    %cst_62 = arith.constant 3.000000e+01 : f32
    %131 = vector.broadcast %cst_62 : f32 to vector<1x15xf32>
    %132 = arith.divf %130, %131 : vector<1x15xf32>
    %133 = vector.broadcast %132 : vector<1x15xf32> to vector<30x15xf32>
    %134 = arith.subf %122, %133 : vector<30x15xf32>
    %135 = arith.mulf %128, %128 : vector<30x15xf32>
    %cst_63 = arith.constant dense<0.000000e+00> : vector<15xf32>
    %136 = vector.multi_reduction <add>, %135, %cst_63 [0] : vector<30x15xf32> to vector<15xf32>
    %137 = vector.shape_cast %136 : vector<15xf32> to vector<1x15xf32>
    %138 = math.rsqrt %137 : vector<1x15xf32>
    %139 = vector.broadcast %138 : vector<1x15xf32> to vector<30x15xf32>
    %140 = arith.mulf %128, %139 : vector<30x15xf32>
    %141 = arith.mulf %134, %134 : vector<30x15xf32>
    %cst_64 = arith.constant dense<0.000000e+00> : vector<15xf32>
    %142 = vector.multi_reduction <add>, %141, %cst_64 [0] : vector<30x15xf32> to vector<15xf32>
    %143 = vector.shape_cast %142 : vector<15xf32> to vector<1x15xf32>
    %144 = math.rsqrt %143 : vector<1x15xf32>
    %145 = vector.broadcast %144 : vector<1x15xf32> to vector<30x15xf32>
    %146 = arith.mulf %134, %145 : vector<30x15xf32>
    %147 = arith.mulf %140, %146 : vector<30x15xf32>
    %cst_65 = arith.constant dense<0.000000e+00> : vector<15xf32>
    %148 = vector.multi_reduction <add>, %147, %cst_65 [0] : vector<30x15xf32> to vector<15xf32>
    %149 = vector.shape_cast %148 : vector<15xf32> to vector<1x15xf32>
    %150 = arith.addf %102, %149 : vector<1x15xf32>
    %c2_i32_66 = arith.constant 2 : i32
    %151 = arith.index_cast %c2_i32_66 : i32 to index
    %c0_67 = arith.constant 0 : index
    %152 = vector.load %arg6[%151, %c0_67] : memref<40x15xf32, #tpu.memory_space<vmem>>, vector<30x15xf32>
    %153 = arith.index_cast %c2_i32_66 : i32 to index
    %c0_68 = arith.constant 0 : index
    %154 = vector.load %arg7[%153, %c0_68] : memref<40x15xf32, #tpu.memory_space<vmem>>, vector<30x15xf32>
    %155 = arith.mulf %152, %152 : vector<30x15xf32>
    %cst_69 = arith.constant dense<0.000000e+00> : vector<15xf32>
    %156 = vector.multi_reduction <add>, %155, %cst_69 [0] : vector<30x15xf32> to vector<15xf32>
    %157 = vector.shape_cast %156 : vector<15xf32> to vector<1x15xf32>
    %158 = arith.mulf %154, %154 : vector<30x15xf32>
    %cst_70 = arith.constant dense<0.000000e+00> : vector<15xf32>
    %159 = vector.multi_reduction <add>, %158, %cst_70 [0] : vector<30x15xf32> to vector<15xf32>
    %160 = vector.shape_cast %159 : vector<15xf32> to vector<1x15xf32>
    %161 = math.sqrt %157 : vector<1x15xf32>
    %cst_71 = arith.constant 1.000000e-07 : f32
    %162 = vector.broadcast %cst_71 : f32 to vector<1x15xf32>
    %163 = arith.addf %160, %162 : vector<1x15xf32>
    %164 = math.rsqrt %163 : vector<1x15xf32>
    %165 = arith.mulf %161, %164 : vector<1x15xf32>
    %166 = vector.broadcast %165 : vector<1x15xf32> to vector<30x15xf32>
    %167 = arith.mulf %166, %154 : vector<30x15xf32>
    %cst_72 = arith.constant 6.62341309 : f32
    %168 = vector.broadcast %cst_72 : f32 to vector<30x15xf32>
    %169 = arith.mulf %168, %152 : vector<30x15xf32>
    %170 = arith.minimumf %167, %169 : vector<30x15xf32>
    %cst_73 = arith.constant dense<0.000000e+00> : vector<15xf32>
    %171 = vector.multi_reduction <add>, %152, %cst_73 [0] : vector<30x15xf32> to vector<15xf32>
    %172 = vector.shape_cast %171 : vector<15xf32> to vector<1x15xf32>
    %cst_74 = arith.constant 3.000000e+01 : f32
    %173 = vector.broadcast %cst_74 : f32 to vector<1x15xf32>
    %174 = arith.divf %172, %173 : vector<1x15xf32>
    %175 = vector.broadcast %174 : vector<1x15xf32> to vector<30x15xf32>
    %176 = arith.subf %152, %175 : vector<30x15xf32>
    %cst_75 = arith.constant dense<0.000000e+00> : vector<15xf32>
    %177 = vector.multi_reduction <add>, %170, %cst_75 [0] : vector<30x15xf32> to vector<15xf32>
    %178 = vector.shape_cast %177 : vector<15xf32> to vector<1x15xf32>
    %cst_76 = arith.constant 3.000000e+01 : f32
    %179 = vector.broadcast %cst_76 : f32 to vector<1x15xf32>
    %180 = arith.divf %178, %179 : vector<1x15xf32>
    %181 = vector.broadcast %180 : vector<1x15xf32> to vector<30x15xf32>
    %182 = arith.subf %170, %181 : vector<30x15xf32>
    %183 = arith.mulf %176, %176 : vector<30x15xf32>
    %cst_77 = arith.constant dense<0.000000e+00> : vector<15xf32>
    %184 = vector.multi_reduction <add>, %183, %cst_77 [0] : vector<30x15xf32> to vector<15xf32>
    %185 = vector.shape_cast %184 : vector<15xf32> to vector<1x15xf32>
    %186 = math.rsqrt %185 : vector<1x15xf32>
    %187 = vector.broadcast %186 : vector<1x15xf32> to vector<30x15xf32>
    %188 = arith.mulf %176, %187 : vector<30x15xf32>
    %189 = arith.mulf %182, %182 : vector<30x15xf32>
    %cst_78 = arith.constant dense<0.000000e+00> : vector<15xf32>
    %190 = vector.multi_reduction <add>, %189, %cst_78 [0] : vector<30x15xf32> to vector<15xf32>
    %191 = vector.shape_cast %190 : vector<15xf32> to vector<1x15xf32>
    %192 = math.rsqrt %191 : vector<1x15xf32>
    %193 = vector.broadcast %192 : vector<1x15xf32> to vector<30x15xf32>
    %194 = arith.mulf %182, %193 : vector<30x15xf32>
    %195 = arith.mulf %188, %194 : vector<30x15xf32>
    %cst_79 = arith.constant dense<0.000000e+00> : vector<15xf32>
    %196 = vector.multi_reduction <add>, %195, %cst_79 [0] : vector<30x15xf32> to vector<15xf32>
    %197 = vector.shape_cast %196 : vector<15xf32> to vector<1x15xf32>
    %198 = arith.addf %150, %197 : vector<1x15xf32>
    %c3_i32_80 = arith.constant 3 : i32
    %199 = arith.index_cast %c3_i32_80 : i32 to index
    %c0_81 = arith.constant 0 : index
    %200 = vector.load %arg6[%199, %c0_81] : memref<40x15xf32, #tpu.memory_space<vmem>>, vector<30x15xf32>
    %201 = arith.index_cast %c3_i32_80 : i32 to index
    %c0_82 = arith.constant 0 : index
    %202 = vector.load %arg7[%201, %c0_82] : memref<40x15xf32, #tpu.memory_space<vmem>>, vector<30x15xf32>
    %203 = arith.mulf %200, %200 : vector<30x15xf32>
    %cst_83 = arith.constant dense<0.000000e+00> : vector<15xf32>
    %204 = vector.multi_reduction <add>, %203, %cst_83 [0] : vector<30x15xf32> to vector<15xf32>
    %205 = vector.shape_cast %204 : vector<15xf32> to vector<1x15xf32>
    %206 = arith.mulf %202, %202 : vector<30x15xf32>
    %cst_84 = arith.constant dense<0.000000e+00> : vector<15xf32>
    %207 = vector.multi_reduction <add>, %206, %cst_84 [0] : vector<30x15xf32> to vector<15xf32>
    %208 = vector.shape_cast %207 : vector<15xf32> to vector<1x15xf32>
    %209 = math.sqrt %205 : vector<1x15xf32>
    %cst_85 = arith.constant 1.000000e-07 : f32
    %210 = vector.broadcast %cst_85 : f32 to vector<1x15xf32>
    %211 = arith.addf %208, %210 : vector<1x15xf32>
    %212 = math.rsqrt %211 : vector<1x15xf32>
    %213 = arith.mulf %209, %212 : vector<1x15xf32>
    %214 = vector.broadcast %213 : vector<1x15xf32> to vector<30x15xf32>
    %215 = arith.mulf %214, %202 : vector<30x15xf32>
    %cst_86 = arith.constant 6.62341309 : f32
    %216 = vector.broadcast %cst_86 : f32 to vector<30x15xf32>
    %217 = arith.mulf %216, %200 : vector<30x15xf32>
    %218 = arith.minimumf %215, %217 : vector<30x15xf32>
    %cst_87 = arith.constant dense<0.000000e+00> : vector<15xf32>
    %219 = vector.multi_reduction <add>, %200, %cst_87 [0] : vector<30x15xf32> to vector<15xf32>
    %220 = vector.shape_cast %219 : vector<15xf32> to vector<1x15xf32>
    %cst_88 = arith.constant 3.000000e+01 : f32
    %221 = vector.broadcast %cst_88 : f32 to vector<1x15xf32>
    %222 = arith.divf %220, %221 : vector<1x15xf32>
    %223 = vector.broadcast %222 : vector<1x15xf32> to vector<30x15xf32>
    %224 = arith.subf %200, %223 : vector<30x15xf32>
    %cst_89 = arith.constant dense<0.000000e+00> : vector<15xf32>
    %225 = vector.multi_reduction <add>, %218, %cst_89 [0] : vector<30x15xf32> to vector<15xf32>
    %226 = vector.shape_cast %225 : vector<15xf32> to vector<1x15xf32>
    %cst_90 = arith.constant 3.000000e+01 : f32
    %227 = vector.broadcast %cst_90 : f32 to vector<1x15xf32>
    %228 = arith.divf %226, %227 : vector<1x15xf32>
    %229 = vector.broadcast %228 : vector<1x15xf32> to vector<30x15xf32>
    %230 = arith.subf %218, %229 : vector<30x15xf32>
    %231 = arith.mulf %224, %224 : vector<30x15xf32>
    %cst_91 = arith.constant dense<0.000000e+00> : vector<15xf32>
    %232 = vector.multi_reduction <add>, %231, %cst_91 [0] : vector<30x15xf32> to vector<15xf32>
    %233 = vector.shape_cast %232 : vector<15xf32> to vector<1x15xf32>
    %234 = math.rsqrt %233 : vector<1x15xf32>
    %235 = vector.broadcast %234 : vector<1x15xf32> to vector<30x15xf32>
    %236 = arith.mulf %224, %235 : vector<30x15xf32>
    %237 = arith.mulf %230, %230 : vector<30x15xf32>
    %cst_92 = arith.constant dense<0.000000e+00> : vector<15xf32>
    %238 = vector.multi_reduction <add>, %237, %cst_92 [0] : vector<30x15xf32> to vector<15xf32>
    %239 = vector.shape_cast %238 : vector<15xf32> to vector<1x15xf32>
    %240 = math.rsqrt %239 : vector<1x15xf32>
    %241 = vector.broadcast %240 : vector<1x15xf32> to vector<30x15xf32>
    %242 = arith.mulf %230, %241 : vector<30x15xf32>
    %243 = arith.mulf %236, %242 : vector<30x15xf32>
    %cst_93 = arith.constant dense<0.000000e+00> : vector<15xf32>
    %244 = vector.multi_reduction <add>, %243, %cst_93 [0] : vector<30x15xf32> to vector<15xf32>
    %245 = vector.shape_cast %244 : vector<15xf32> to vector<1x15xf32>
    %246 = arith.addf %198, %245 : vector<1x15xf32>
    %c4_i32 = arith.constant 4 : i32
    %c0_94 = arith.constant 0 : index
    %c0_95 = arith.constant 0 : index
    %c0_96 = arith.constant 0 : index
    %247 = vector.load %arg5[%c0_94, %c0_95, %c0_96] : memref<1x1x15xf32, #tpu.memory_space<vmem>>, vector<1x1x15xf32>
    %248 = vector.shape_cast %247 : vector<1x1x15xf32> to vector<1x15xf32>
    %249 = vector.shape_cast %246 : vector<1x15xf32> to vector<1x1x15xf32>
    tpu.vector_store %arg5[%c0_94, %c0_95, %c0_96], %249 {strides = array<i32>} : memref<1x1x15xf32, #tpu.memory_space<vmem>>, vector<1x1x15xf32>,
    return
  }
  func.func @transform_0(%arg0: i32) -> (i32, i32, i32) {
    %c0_i32 = arith.constant 0 : i32
    %c0_i32_0 = arith.constant 0 : i32
    %c0_i32_1 = arith.constant 0 : i32
    return %arg0, %c0_i32, %c0_i32_0 : i32, i32, i32
  }
  func.func @transform_1(%arg0: i32) -> (i32, i32, i32) {
    %c0_i32 = arith.constant 0 : i32
    %c0_i32_0 = arith.constant 0 : i32
    %c0_i32_1 = arith.constant 0 : i32
    return %arg0, %c0_i32, %c0_i32_0 : i32, i32, i32
  }
  func.func @transform_2(%arg0: i32) -> (i32, i32) {
    %c0_i32 = arith.constant 0 : i32
    %c0_i32_0 = arith.constant 0 : i32
    %c0_i32_1 = arith.constant 0 : i32
    return %c0_i32, %c0_i32_0 : i32, i32
  }
  func.func @transform_3(%arg0: i32) -> (i32, i32) {
    %c0_i32 = arith.constant 0 : i32
    %c0_i32_0 = arith.constant 0 : i32
    %c0_i32_1 = arith.constant 0 : i32
    return %c0_i32, %c0_i32_0 : i32, i32
  }
  func.func @transform_4(%arg0: i32) -> (i32, i32, i32) {
    %c0_i32 = arith.constant 0 : i32
    %c0_i32_0 = arith.constant 0 : i32
    %c0_i32_1 = arith.constant 0 : i32
    return %arg0, %c0_i32, %c0_i32_0 : i32, i32, i32
  }
}

</mosaic_0001>

<bundles_post_ra>
// kernel: tpu_custom_call.1
= control target key start
LH: loop header
LB: loop body
LE: loop exit
PB: predicated region body
PF: predicated region fallthrough
CT: control target
= control target key end

     0   :  { %9 = vsyncpa [#allocation5], 0  ;;  %s4746_s0 = inlined_call_operand.vmem [shape: f32[2,48,128], index: 0, kind: input, shape index: {}]   ;;  %s4747_s1 = inlined_call_operand.vmem [shape: f32[2,48,128], index: 1, kind: input, shape index: {}]   ;;  %s4748_s2 = inlined_call_operand.hbm [shape: f32[512,512], index: 2, kind: input, shape index: {}]   ;;  %s4749_s3 = inlined_call_operand.vmem [shape: f32[512,15], index: 3, kind: input, shape index: {}]   ;;  %s4750_s4 = inlined_call_operand.hbm [shape: f32[2,1,15], index: 4, kind: output, shape index: {}]  }
   0x1   :  { %10 = vsyncpa [#allocation6], 0 }
   0x2   :  { %12 = vsyncpa [#allocation6 + $0x1], 0  ;;  %s3373_s15 = smov 0   ;;  %s3375_s16 = smov 0  }
   0x3   :  { %s3377_s17 = smov 0   ;;  %s3379_s18 = smov 0  }
   0x4 LB: > { %s3394_s19 = sadd.s32 4294967295, %s3342_s18   ;;  %s2910_s20 = sadd.s32 4294967294, %s3342_s18   ;;  %s3342_s18 = sphi %s3379_s18, %s4778_s18   ;;  %s3338_s17 = sphi %s3377_s17, %s4777_s17   ;;  %s3334_s16 = sphi %s3375_s16, %s4776_s16   ;;  %s3330_s15 = sphi %s3373_s15, %s4775_s15  }
   0x5   : > { %s3398_s21 = sadd.s32 1, %s3342_s18   ;;  %s119_s22 = sadd.s32 1, %s3338_s17 }
   0x6   : > { %s116_s23 = ssub.s32 %s3342_s18, %s3398_s21  ;;  %p129_p0 = scmp.ne.s32.totalorder %s3338_s17, %s3334_s16 }
   0x7   : > { %p117_p1 = scmp.eq.s32.totalorder %s116_s23, 0  ;;  %p130_p2 = scmp.eq.s32.totalorder %s3394_s19, 1 }
   0x8   : > { %p135_p3 = scmp.ne.s32.totalorder %s3334_s16, %s3330_s15  ;;  %p136_p4 = scmp.eq.s32.totalorder %s2910_s20, 1 }
   0x9   : > { %s3409_s24 = scalar_select %p117_p1, %s3338_s17, %s119_s22  }
   0xa   : > { %p3411_p5 = por %p130_p2, %p129_p0  ;;  %p3415_p6 = por %p136_p4, %p135_p3 }
   0xb   : > { %p2911_p7 = scmp.ge.s32.totalorder %s3342_s18, 1  ;;  %p143_p8 = scmp.lt.s32.totalorder %s3342_s18, 3 }
   0xc   : > { %s4756_s26 = scalar_select %p3415_p6, 1, 0 }
   0xd   : > { %p3154_p9 = scmp.eq.s32.totalorder %s3394_s19, 0  ;;  %p3422_p10 = pnand %p2911_p7, %p143_p8 }
   0xe   : > { %s3344_s28 = smov [#allocation4]  }
   0xf   : > { %s155_s29 = sshll.u32 %s3344_s28, 4  ;;  %p3146_p11 = pneg %p3422_p10  ;;  %s156_s29 = int_to_ptr.vmem [resolvable:$true] %s155_s29 }
  0x10   : > { %s3263_s30 = scalar_lea.vmem %s156_s29, 32768  ;;  %p3271_p3 = scmp.lt.s32.totalorder %s156_s29, %s156_s29 }
  0x11   : > { %p3147_p12 = pnand %p3154_p9, %p3146_p11  ;;  %p3264_p0 = scmp.ne.s32.totalorder %s156_s29, %s3263_s30 }
  0x12   : > { %p3272_p4 = scmp.lt.s32.totalorder %s3263_s30, %s3263_s30 }
  0x13   : > { %p3254_p13 = pneg %p3147_p12 }
  0x14   : > { %p3273_p6 = por %p3272_p4, %p3271_p3 }
  0x15   : > { %p3266_p1 = pnand %p3264_p0, %p3254_p13 }
  0x17   : > { %p3267_p2 = pneg %p3266_p1 }
  0x19   : > { %p3274_p7 = pnand %p3273_p6, %p3267_p2 }
  0x1b   : > { %3277 = shalt.err (!%p3274_p7)
}
  0x1c   : > { %s3345_s5 = smov 512   ;;  %s3346_s6 = smov 32  }
  0x1d   : > { %3149 = dma.hbm_to_vmem [thread:$0]  (!%p3147_p12), %s4748_s2, 32768, %s156_s29, [#allocation5], %s3345_s5, %s3345_s5, %s3346_s6  }
  0x1e   : > { %190 = sbr.rel (%p3422_p10) target bundleno = 1093 (0x445), region = 36 }
  0x23   : > { %3321 = dma.done.wait (%p3154_p9), [#allocation5], 32768  }
  0x24   : > { %3323 = vsyncadd (%p3154_p9), [#allocation5], 4294934528  ;;  %v317_v0 = vld [vmem:[#allocation4 + $0x1e8] sm:$0xff]  ;;  %v316_v2 = vld [vmem:[#allocation4 + $0x1e0] sm:$0xff]  ;;  %p220_p6 = scmp.lt.s32.totalorder %s3394_s19, 1  ;;  %vm1191_vm1 = vcmask 121856  }
  0x25   : > { %v445_v1 = vld [vmem:[#allocation4 + $0x5e8] sm:$0xff]  ;;  %512 = vmatprep.subr.mxu0 %v317_v0  ;;  %v444_v3 = vld [vmem:[#allocation4 + $0x5e0] sm:$0xff]  ;;  %vm2177_vm11 = vcmask 119808   ;;  %s218_s23 = sand.u32 1, %s3334_s16   ;;  %s2948_s27 = sshll.u32 %s3394_s19, 4 }
  0x26   : > { %607 = vmatprep.subr.mxu1 %v445_v1  ;;  %v313_v4 = vld [vmem:[#allocation4 + $0x1c8] sm:$0xff]  ;;  %513 = vmatpush1.msra.mxu0 %v316_v2  ;;  %v312_v6 = vld [vmem:[#allocation4 + $0x1c0] sm:$0xff]  ;;  %s3443_s9 = scalar_select %p220_p6, %s3394_s19, 1 }
  0x27   : > { %v441_v5 = vld [vmem:[#allocation4 + $0x5c8] sm:$0xff]  ;;  %608 = vmatpush1.msra.mxu1 %v444_v3  ;;  %v440_v7 = vld [vmem:[#allocation4 + $0x5c0] sm:$0xff]  ;;  %514 = vmatprep.subr.mxu0 %v313_v4  ;;  %s219_s28 = scalar_lea.vmem [#allocation7], %s218_s23  ;;  %s2823_s6 = scalar_lea.hbm %s4750_s4, %s2948_s27 }
  0x28   : > { %v309_v8 = vld [vmem:[#allocation4 + $0x1a8] sm:$0xff]  ;;  %609 = vmatprep.subr.mxu1 %v441_v5  ;;  %v308_v10 = vld [vmem:[#allocation4 + $0x1a0] sm:$0xff]  ;;  %515 = vmatpush1.msra.mxu0 %v312_v6  ;;  %s3139_s10 = smul.u32 48, %s3443_s9  ;;  %s2825_s29 = sshll.u32 %s219_s28, 4  ;;  %s2826_s29 = int_to_ptr.vmem [resolvable:$true] %s2825_s29 }
  0x29   : > { %v437_v9 = vld [vmem:[#allocation4 + $0x5a8] sm:$0xff]  ;;  %v436_v11 = vld [vmem:[#allocation4 + $0x5a0] sm:$0xff]  ;;  %610 = vmatpush1.msra.mxu1 %v440_v7  ;;  %516 = vmatprep.subr.mxu0 %v309_v8  ;;  %s3278_s9 = scalar_lea.vmem %s2826_s29, 16 }
  0x2a   : > { %v305_v12 = vld [vmem:[#allocation4 + $0x188] sm:$0xff]  ;;  %611 = vmatprep.subr.mxu1 %v437_v9  ;;  %v304_v14 = vld [vmem:[#allocation4 + $0x180] sm:$0xff]  ;;  %517 = vmatpush1.msra.mxu0 %v308_v10  ;;  %s3451_s13 = scalar_lea.vmem %s4746_s0, %s3139_s10  ;;  %s3750_s7 = scalar_lea.vmem %s4747_s1, %s3139_s10 }
  0x2b   : > { %v433_v13 = vld [vmem:[#allocation4 + $0x588] sm:$0xff]  ;;  %v432_v15 = vld [vmem:[#allocation4 + $0x580] sm:$0xff]  ;;  %612 = vmatpush1.msra.mxu1 %v436_v11  ;;  %518 = vmatprep.subr.mxu0 %v305_v12  ;;  %p3279_p8 = scmp.ne.s32.totalorder %s2826_s29, %s3278_s9  ;;  %s3347_s10 = smov [#allocation7]  }
  0x2c   : > { %v301_v16 = vld [vmem:[#allocation4 + $0x168] sm:$0xff]  ;;  %613 = vmatprep.subr.mxu1 %v433_v13  ;;  %v300_v18 = vld [vmem:[#allocation4 + $0x160] sm:$0xff]  ;;  %519 = vmatpush1.msra.mxu0 %v304_v14  ;;  %s3282_s8 = sshll.u32 %s3347_s10, 4  ;;  %s3283_s8 = int_to_ptr.vmem [resolvable:$false] %s3282_s8 }
  0x2d   : > { %v429_v17 = vld [vmem:[#allocation4 + $0x568] sm:$0xff]  ;;  %v428_v19 = vld [vmem:[#allocation4 + $0x560] sm:$0xff]  ;;  %614 = vmatpush1.msra.mxu1 %v432_v15  ;;  %520 = vmatprep.subr.mxu0 %v301_v16  ;;  %p3280_p9 = pnand %p3279_p8, %p3411_p5  ;;  %s3284_s19 = scalar_lea.vmem %s3283_s8, 32 }
  0x2e   : > { %v297_v20 = vld [vmem:[#allocation4 + $0x148] sm:$0xff]  ;;  %615 = vmatprep.subr.mxu1 %v429_v17  ;;  %v296_v22 = vld [vmem:[#allocation4 + $0x140] sm:$0xff]  ;;  %521 = vmatpush1.msra.mxu0 %v300_v18  ;;  %p3285_p11 = scmp.lt.s32.totalorder %s2826_s29, %s3283_s8  ;;  %p3286_p12 = scmp.lt.s32.totalorder %s3284_s19, %s3278_s9 }
  0x2f   : > { %v425_v21 = vld [vmem:[#allocation4 + $0x548] sm:$0xff]  ;;  %v424_v23 = vld [vmem:[#allocation4 + $0x540] sm:$0xff]  ;;  %616 = vmatpush1.msra.mxu1 %v428_v19  ;;  %522 = vmatprep.subr.mxu0 %v297_v20  ;;  %p3281_p10 = pneg %p3280_p9 }
  0x30   : > { %v293_v24 = vld [vmem:[#allocation4 + $0x128] sm:$0xff]  ;;  %617 = vmatprep.subr.mxu1 %v425_v21  ;;  %v292_v26 = vld [vmem:[#allocation4 + $0x120] sm:$0xff]  ;;  %523 = vmatpush1.msra.mxu0 %v296_v22  ;;  %p3287_p13 = por %p3286_p12, %p3285_p11 }
  0x31   : > { %v421_v25 = vld [vmem:[#allocation4 + $0x528] sm:$0xff]  ;;  %v420_v27 = vld [vmem:[#allocation4 + $0x520] sm:$0xff]  ;;  %618 = vmatpush1.msra.mxu1 %v424_v23  ;;  %524 = vmatprep.subr.mxu0 %v293_v24 }
  0x32   : > { %v289_v28 = vld [vmem:[#allocation4 + $0x108] sm:$0xff]  ;;  %619 = vmatprep.subr.mxu1 %v421_v25  ;;  %v288_v30 = vld [vmem:[#allocation4 + $0x100] sm:$0xff]  ;;  %525 = vmatpush1.msra.mxu0 %v292_v26  ;;  %p3288_p0 = pnand %p3287_p13, %p3281_p10 }
  0x33   : > { %v417_v29 = vld [vmem:[#allocation4 + $0x508] sm:$0xff]  ;;  %v416_v31 = vld [vmem:[#allocation4 + $0x500] sm:$0xff]  ;;  %620 = vmatpush1.msra.mxu1 %v420_v27  ;;  %526 = vmatprep.subr.mxu0 %v289_v28 }
  0x34   : > { %v285_v32 = vld [vmem:[#allocation4 + $0xe8] sm:$0xff]  ;;  %621 = vmatprep.subr.mxu1 %v417_v29  ;;  %v284_v34 = vld [vmem:[#allocation4 + $0xe0] sm:$0xff]  ;;  %527 = vmatpush1.msra.mxu0 %v288_v30 }
  0x35   : > { %v413_v33 = vld [vmem:[#allocation4 + $0x4e8] sm:$0xff]  ;;  %v412_v35 = vld [vmem:[#allocation4 + $0x4e0] sm:$0xff]  ;;  %622 = vmatpush1.msra.mxu1 %v416_v31  ;;  %528 = vmatprep.subr.mxu0 %v285_v32 }
  0x36   : > { %v281_v36 = vld [vmem:[#allocation4 + $0xc8] sm:$0xff]  ;;  %623 = vmatprep.subr.mxu1 %v413_v33  ;;  %v280_v38 = vld [vmem:[#allocation4 + $0xc0] sm:$0xff]  ;;  %529 = vmatpush1.msra.mxu0 %v284_v34 }
  0x37   : > { %v409_v37 = vld [vmem:[#allocation4 + $0x4c8] sm:$0xff]  ;;  %v408_v39 = vld [vmem:[#allocation4 + $0x4c0] sm:$0xff]  ;;  %624 = vmatpush1.msra.mxu1 %v412_v35  ;;  %530 = vmatprep.subr.mxu0 %v281_v36 }
  0x38   : > { %v277_v40 = vld [vmem:[#allocation4 + $0xa8] sm:$0xff]  ;;  %625 = vmatprep.subr.mxu1 %v409_v37  ;;  %v276_v42 = vld [vmem:[#allocation4 + $0xa0] sm:$0xff]  ;;  %531 = vmatpush1.msra.mxu0 %v280_v38 }
  0x39   : > { %v405_v41 = vld [vmem:[#allocation4 + $0x4a8] sm:$0xff]  ;;  %v404_v43 = vld [vmem:[#allocation4 + $0x4a0] sm:$0xff]  ;;  %626 = vmatpush1.msra.mxu1 %v408_v39  ;;  %532 = vmatprep.subr.mxu0 %v277_v40 }
  0x3a   : > { %v273_v44 = vld [vmem:[#allocation4 + $0x88] sm:$0xff]  ;;  %627 = vmatprep.subr.mxu1 %v405_v41  ;;  %v272_v46 = vld [vmem:[#allocation4 + $0x80] sm:$0xff]  ;;  %533 = vmatpush1.msra.mxu0 %v276_v42 }
  0x3b   : > { %v401_v45 = vld [vmem:[#allocation4 + $0x488] sm:$0xff]  ;;  %v400_v47 = vld [vmem:[#allocation4 + $0x480] sm:$0xff]  ;;  %628 = vmatpush1.msra.mxu1 %v404_v43  ;;  %534 = vmatprep.subr.mxu0 %v273_v44 }
  0x3c   : > { %v269_v48 = vld [vmem:[#allocation4 + $0x68] sm:$0xff]  ;;  %629 = vmatprep.subr.mxu1 %v401_v45  ;;  %v268_v50 = vld [vmem:[#allocation4 + $0x60] sm:$0xff]  ;;  %535 = vmatpush1.msra.mxu0 %v272_v46 }
  0x3d   : > { %v397_v49 = vld [vmem:[#allocation4 + $0x468] sm:$0xff]  ;;  %v396_v51 = vld [vmem:[#allocation4 + $0x460] sm:$0xff]  ;;  %630 = vmatpush1.msra.mxu1 %v400_v47  ;;  %536 = vmatprep.subr.mxu0 %v269_v48 }
  0x3e   : > { %v265_v52 = vld [vmem:[#allocation4 + $0x48] sm:$0xff]  ;;  %631 = vmatprep.subr.mxu1 %v397_v49  ;;  %v264_v54 = vld [vmem:[#allocation4 + $0x40] sm:$0xff]  ;;  %537 = vmatpush1.msra.mxu0 %v268_v50 }
  0x3f   : > { %v393_v53 = vld [vmem:[#allocation4 + $0x448] sm:$0xff]  ;;  %v392_v55 = vld [vmem:[#allocation4 + $0x440] sm:$0xff]  ;;  %632 = vmatpush1.msra.mxu1 %v396_v51  ;;  %538 = vmatprep.subr.mxu0 %v265_v52 }
  0x40   : > { %v261_v56 = vld [vmem:[#allocation4 + $0x28] sm:$0xff]  ;;  %633 = vmatprep.subr.mxu1 %v393_v53  ;;  %v260_v58 = vld [vmem:[#allocation4 + $0x20] sm:$0xff]  ;;  %539 = vmatpush1.msra.mxu0 %v264_v54 }
  0x41   : > { %v389_v57 = vld [vmem:[#allocation4 + $0x428] sm:$0xff]  ;;  %v388_v59 = vld [vmem:[#allocation4 + $0x420] sm:$0xff]  ;;  %634 = vmatpush1.msra.mxu1 %v392_v55  ;;  %540 = vmatprep.subr.mxu0 %v261_v56 }
  0x42   : > { %v257_v60 = vld [vmem:[#allocation4 + $0x8] sm:$0xff]  ;;  %635 = vmatprep.subr.mxu1 %v389_v57  ;;  %v256_v62 = vld [vmem:[#allocation4] sm:$0xff]  ;;  %541 = vmatpush1.msra.mxu0 %v260_v58 }
  0x43   : > { %v385_v61 = vld [vmem:[#allocation4 + $0x408] sm:$0xff]  ;;  %v384_v63 = vld [vmem:[#allocation4 + $0x400] sm:$0xff]  ;;  %636 = vmatpush1.msra.mxu1 %v388_v59  ;;  %542 = vmatprep.subr.mxu0 %v257_v60 }
  0x44   : > { %v381_v0 = vld [vmem:[#allocation4 + $0x3e8] sm:$0xff]  ;;  %637 = vmatprep.subr.mxu1 %v385_v61  ;;  %v380_v2 = vld [vmem:[#allocation4 + $0x3e0] sm:$0xff]  ;;  %543 = vmatpush1.msra.mxu0 %v256_v62 }
  0x45   : > { %v509_v1 = vld [vmem:[#allocation4 + $0x7e8] sm:$0xff]  ;;  %v508_v3 = vld [vmem:[#allocation4 + $0x7e0] sm:$0xff]  ;;  %638 = vmatpush1.msra.mxu1 %v384_v63  ;;  %544 = vmatprep.subr.mxu0 %v381_v0  ;;  %v3454_v63 = vld [vmem:[%s3451_s13 + $0x1] sm:$0xff] }
  0x46   : > { %v377_v4 = vld [vmem:[#allocation4 + $0x3c8] sm:$0xff]  ;;  %639 = vmatprep.subr.mxu1 %v509_v1  ;;  %v376_v6 = vld [vmem:[#allocation4 + $0x3c0] sm:$0xff]  ;;  %545 = vmatpush2.msra.mxu0 %v380_v2  ;;  %v3457_v1 = vld [vmem:[%s3451_s13 + $0x3] sm:$0xff] }
  0x47   : > { %v505_v5 = vld [vmem:[#allocation4 + $0x7c8] sm:$0xff]  ;;  %v504_v7 = vld [vmem:[#allocation4 + $0x7c0] sm:$0xff]  ;;  %640 = vmatpush2.msra.mxu1 %v508_v3  ;;  %546 = vmatprep.subr.mxu0 %v377_v4  ;;  %v3460_v2 = vld [vmem:[%s3451_s13] sm:$0xff] }
  0x48   : > { %v373_v8 = vld [vmem:[#allocation4 + $0x3a8] sm:$0xff]  ;;  %641 = vmatprep.subr.mxu1 %v505_v5  ;;  %v372_v10 = vld [vmem:[#allocation4 + $0x3a0] sm:$0xff]  ;;  %547 = vmatpush2.msra.mxu0 %v376_v6  ;;  %v3463_v3 = vld [vmem:[%s3451_s13 + $0x2] sm:$0xff] }
  0x49   : > { %v501_v9 = vld [vmem:[#allocation4 + $0x7a8] sm:$0xff]  ;;  %v500_v11 = vld [vmem:[#allocation4 + $0x7a0] sm:$0xff]  ;;  %642 = vmatpush2.msra.mxu1 %v504_v7  ;;  %548 = vmatprep.subr.mxu0 %v373_v8  ;;  %v319_v4 = vld [vmem:[#allocation4 + $0x1f8] sm:$0xff] }
  0x4a   : > { %v369_v12 = vld [vmem:[#allocation4 + $0x388] sm:$0xff]  ;;  %643 = vmatprep.subr.mxu1 %v501_v9  ;;  %v368_v14 = vld [vmem:[#allocation4 + $0x380] sm:$0xff]  ;;  %549 = vmatpush2.msra.mxu0 %v372_v10  ;;  %v447_v5 = vld [vmem:[#allocation4 + $0x5f8] sm:$0xff] }
  0x4b   : > { %v497_v13 = vld [vmem:[#allocation4 + $0x788] sm:$0xff]  ;;  %v496_v15 = vld [vmem:[#allocation4 + $0x780] sm:$0xff]  ;;  %644 = vmatpush2.msra.mxu1 %v500_v11  ;;  %550 = vmatprep.subr.mxu0 %v369_v12  ;;  %v318_v6 = vld [vmem:[#allocation4 + $0x1f0] sm:$0xff] }
  0x4c   : > { %v365_v16 = vld [vmem:[#allocation4 + $0x368] sm:$0xff]  ;;  %645 = vmatprep.subr.mxu1 %v497_v13  ;;  %v364_v18 = vld [vmem:[#allocation4 + $0x360] sm:$0xff]  ;;  %551 = vmatpush2.msra.mxu0 %v368_v14  ;;  %v446_v7 = vld [vmem:[#allocation4 + $0x5f0] sm:$0xff] }
  0x4d   : > { %v493_v17 = vld [vmem:[#allocation4 + $0x768] sm:$0xff]  ;;  %v492_v19 = vld [vmem:[#allocation4 + $0x760] sm:$0xff]  ;;  %646 = vmatpush2.msra.mxu1 %v496_v15  ;;  %552 = vmatprep.subr.mxu0 %v365_v16  ;;  %v315_v8 = vld [vmem:[#allocation4 + $0x1d8] sm:$0xff] }
  0x4e   : > { %v361_v20 = vld [vmem:[#allocation4 + $0x348] sm:$0xff]  ;;  %647 = vmatprep.subr.mxu1 %v493_v17  ;;  %v360_v22 = vld [vmem:[#allocation4 + $0x340] sm:$0xff]  ;;  %553 = vmatpush2.msra.mxu0 %v364_v18  ;;  %v443_v9 = vld [vmem:[#allocation4 + $0x5d8] sm:$0xff] }
  0x4f   : > { %v489_v21 = vld [vmem:[#allocation4 + $0x748] sm:$0xff]  ;;  %v488_v23 = vld [vmem:[#allocation4 + $0x740] sm:$0xff]  ;;  %648 = vmatpush2.msra.mxu1 %v492_v19  ;;  %554 = vmatprep.subr.mxu0 %v361_v20  ;;  %v314_v10 = vld [vmem:[#allocation4 + $0x1d0] sm:$0xff] }
  0x50   : > { %v357_v24 = vld [vmem:[#allocation4 + $0x328] sm:$0xff]  ;;  %649 = vmatprep.subr.mxu1 %v489_v21  ;;  %v356_v26 = vld [vmem:[#allocation4 + $0x320] sm:$0xff]  ;;  %555 = vmatpush2.msra.mxu0 %v360_v22  ;;  %v442_v11 = vld [vmem:[#allocation4 + $0x5d0] sm:$0xff] }
  0x51   : > { %v485_v25 = vld [vmem:[#allocation4 + $0x728] sm:$0xff]  ;;  %v484_v27 = vld [vmem:[#allocation4 + $0x720] sm:$0xff]  ;;  %650 = vmatpush2.msra.mxu1 %v488_v23  ;;  %556 = vmatprep.subr.mxu0 %v357_v24  ;;  %v311_v12 = vld [vmem:[#allocation4 + $0x1b8] sm:$0xff] }
  0x52   : > { %v353_v28 = vld [vmem:[#allocation4 + $0x308] sm:$0xff]  ;;  %651 = vmatprep.subr.mxu1 %v485_v25  ;;  %v352_v30 = vld [vmem:[#allocation4 + $0x300] sm:$0xff]  ;;  %557 = vmatpush2.msra.mxu0 %v356_v26  ;;  %v439_v13 = vld [vmem:[#allocation4 + $0x5b8] sm:$0xff] }
  0x53   : > { %v481_v29 = vld [vmem:[#allocation4 + $0x708] sm:$0xff]  ;;  %v480_v31 = vld [vmem:[#allocation4 + $0x700] sm:$0xff]  ;;  %652 = vmatpush2.msra.mxu1 %v484_v27  ;;  %558 = vmatprep.subr.mxu0 %v353_v28  ;;  %v310_v14 = vld [vmem:[#allocation4 + $0x1b0] sm:$0xff] }
  0x54   : > { %v349_v32 = vld [vmem:[#allocation4 + $0x2e8] sm:$0xff]  ;;  %653 = vmatprep.subr.mxu1 %v481_v29  ;;  %v348_v34 = vld [vmem:[#allocation4 + $0x2e0] sm:$0xff]  ;;  %559 = vmatpush2.msra.mxu0 %v352_v30  ;;  %v438_v15 = vld [vmem:[#allocation4 + $0x5b0] sm:$0xff] }
  0x55   : > { %v477_v33 = vld [vmem:[#allocation4 + $0x6e8] sm:$0xff]  ;;  %v476_v35 = vld [vmem:[#allocation4 + $0x6e0] sm:$0xff]  ;;  %654 = vmatpush2.msra.mxu1 %v480_v31  ;;  %560 = vmatprep.subr.mxu0 %v349_v32  ;;  %v307_v16 = vld [vmem:[#allocation4 + $0x198] sm:$0xff] }
  0x56   : > { %v345_v36 = vld [vmem:[#allocation4 + $0x2c8] sm:$0xff]  ;;  %655 = vmatprep.subr.mxu1 %v477_v33  ;;  %v344_v38 = vld [vmem:[#allocation4 + $0x2c0] sm:$0xff]  ;;  %561 = vmatpush2.msra.mxu0 %v348_v34  ;;  %v435_v17 = vld [vmem:[#allocation4 + $0x598] sm:$0xff] }
  0x57   : > { %v473_v37 = vld [vmem:[#allocation4 + $0x6c8] sm:$0xff]  ;;  %v472_v39 = vld [vmem:[#allocation4 + $0x6c0] sm:$0xff]  ;;  %656 = vmatpush2.msra.mxu1 %v476_v35  ;;  %562 = vmatprep.subr.mxu0 %v345_v36  ;;  %v306_v18 = vld [vmem:[#allocation4 + $0x190] sm:$0xff] }
  0x58   : > { %v341_v40 = vld [vmem:[#allocation4 + $0x2a8] sm:$0xff]  ;;  %657 = vmatprep.subr.mxu1 %v473_v37  ;;  %v340_v42 = vld [vmem:[#allocation4 + $0x2a0] sm:$0xff]  ;;  %563 = vmatpush2.msra.mxu0 %v344_v38  ;;  %v434_v19 = vld [vmem:[#allocation4 + $0x590] sm:$0xff] }
  0x59   : > { %v469_v41 = vld [vmem:[#allocation4 + $0x6a8] sm:$0xff]  ;;  %v468_v43 = vld [vmem:[#allocation4 + $0x6a0] sm:$0xff]  ;;  %658 = vmatpush2.msra.mxu1 %v472_v39  ;;  %564 = vmatprep.subr.mxu0 %v341_v40  ;;  %v303_v20 = vld [vmem:[#allocation4 + $0x178] sm:$0xff] }
  0x5a   : > { %v337_v44 = vld [vmem:[#allocation4 + $0x288] sm:$0xff]  ;;  %659 = vmatprep.subr.mxu1 %v469_v41  ;;  %v336_v46 = vld [vmem:[#allocation4 + $0x280] sm:$0xff]  ;;  %565 = vmatpush2.msra.mxu0 %v340_v42  ;;  %v431_v21 = vld [vmem:[#allocation4 + $0x578] sm:$0xff] }
  0x5b   : > { %v465_v45 = vld [vmem:[#allocation4 + $0x688] sm:$0xff]  ;;  %v464_v47 = vld [vmem:[#allocation4 + $0x680] sm:$0xff]  ;;  %660 = vmatpush2.msra.mxu1 %v468_v43  ;;  %566 = vmatprep.subr.mxu0 %v337_v44  ;;  %v302_v22 = vld [vmem:[#allocation4 + $0x170] sm:$0xff] }
  0x5c   : > { %v333_v48 = vld [vmem:[#allocation4 + $0x268] sm:$0xff]  ;;  %661 = vmatprep.subr.mxu1 %v465_v45  ;;  %v332_v50 = vld [vmem:[#allocation4 + $0x260] sm:$0xff]  ;;  %567 = vmatpush2.msra.mxu0 %v336_v46  ;;  %v430_v23 = vld [vmem:[#allocation4 + $0x570] sm:$0xff] }
  0x5d   : > { %v461_v49 = vld [vmem:[#allocation4 + $0x668] sm:$0xff]  ;;  %v460_v51 = vld [vmem:[#allocation4 + $0x660] sm:$0xff]  ;;  %662 = vmatpush2.msra.mxu1 %v464_v47  ;;  %568 = vmatprep.subr.mxu0 %v333_v48  ;;  %v299_v24 = vld [vmem:[#allocation4 + $0x158] sm:$0xff] }
  0x5e   : > { %v329_v52 = vld [vmem:[#allocation4 + $0x248] sm:$0xff]  ;;  %663 = vmatprep.subr.mxu1 %v461_v49  ;;  %v328_v54 = vld [vmem:[#allocation4 + $0x240] sm:$0xff]  ;;  %569 = vmatpush2.msra.mxu0 %v332_v50  ;;  %v427_v25 = vld [vmem:[#allocation4 + $0x558] sm:$0xff] }
  0x5f   : > { %v457_v53 = vld [vmem:[#allocation4 + $0x648] sm:$0xff]  ;;  %v456_v55 = vld [vmem:[#allocation4 + $0x640] sm:$0xff]  ;;  %664 = vmatpush2.msra.mxu1 %v460_v51  ;;  %570 = vmatprep.subr.mxu0 %v329_v52  ;;  %v298_v26 = vld [vmem:[#allocation4 + $0x150] sm:$0xff] }
  0x60   : > { %v325_v56 = vld [vmem:[#allocation4 + $0x228] sm:$0xff]  ;;  %665 = vmatprep.subr.mxu1 %v457_v53  ;;  %v324_v58 = vld [vmem:[#allocation4 + $0x220] sm:$0xff]  ;;  %571 = vmatpush2.msra.mxu0 %v328_v54  ;;  %v426_v27 = vld [vmem:[#allocation4 + $0x550] sm:$0xff] }
  0x61   : > { %v453_v57 = vld [vmem:[#allocation4 + $0x628] sm:$0xff]  ;;  %v452_v59 = vld [vmem:[#allocation4 + $0x620] sm:$0xff]  ;;  %666 = vmatpush2.msra.mxu1 %v456_v55  ;;  %572 = vmatprep.subr.mxu0 %v325_v56  ;;  %v295_v28 = vld [vmem:[#allocation4 + $0x138] sm:$0xff] }
  0x62   : > { %v321_v60 = vld [vmem:[#allocation4 + $0x208] sm:$0xff]  ;;  %667 = vmatprep.subr.mxu1 %v453_v57  ;;  %v320_v62 = vld [vmem:[#allocation4 + $0x200] sm:$0xff]  ;;  %573 = vmatpush2.msra.mxu0 %v324_v58  ;;  %v423_v29 = vld [vmem:[#allocation4 + $0x538] sm:$0xff] }
  0x63   : > { %v449_v61 = vld [vmem:[#allocation4 + $0x608] sm:$0xff]  ;;  %668 = vmatpush2.msra.mxu1 %v452_v59  ;;  %v448_v0 = vld [vmem:[#allocation4 + $0x600] sm:$0xff]  ;;  %574 = vmatprep.subr.mxu0 %v321_v60  ;;  %v294_v30 = vld [vmem:[#allocation4 + $0x130] sm:$0xff] }
  0x64   : > { %669 = vmatprep.subr.mxu1 %v449_v61  ;;  %575 = vmatpush2.msra.mxu0 %v320_v62  ;;  %v422_v31 = vld [vmem:[#allocation4 + $0x530] sm:$0xff]  ;;  %v291_v32 = vld [vmem:[#allocation4 + $0x118] sm:$0xff] }
  0x65   : > { %576 = vmatprep.mubr.f32.mxu0 %v3454_v63  ;;  %670 = vmatpush2.msra.mxu1 %v448_v0  ;;  %v419_v33 = vld [vmem:[#allocation4 + $0x518] sm:$0xff]  ;;  %v290_v34 = vld [vmem:[#allocation4 + $0x110] sm:$0xff] }
  0x66   : > { %671 = vmatprep.mubr.f32.mxu1 %v3457_v1  ;;  %577 = vmatmul.mubr.f32.vlgmr.msra.gmra.mxu0 %v3460_v2  ;;  %v418_v35 = vld [vmem:[#allocation4 + $0x510] sm:$0xff]  ;;  %v287_v36 = vld [vmem:[#allocation4 + $0xf8] sm:$0xff] }
  0x67   : > { %672 = vmatmul.mubr.f32.vlgmr.msra.gmra.mxu1 %v3463_v3  ;;  %702 = vmatprep.subr.mxu0 %v319_v4  ;;  %v415_v37 = vld [vmem:[#allocation4 + $0x4f8] sm:$0xff]  ;;  %v286_v38 = vld [vmem:[#allocation4 + $0xf0] sm:$0xff] }
  0x68   : > { %797 = vmatprep.subr.mxu1 %v447_v5  ;;  %703 = vmatpush1.msra.mxu0 %v318_v6  ;;  %v414_v39 = vld [vmem:[#allocation4 + $0x4f0] sm:$0xff]  ;;  %v283_v40 = vld [vmem:[#allocation4 + $0xd8] sm:$0xff] }
  0x69   : > { %798 = vmatpush1.msra.mxu1 %v446_v7  ;;  %704 = vmatprep.subr.mxu0 %v315_v8  ;;  %v411_v41 = vld [vmem:[#allocation4 + $0x4d8] sm:$0xff]  ;;  %v282_v42 = vld [vmem:[#allocation4 + $0xd0] sm:$0xff] }
  0x6a   : > { %799 = vmatprep.subr.mxu1 %v443_v9  ;;  %705 = vmatpush1.msra.mxu0 %v314_v10  ;;  %v410_v43 = vld [vmem:[#allocation4 + $0x4d0] sm:$0xff]  ;;  %v279_v44 = vld [vmem:[#allocation4 + $0xb8] sm:$0xff] }
  0x6b   : > { %800 = vmatpush1.msra.mxu1 %v442_v11  ;;  %706 = vmatprep.subr.mxu0 %v311_v12  ;;  %v407_v45 = vld [vmem:[#allocation4 + $0x4b8] sm:$0xff]  ;;  %v278_v46 = vld [vmem:[#allocation4 + $0xb0] sm:$0xff] }
  0x6c   : > { %801 = vmatprep.subr.mxu1 %v439_v13  ;;  %707 = vmatpush1.msra.mxu0 %v310_v14  ;;  %v406_v47 = vld [vmem:[#allocation4 + $0x4b0] sm:$0xff]  ;;  %v275_v48 = vld [vmem:[#allocation4 + $0x98] sm:$0xff] }
  0x6d   : > { %802 = vmatpush1.msra.mxu1 %v438_v15  ;;  %708 = vmatprep.subr.mxu0 %v307_v16  ;;  %v403_v49 = vld [vmem:[#allocation4 + $0x498] sm:$0xff]  ;;  %v274_v50 = vld [vmem:[#allocation4 + $0x90] sm:$0xff] }
  0x6e   : > { %803 = vmatprep.subr.mxu1 %v435_v17  ;;  %709 = vmatpush1.msra.mxu0 %v306_v18  ;;  %v402_v51 = vld [vmem:[#allocation4 + $0x490] sm:$0xff]  ;;  %v271_v52 = vld [vmem:[#allocation4 + $0x78] sm:$0xff] }
  0x6f   : > { %804 = vmatpush1.msra.mxu1 %v434_v19  ;;  %710 = vmatprep.subr.mxu0 %v303_v20  ;;  %v399_v53 = vld [vmem:[#allocation4 + $0x478] sm:$0xff]  ;;  %v270_v54 = vld [vmem:[#allocation4 + $0x70] sm:$0xff] }
  0x70   : > { %805 = vmatprep.subr.mxu1 %v431_v21  ;;  %711 = vmatpush1.msra.mxu0 %v302_v22  ;;  %v398_v55 = vld [vmem:[#allocation4 + $0x470] sm:$0xff]  ;;  %v267_v56 = vld [vmem:[#allocation4 + $0x58] sm:$0xff] }
  0x71   : > { %806 = vmatpush1.msra.mxu1 %v430_v23  ;;  %712 = vmatprep.subr.mxu0 %v299_v24  ;;  %v395_v57 = vld [vmem:[#allocation4 + $0x458] sm:$0xff]  ;;  %v266_v58 = vld [vmem:[#allocation4 + $0x50] sm:$0xff] }
  0x72   : > { %807 = vmatprep.subr.mxu1 %v427_v25  ;;  %713 = vmatpush1.msra.mxu0 %v298_v26  ;;  %v394_v59 = vld [vmem:[#allocation4 + $0x450] sm:$0xff]  ;;  %v263_v60 = vld [vmem:[#allocation4 + $0x38] sm:$0xff] }
  0x73   : > { %808 = vmatpush1.msra.mxu1 %v426_v27  ;;  %714 = vmatprep.subr.mxu0 %v295_v28  ;;  %v391_v61 = vld [vmem:[#allocation4 + $0x438] sm:$0xff]  ;;  %v262_v62 = vld [vmem:[#allocation4 + $0x30] sm:$0xff] }
  0x74   : > { %809 = vmatprep.subr.mxu1 %v423_v29  ;;  %715 = vmatpush1.msra.mxu0 %v294_v30  ;;  %v390_v0 = vld [vmem:[#allocation4 + $0x430] sm:$0xff]  ;;  %v259_v4 = vld [vmem:[#allocation4 + $0x18] sm:$0xff] }
  0x75   : > { %810 = vmatpush1.msra.mxu1 %v422_v31  ;;  %716 = vmatprep.subr.mxu0 %v291_v32  ;;  %v387_v5 = vld [vmem:[#allocation4 + $0x418] sm:$0xff]  ;;  %v258_v6 = vld [vmem:[#allocation4 + $0x10] sm:$0xff] }
  0x76   : > { %811 = vmatprep.subr.mxu1 %v419_v33  ;;  %717 = vmatpush1.msra.mxu0 %v290_v34  ;;  %v386_v7 = vld [vmem:[#allocation4 + $0x410] sm:$0xff]  ;;  %v383_v8 = vld [vmem:[#allocation4 + $0x3f8] sm:$0xff] }
  0x77   : > { %812 = vmatpush1.msra.mxu1 %v418_v35  ;;  %718 = vmatprep.subr.mxu0 %v287_v36  ;;  %v511_v9 = vld [vmem:[#allocation4 + $0x7f8] sm:$0xff]  ;;  %v382_v10 = vld [vmem:[#allocation4 + $0x3f0] sm:$0xff] }
  0x78   : > { %813 = vmatprep.subr.mxu1 %v415_v37  ;;  %719 = vmatpush1.msra.mxu0 %v286_v38  ;;  %v510_v11 = vld [vmem:[#allocation4 + $0x7f0] sm:$0xff]  ;;  %v379_v12 = vld [vmem:[#allocation4 + $0x3d8] sm:$0xff] }
  0x79   : > { %814 = vmatpush1.msra.mxu1 %v414_v39  ;;  %720 = vmatprep.subr.mxu0 %v283_v40  ;;  %v507_v13 = vld [vmem:[#allocation4 + $0x7d8] sm:$0xff]  ;;  %v378_v14 = vld [vmem:[#allocation4 + $0x3d0] sm:$0xff]  ;;  %v3486_v40 = vld [vmem:[%s3451_s13 + $0x11] sm:$0xff] }
  0x7a   : > { %815 = vmatprep.subr.mxu1 %v411_v41  ;;  %721 = vmatpush1.msra.mxu0 %v282_v42  ;;  %v506_v15 = vld [vmem:[#allocation4 + $0x7d0] sm:$0xff]  ;;  %v375_v16 = vld [vmem:[#allocation4 + $0x3b8] sm:$0xff]  ;;  %v3489_v41 = vld [vmem:[%s3451_s13 + $0x13] sm:$0xff] }
  0x7b   : > { %816 = vmatpush1.msra.mxu1 %v410_v43  ;;  %722 = vmatprep.subr.mxu0 %v279_v44  ;;  %v503_v17 = vld [vmem:[#allocation4 + $0x7b8] sm:$0xff]  ;;  %v374_v18 = vld [vmem:[#allocation4 + $0x3b0] sm:$0xff]  ;;  %v3492_v44 = vld [vmem:[%s3451_s13 + $0x10] sm:$0xff] }
  0x7c   : > { %817 = vmatprep.subr.mxu1 %v407_v45  ;;  %723 = vmatpush1.msra.mxu0 %v278_v46  ;;  %v502_v19 = vld [vmem:[#allocation4 + $0x7b0] sm:$0xff]  ;;  %v371_v20 = vld [vmem:[#allocation4 + $0x398] sm:$0xff]  ;;  %v3495_v45 = vld [vmem:[%s3451_s13 + $0x12] sm:$0xff] }
  0x7d   : > { %818 = vmatpush1.msra.mxu1 %v406_v47  ;;  %724 = vmatprep.subr.mxu0 %v275_v48  ;;  %v499_v21 = vld [vmem:[#allocation4 + $0x798] sm:$0xff]  ;;  %v370_v22 = vld [vmem:[#allocation4 + $0x390] sm:$0xff] }
  0x7e   : > { %819 = vmatprep.subr.mxu1 %v403_v49  ;;  %725 = vmatpush1.msra.mxu0 %v274_v50  ;;  %v498_v23 = vld [vmem:[#allocation4 + $0x790] sm:$0xff]  ;;  %v367_v24 = vld [vmem:[#allocation4 + $0x378] sm:$0xff] }
  0x7f   : > { %820 = vmatpush1.msra.mxu1 %v402_v51  ;;  %726 = vmatprep.subr.mxu0 %v271_v52  ;;  %v495_v25 = vld [vmem:[#allocation4 + $0x778] sm:$0xff]  ;;  %v366_v26 = vld [vmem:[#allocation4 + $0x370] sm:$0xff] }
  0x80   : > { %821 = vmatprep.subr.mxu1 %v399_v53  ;;  %727 = vmatpush1.msra.mxu0 %v270_v54  ;;  %v494_v27 = vld [vmem:[#allocation4 + $0x770] sm:$0xff]  ;;  %v3470_v28 = vld [vmem:[%s3451_s13 + $0x9] sm:$0xff] }
  0x81   : > { %822 = vmatpush1.msra.mxu1 %v398_v55  ;;  %728 = vmatprep.subr.mxu0 %v267_v56  ;;  %v3473_v29 = vld [vmem:[%s3451_s13 + $0xb] sm:$0xff]  ;;  %v362_v34 = vld [vmem:[#allocation4 + $0x350] sm:$0xff]  ;;  %v3508_v56 = vld [vmem:[%s3451_s13 + $0x18] sm:$0xff] }
  0x82   : > { %823 = vmatprep.subr.mxu1 %v395_v57  ;;  %729 = vmatpush1.msra.mxu0 %v266_v58  ;;  %v363_v30 = vld [vmem:[#allocation4 + $0x358] sm:$0xff]  ;;  %v490_v35 = vld [vmem:[#allocation4 + $0x750] sm:$0xff] }
  0x83   : > { %824 = vmatpush1.msra.mxu1 %v394_v59  ;;  %730 = vmatprep.subr.mxu0 %v263_v60  ;;  %v491_v31 = vld [vmem:[#allocation4 + $0x758] sm:$0xff]  ;;  %v358_v38 = vld [vmem:[#allocation4 + $0x330] sm:$0xff] }
  0x84   : > { %825 = vmatprep.subr.mxu1 %v391_v61  ;;  %731 = vmatpush1.msra.mxu0 %v262_v62  ;;  %v3476_v32 = vld [vmem:[%s3451_s13 + $0x8] sm:$0xff]  ;;  %v486_v39 = vld [vmem:[#allocation4 + $0x730] sm:$0xff] }
  0x85   : > { %826 = vmatpush1.msra.mxu1 %v390_v0  ;;  %732 = vmatprep.subr.mxu0 %v259_v4  ;;  %v3479_v33 = vld [vmem:[%s3451_s13 + $0xa] sm:$0xff]  ;;  %v354_v46 = vld [vmem:[#allocation4 + $0x310] sm:$0xff] }
  0x86   : > { %827 = vmatprep.subr.mxu1 %v387_v5  ;;  %733 = vmatpush1.msra.mxu0 %v258_v6  ;;  %v359_v36 = vld [vmem:[#allocation4 + $0x338] sm:$0xff]  ;;  %v482_v47 = vld [vmem:[#allocation4 + $0x710] sm:$0xff] }
  0x87   : > { %828 = vmatpush1.msra.mxu1 %v386_v7  ;;  %734 = vmatprep.subr.mxu0 %v383_v8  ;;  %v487_v37 = vld [vmem:[#allocation4 + $0x738] sm:$0xff]  ;;  %v350_v50 = vld [vmem:[#allocation4 + $0x2f0] sm:$0xff] }
  0x88   : > { %829 = vmatprep.subr.mxu1 %v511_v9  ;;  %735 = vmatpush2.msra.mxu0 %v382_v10  ;;  %v355_v42 = vld [vmem:[#allocation4 + $0x318] sm:$0xff]  ;;  %v478_v51 = vld [vmem:[#allocation4 + $0x6f0] sm:$0xff] }
  0x89   : > { %830 = vmatpush2.msra.mxu1 %v510_v11  ;;  %736 = vmatprep.subr.mxu0 %v379_v12  ;;  %v483_v43 = vld [vmem:[#allocation4 + $0x718] sm:$0xff]  ;;  %v3502_v52 = vld [vmem:[%s3451_s13 + $0x19] sm:$0xff] }
  0x8a   : > { %831 = vmatprep.subr.mxu1 %v507_v13  ;;  %737 = vmatpush2.msra.mxu0 %v378_v14  ;;  %v351_v48 = vld [vmem:[#allocation4 + $0x2f8] sm:$0xff]  ;;  %v3505_v53 = vld [vmem:[%s3451_s13 + $0x1b] sm:$0xff] }
  0x8b   : > { %832 = vmatpush2.msra.mxu1 %v506_v15  ;;  %738 = vmatprep.subr.mxu0 %v375_v16  ;;  %v479_v49 = vld [vmem:[#allocation4 + $0x6f8] sm:$0xff]  ;;  %v3511_v57 = vld [vmem:[%s3451_s13 + $0x1a] sm:$0xff] }
  0x8c   : > { %833 = vmatprep.subr.mxu1 %v503_v17  ;;  %739 = vmatpush2.msra.mxu0 %v374_v18  ;;  %v347_v54 = vld [vmem:[#allocation4 + $0x2d8] sm:$0xff]  ;;  %v346_v58 = vld [vmem:[#allocation4 + $0x2d0] sm:$0xff] }
  0x8d   : > { %834 = vmatpush2.msra.mxu1 %v502_v19  ;;  %740 = vmatprep.subr.mxu0 %v371_v20  ;;  %v475_v55 = vld [vmem:[#allocation4 + $0x6d8] sm:$0xff]  ;;  %v474_v59 = vld [vmem:[#allocation4 + $0x6d0] sm:$0xff] }
  0x8e   : > { %835 = vmatprep.subr.mxu1 %v499_v21  ;;  %741 = vmatpush2.msra.mxu0 %v370_v22  ;;  %v343_v60 = vld [vmem:[#allocation4 + $0x2b8] sm:$0xff]  ;;  %v342_v62 = vld [vmem:[#allocation4 + $0x2b0] sm:$0xff] }
  0x8f   : > { %836 = vmatpush2.msra.mxu1 %v498_v23  ;;  %742 = vmatprep.subr.mxu0 %v367_v24  ;;  %v471_v61 = vld [vmem:[#allocation4 + $0x6b8] sm:$0xff]  ;;  %v470_v0 = vld [vmem:[#allocation4 + $0x6b0] sm:$0xff] }
  0x90   : > { %837 = vmatprep.subr.mxu1 %v495_v25  ;;  %743 = vmatpush2.msra.mxu0 %v366_v26  ;;  %v3518_v4 = vld [vmem:[%s3451_s13 + $0x21] sm:$0xff] }
  0x91   : > { %838 = vmatpush2.msra.mxu1 %v494_v27  ;;  %582 = vmatprep.mubr.f32.mxu0 %v3470_v28  ;;  %v3521_v5 = vld [vmem:[%s3451_s13 + $0x23] sm:$0xff] }
  0x92   : > { %677 = vmatprep.mubr.f32.mxu1 %v3473_v29  ;;  %744 = vmatprep.subr.mxu0 %v363_v30  ;;  %v339_v6 = vld [vmem:[#allocation4 + $0x298] sm:$0xff]  ;;  %v3524_v8 = vld [vmem:[%s3451_s13 + $0x20] sm:$0xff]  ;;  %v943_v30 = vld [vmem:[%s4749_s3 + $0xf8] sm:$0xff] }
  0x93   : > { %839 = vmatprep.subr.mxu1 %v491_v31  ;;  %583 = vmatmul.mubr.f32.gmra.mxu0 %v3476_v32  ;;  %v467_v7 = vld [vmem:[#allocation4 + $0x698] sm:$0xff]  ;;  %v338_v10 = vld [vmem:[#allocation4 + $0x290] sm:$0xff]  ;;  %v975_v31 = vld [vmem:[%s4749_s3 + $0x1f8] sm:$0xff] }
  0x94   : > { %678 = vmatmul.mubr.f32.gmra.mxu1 %v3479_v33  ;;  %745 = vmatpush2.msra.mxu0 %v362_v34  ;;  %v3527_v9 = vld [vmem:[%s3451_s13 + $0x22] sm:$0xff]  ;;  %v927_v34 = vld [vmem:[%s4749_s3 + $0x78] sm:$0xff] }
  0x95   : > { %840 = vmatpush2.msra.mxu1 %v490_v35  ;;  %746 = vmatprep.subr.mxu0 %v359_v36  ;;  %v466_v11 = vld [vmem:[#allocation4 + $0x690] sm:$0xff]  ;;  %v335_v12 = vld [vmem:[#allocation4 + $0x278] sm:$0xff]  ;;  %v939_v36 = vld [vmem:[%s4749_s3 + $0xd8] sm:$0xff] }
  0x96   : > { %841 = vmatprep.subr.mxu1 %v487_v37  ;;  %747 = vmatpush2.msra.mxu0 %v358_v38  ;;  %v463_v13 = vld [vmem:[#allocation4 + $0x678] sm:$0xff]  ;;  %v334_v14 = vld [vmem:[#allocation4 + $0x270] sm:$0xff]  ;;  %v923_v37 = vld [vmem:[%s4749_s3 + $0x58] sm:$0xff] }
  0x97   : > { %842 = vmatpush2.msra.mxu1 %v486_v39  ;;  %588 = vmatprep.mubr.f32.mxu0 %v3486_v40  ;;  %v462_v15 = vld [vmem:[#allocation4 + $0x670] sm:$0xff]  ;;  %v331_v16 = vld [vmem:[#allocation4 + $0x258] sm:$0xff]  ;;  %v938_v38 = vld [vmem:[%s4749_s3 + $0xd0] sm:$0xff] }
  0x98   : > { %683 = vmatprep.mubr.f32.mxu1 %v3489_v41  ;;  %748 = vmatprep.subr.mxu0 %v355_v42  ;;  %v459_v17 = vld [vmem:[#allocation4 + $0x658] sm:$0xff]  ;;  %v330_v18 = vld [vmem:[#allocation4 + $0x250] sm:$0xff]  ;;  %v922_v39 = vld [vmem:[%s4749_s3 + $0x50] sm:$0xff] }
  0x99   : > { %843 = vmatprep.subr.mxu1 %v483_v43  ;;  %589 = vmatmul.mubr.f32.gmra.mxu0 %v3492_v44  ;;  %v458_v19 = vld [vmem:[#allocation4 + $0x650] sm:$0xff]  ;;  %v327_v20 = vld [vmem:[#allocation4 + $0x238] sm:$0xff] }
  0x9a   : > { %684 = vmatmul.mubr.f32.gmra.mxu1 %v3495_v45  ;;  %749 = vmatpush2.msra.mxu0 %v354_v46  ;;  %v455_v21 = vld [vmem:[#allocation4 + $0x638] sm:$0xff]  ;;  %v326_v22 = vld [vmem:[#allocation4 + $0x230] sm:$0xff]  ;;  %v934_v46 = vld [vmem:[%s4749_s3 + $0xb0] sm:$0xff] }
  0x9b   : > { %844 = vmatpush2.msra.mxu1 %v482_v47  ;;  %750 = vmatprep.subr.mxu0 %v351_v48  ;;  %v454_v23 = vld [vmem:[#allocation4 + $0x630] sm:$0xff]  ;;  %v323_v24 = vld [vmem:[#allocation4 + $0x218] sm:$0xff]  ;;  %v918_v47 = vld [vmem:[%s4749_s3 + $0x30] sm:$0xff] }
  0x9c   : > { %845 = vmatprep.subr.mxu1 %v479_v49  ;;  %751 = vmatpush2.msra.mxu0 %v350_v50  ;;  %v451_v25 = vld [vmem:[#allocation4 + $0x618] sm:$0xff]  ;;  %v322_v26 = vld [vmem:[#allocation4 + $0x210] sm:$0xff] }
  0x9d   : > { %846 = vmatpush2.msra.mxu1 %v478_v51  ;;  %594 = vmatprep.mubr.f32.mxu0 %v3502_v52  ;;  %v450_v27 = vld [vmem:[#allocation4 + $0x610] sm:$0xff]  ;;  %v933_v48 = vld [vmem:[%s4749_s3 + $0xa8] sm:$0xff] }
  0x9e   : > { %689 = vmatprep.mubr.f32.mxu1 %v3505_v53  ;;  %752 = vmatprep.subr.mxu0 %v347_v54  ;;  %v924_v35 = vld [vmem:[%s4749_s3 + $0x60] sm:$0xff]  ;;  %v917_v49 = vld [vmem:[%s4749_s3 + $0x28] sm:$0xff]  ;;  %v930_v54 = vld [vmem:[%s4749_s3 + $0x90] sm:$0xff] }
  0x9f   : > { %847 = vmatprep.subr.mxu1 %v475_v55  ;;  %595 = vmatmul.mubr.f32.gmra.mxu0 %v3508_v56  ;;  %v936_v42 = vld [vmem:[%s4749_s3 + $0xc0] sm:$0xff]  ;;  %v914_v55 = vld [vmem:[%s4749_s3 + $0x10] sm:$0xff] }
  0xa0   : > { %690 = vmatmul.mubr.f32.gmra.mxu1 %v3511_v57  ;;  %753 = vmatpush2.msra.mxu0 %v346_v58  ;;  %v920_v43 = vld [vmem:[%s4749_s3 + $0x40] sm:$0xff] }
  0xa1   : > { %848 = vmatpush2.msra.mxu1 %v474_v59  ;;  %754 = vmatprep.subr.mxu0 %v343_v60  ;;  %v932_v50 = vld [vmem:[%s4749_s3 + $0xa0] sm:$0xff]  ;;  %v973_v60 = vld [vmem:[%s4749_s3 + $0x1e8] sm:$0xff] }
  0xa2   : > { %849 = vmatprep.subr.mxu1 %v471_v61  ;;  %755 = vmatpush2.msra.mxu0 %v342_v62  ;;  %v916_v51 = vld [vmem:[%s4749_s3 + $0x20] sm:$0xff]  ;;  %v957_v61 = vld [vmem:[%s4749_s3 + $0x168] sm:$0xff] }
  0xa3   : > { %850 = vmatpush2.msra.mxu1 %v470_v0  ;;  %600 = vmatprep.mubr.f32.mxu0 %v3518_v4  ;;  %v928_v58 = vld [vmem:[%s4749_s3 + $0x80] sm:$0xff] }
  0xa4   : > { %695 = vmatprep.mubr.f32.mxu1 %v3521_v5  ;;  %756 = vmatprep.subr.mxu0 %v339_v6  ;;  %v912_v59 = vld [vmem:[%s4749_s3] sm:$0xff]  ;;  %v970_v6 = vld [vmem:[%s4749_s3 + $0x1d0] sm:$0xff] }
  0xa5   : > { %851 = vmatprep.subr.mxu1 %v467_v7  ;;  %601 = vmatmul.mubr.f32.gmra.mxu0 %v3524_v8  ;;  %v972_v62 = vld [vmem:[%s4749_s3 + $0x1e0] sm:$0xff]  ;;  %v954_v7 = vld [vmem:[%s4749_s3 + $0x150] sm:$0xff] }
  0xa6   : > { %696 = vmatmul.mubr.f32.gmra.mxu1 %v3527_v9  ;;  %757 = vmatpush2.msra.mxu0 %v338_v10  ;;  %v956_v0 = vld [vmem:[%s4749_s3 + $0x160] sm:$0xff] }
  0xa7   : > { %852 = vmatpush2.msra.mxu1 %v466_v11  ;;  %758 = vmatprep.subr.mxu0 %v335_v12  ;;  %v968_v10 = vld [vmem:[%s4749_s3 + $0x1c0] sm:$0xff]  ;;  %v967_v12 = vld [vmem:[%s4749_s3 + $0x1b8] sm:$0xff] }
  0xa8   : > { %853 = vmatprep.subr.mxu1 %v463_v13  ;;  %759 = vmatpush2.msra.mxu0 %v334_v14  ;;  %v952_v11 = vld [vmem:[%s4749_s3 + $0x140] sm:$0xff]  ;;  %v951_v13 = vld [vmem:[%s4749_s3 + $0x138] sm:$0xff]  ;;  %v966_v14 = vld [vmem:[%s4749_s3 + $0x1b0] sm:$0xff] }
  0xa9   : > { %854 = vmatpush2.msra.mxu1 %v462_v15  ;;  %760 = vmatprep.subr.mxu0 %v331_v16  ;;  %v950_v15 = vld [vmem:[%s4749_s3 + $0x130] sm:$0xff]  ;;  %v965_v16 = vld [vmem:[%s4749_s3 + $0x1a8] sm:$0xff] }
  0xaa   : > { %855 = vmatprep.subr.mxu1 %v459_v17  ;;  %761 = vmatpush2.msra.mxu0 %v330_v18  ;;  %v949_v17 = vld [vmem:[%s4749_s3 + $0x128] sm:$0xff]  ;;  %v964_v18 = vld [vmem:[%s4749_s3 + $0x1a0] sm:$0xff] }
  0xab   : > { %856 = vmatpush2.msra.mxu1 %v458_v19  ;;  %762 = vmatprep.subr.mxu0 %v327_v20  ;;  %v948_v19 = vld [vmem:[%s4749_s3 + $0x120] sm:$0xff]  ;;  %v963_v20 = vld [vmem:[%s4749_s3 + $0x198] sm:$0xff] }
  0xac   : > { %857 = vmatprep.subr.mxu1 %v455_v21  ;;  %763 = vmatpush2.msra.mxu0 %v326_v22  ;;  %v947_v21 = vld [vmem:[%s4749_s3 + $0x118] sm:$0xff]  ;;  %v962_v22 = vld [vmem:[%s4749_s3 + $0x190] sm:$0xff] }
  0xad   : > { %858 = vmatpush2.msra.mxu1 %v454_v23  ;;  %764 = vmatprep.subr.mxu0 %v323_v24  ;;  %v946_v23 = vld [vmem:[%s4749_s3 + $0x110] sm:$0xff]  ;;  %v961_v24 = vld [vmem:[%s4749_s3 + $0x188] sm:$0xff] }
  0xae   : > { %859 = vmatprep.subr.mxu1 %v451_v25  ;;  %765 = vmatpush2.msra.mxu0 %v322_v26  ;;  %v945_v25 = vld [vmem:[%s4749_s3 + $0x108] sm:$0xff]  ;;  %v960_v26 = vld [vmem:[%s4749_s3 + $0x180] sm:$0xff] }
  0xaf   : > { %766 = vmatprep.mubr.f32.mxu0 %v3454_v63  ;;  %860 = vmatpush2.msra.mxu1 %v450_v27  ;;  %v959_v63 = vld [vmem:[%s4749_s3 + $0x178] sm:$0xff] }
  0xb0   : > { %861 = vmatprep.mubr.f32.mxu1 %v3457_v1  ;;  %767 = vmatmul.mubr.f32.vlgmr.msra.gmra.mxu0 %v3460_v2  ;;  %v942_v1 = vld [vmem:[%s4749_s3 + $0xf0] sm:$0xff]  ;;  %v1281_v27 = vld [vmem:[#allocation4 + $0x1e8] sm:$0xff] }
  0xb1   : > { %862 = vmatmul.mubr.f32.vlgmr.msra.gmra.mxu1 %v3463_v3  ;;  %772 = vmatprep.mubr.f32.mxu0 %v3470_v28  ;;  %v974_v2 = vld [vmem:[%s4749_s3 + $0x1f0] sm:$0xff] }
  0xb2   : > { %867 = vmatprep.mubr.f32.mxu1 %v3473_v29  ;;  %2951 = vmatprep.subr.mxu0 %v943_v30  ;;  %v926_v3 = vld [vmem:[%s4749_s3 + $0x70] sm:$0xff]  ;;  %v941_v29 = vld [vmem:[%s4749_s3 + $0xe8] sm:$0xff]  ;;  %v944_v30 = vld [vmem:[%s4749_s3 + $0x100] sm:$0xff] }
  0xb3   : > { %2998 = vmatprep.subr.mxu1 %v975_v31  ;;  %2952 = vmatpush3.msra.mxu0 %v927_v34  ;;  %v958_v28 = vld [vmem:[%s4749_s3 + $0x170] sm:$0xff]  ;;  %v1409_v31 = vld [vmem:[#allocation4 + $0x5e8] sm:$0xff] }
  0xb4   : > { %2999 = vmatpush3.msra.mxu1 %v959_v63  ;;  %773 = vmatmul.mubr.f32.gmra.mxu0 %v3476_v32  ;;  %v925_v32 = vld [vmem:[%s4749_s3 + $0x68] sm:$0xff] }
  0xb5   : > { %868 = vmatmul.mubr.f32.gmra.mxu1 %v3479_v33  ;;  %778 = vmatprep.mubr.f32.mxu0 %v3486_v40  ;;  %v940_v33 = vld [vmem:[%s4749_s3 + $0xe0] sm:$0xff]  ;;  %v937_v40 = vld [vmem:[%s4749_s3 + $0xc8] sm:$0xff] }
  0xb6   : > { %873 = vmatprep.mubr.f32.mxu1 %v3489_v41  ;;  %2953 = vmatprep.subr.mxu0 %v942_v1  ;;  %v921_v41 = vld [vmem:[%s4749_s3 + $0x48] sm:$0xff] }
  0xb7   : > { %3000 = vmatprep.subr.mxu1 %v974_v2  ;;  %2954 = vmatpush3.msra.mxu0 %v926_v3 }
  0xb8   : > { %3001 = vmatpush3.msra.mxu1 %v958_v28  ;;  %779 = vmatmul.mubr.f32.gmra.mxu0 %v3492_v44  ;;  %v935_v44 = vld [vmem:[%s4749_s3 + $0xb8] sm:$0xff] }
  0xb9   : > { %874 = vmatmul.mubr.f32.gmra.mxu1 %v3495_v45  ;;  %784 = vmatprep.mubr.f32.mxu0 %v3502_v52  ;;  %v919_v45 = vld [vmem:[%s4749_s3 + $0x38] sm:$0xff] }
  0xba   : > { %879 = vmatprep.mubr.f32.mxu1 %v3505_v53  ;;  %2955 = vmatprep.subr.mxu0 %v941_v29  ;;  %v931_v52 = vld [vmem:[%s4749_s3 + $0x98] sm:$0xff] }
  0xbb   : > { %2956 = vmatpush3.msra.mxu0 %v925_v32  ;;  %v915_v53 = vld [vmem:[%s4749_s3 + $0x18] sm:$0xff]  ;;  %3002 = vmatprep.subr.mxu1 %v973_v60  ;;  %v1228_v60 = vld [vmem:[#allocation4 + $0x40] sm:$0xff] }
  0xbc   : > { %785 = vmatmul.mubr.f32.gmra.mxu0 %v3508_v56  ;;  %2957 = vmatprep.subr.mxu0 %v940_v33  ;;  %v929_v56 = vld [vmem:[%s4749_s3 + $0x88] sm:$0xff]  ;;  %v1280_v33 = vld [vmem:[#allocation4 + $0x1e0] sm:$0xff] }
  0xbd   : > { %880 = vmatmul.mubr.f32.gmra.mxu1 %v3511_v57  ;;  %790 = vmatprep.mubr.f32.mxu0 %v3518_v4  ;;  %v913_v57 = vld [vmem:[%s4749_s3 + $0x8] sm:$0xff]  ;;  %v971_v4 = vld [vmem:[%s4749_s3 + $0x1d8] sm:$0xff] }
  0xbe   : > { %885 = vmatprep.mubr.f32.mxu1 %v3521_v5  ;;  %2958 = vmatpush3.msra.mxu0 %v924_v35  ;;  %v955_v5 = vld [vmem:[%s4749_s3 + $0x158] sm:$0xff] }
  0xbf   : > { %2959 = vmatprep.subr.mxu0 %v939_v36  ;;  %3003 = vmatpush3.msra.mxu1 %v957_v61  ;;  %v1277_v35 = vld [vmem:[#allocation4 + $0x1c8] sm:$0xff]  ;;  %v1276_v36 = vld [vmem:[#allocation4 + $0x1c0] sm:$0xff] }
  0xc0   : > { %791 = vmatmul.mubr.f32.gmra.mxu0 %v3524_v8  ;;  %3004 = vmatprep.subr.mxu1 %v972_v62  ;;  %v969_v8 = vld [vmem:[%s4749_s3 + $0x1c8] sm:$0xff]  ;;  %v1225_v61 = vld [vmem:[#allocation4 + $0x28] sm:$0xff]  ;;  %v1224_v62 = vld [vmem:[#allocation4 + $0x20] sm:$0xff] }
  0xc1   : > { %886 = vmatmul.mubr.f32.gmra.mxu1 %v3527_v9  ;;  %2960 = vmatpush3.msra.mxu0 %v923_v37  ;;  %v953_v9 = vld [vmem:[%s4749_s3 + $0x148] sm:$0xff]  ;;  %v1273_v37 = vld [vmem:[#allocation4 + $0x1a8] sm:$0xff] }
  0xc2   : > { %2961 = vmatprep.subr.mxu0 %v938_v38  ;;  %3005 = vmatpush3.msra.mxu1 %v956_v0  ;;  %v1272_v38 = vld [vmem:[#allocation4 + $0x1a0] sm:$0xff]  ;;  %v1221_v0 = vld [vmem:[#allocation4 + $0x8] sm:$0xff] }
  0xc3   : > { %2962 = vmatpush3.msra.mxu0 %v922_v39  ;;  %3006 = vmatprep.subr.mxu1 %v971_v4  ;;  %v1269_v39 = vld [vmem:[#allocation4 + $0x188] sm:$0xff]  ;;  %v1220_v4 = vld [vmem:[#allocation4] sm:$0xff] }
  0xc4   : > { %2963 = vmatprep.subr.mxu0 %v937_v40  ;;  %3007 = vmatpush3.msra.mxu1 %v955_v5  ;;  %v1268_v40 = vld [vmem:[#allocation4 + $0x180] sm:$0xff]  ;;  %v1345_v5 = vld [vmem:[#allocation4 + $0x3e8] sm:$0xff] }
  0xc5   : > { %2964 = vmatpush3.msra.mxu0 %v921_v41  ;;  %3008 = vmatprep.subr.mxu1 %v970_v6  ;;  %v1265_v41 = vld [vmem:[#allocation4 + $0x168] sm:$0xff]  ;;  %v1344_v6 = vld [vmem:[#allocation4 + $0x3e0] sm:$0xff] }
  0xc6   : > { %2965 = vmatprep.subr.mxu0 %v936_v42  ;;  %3009 = vmatpush3.msra.mxu1 %v954_v7  ;;  %v1264_v42 = vld [vmem:[#allocation4 + $0x160] sm:$0xff]  ;;  %v1341_v7 = vld [vmem:[#allocation4 + $0x3c8] sm:$0xff] }
  0xc7   : > { %2966 = vmatpush3.msra.mxu0 %v920_v43  ;;  %3010 = vmatprep.subr.mxu1 %v969_v8  ;;  %v1261_v43 = vld [vmem:[#allocation4 + $0x148] sm:$0xff]  ;;  %v1340_v8 = vld [vmem:[#allocation4 + $0x3c0] sm:$0xff] }
  0xc8   : > { %2967 = vmatprep.subr.mxu0 %v935_v44  ;;  %3011 = vmatpush3.msra.mxu1 %v953_v9  ;;  %v1260_v44 = vld [vmem:[#allocation4 + $0x140] sm:$0xff]  ;;  %v1337_v9 = vld [vmem:[#allocation4 + $0x3a8] sm:$0xff] }
  0xc9   : > { %2968 = vmatpush3.msra.mxu0 %v919_v45  ;;  %3012 = vmatprep.subr.mxu1 %v968_v10  ;;  %v1257_v45 = vld [vmem:[#allocation4 + $0x128] sm:$0xff]  ;;  %v1336_v10 = vld [vmem:[#allocation4 + $0x3a0] sm:$0xff] }
  0xca   : > { %2969 = vmatprep.subr.mxu0 %v934_v46  ;;  %3013 = vmatpush3.msra.mxu1 %v952_v11  ;;  %v1256_v46 = vld [vmem:[#allocation4 + $0x120] sm:$0xff]  ;;  %v1333_v11 = vld [vmem:[#allocation4 + $0x388] sm:$0xff] }
  0xcb   : > { %2970 = vmatpush3.msra.mxu0 %v918_v47  ;;  %3014 = vmatprep.subr.mxu1 %v967_v12  ;;  %v1253_v47 = vld [vmem:[#allocation4 + $0x108] sm:$0xff]  ;;  %v1332_v12 = vld [vmem:[#allocation4 + $0x380] sm:$0xff] }
  0xcc   : > { %2971 = vmatprep.subr.mxu0 %v933_v48  ;;  %3015 = vmatpush3.msra.mxu1 %v951_v13  ;;  %v1252_v48 = vld [vmem:[#allocation4 + $0x100] sm:$0xff] }
  0xcd   : > { %2972 = vmatpush3.msra.mxu0 %v917_v49  ;;  %3016 = vmatprep.subr.mxu1 %v966_v14  ;;  %v1249_v49 = vld [vmem:[#allocation4 + $0xe8] sm:$0xff] }
  0xce   : > { %2973 = vmatprep.subr.mxu0 %v932_v50  ;;  %3017 = vmatpush3.msra.mxu1 %v950_v15  ;;  %v1248_v50 = vld [vmem:[#allocation4 + $0xe0] sm:$0xff]  ;;  %v1329_v15 = vld [vmem:[#allocation4 + $0x368] sm:$0xff] }
  0xcf   : > { %2974 = vmatpush3.msra.mxu0 %v916_v51  ;;  %3018 = vmatprep.subr.mxu1 %v965_v16  ;;  %v1245_v51 = vld [vmem:[#allocation4 + $0xc8] sm:$0xff] }
  0xd0   : > { %2975 = vmatprep.subr.mxu0 %v931_v52  ;;  %3019 = vmatpush3.msra.mxu1 %v949_v17  ;;  %v1244_v52 = vld [vmem:[#allocation4 + $0xc0] sm:$0xff] }
  0xd1   : > { %2976 = vmatpush3.msra.mxu0 %v915_v53  ;;  %3020 = vmatprep.subr.mxu1 %v964_v18  ;;  %v1241_v53 = vld [vmem:[#allocation4 + $0xa8] sm:$0xff]  ;;  %v1328_v17 = vld [vmem:[#allocation4 + $0x360] sm:$0xff] }
  0xd2   : > { %2977 = vmatprep.subr.mxu0 %v930_v54  ;;  %3021 = vmatpush3.msra.mxu1 %v948_v19  ;;  %v1240_v54 = vld [vmem:[#allocation4 + $0xa0] sm:$0xff] }
  0xd3   : > { %2978 = vmatpush3.msra.mxu0 %v914_v55  ;;  %3022 = vmatprep.subr.mxu1 %v963_v20  ;;  %v1237_v55 = vld [vmem:[#allocation4 + $0x88] sm:$0xff] }
  0xd4   : > { %2979 = vmatprep.subr.mxu0 %v929_v56  ;;  %3023 = vmatpush3.msra.mxu1 %v947_v21  ;;  %v1236_v56 = vld [vmem:[#allocation4 + $0x80] sm:$0xff]  ;;  %v1325_v20 = vld [vmem:[#allocation4 + $0x348] sm:$0xff] }
  0xd5   : > { %2980 = vmatpush3.msra.mxu0 %v913_v57  ;;  %3024 = vmatprep.subr.mxu1 %v962_v22  ;;  %v1233_v57 = vld [vmem:[#allocation4 + $0x68] sm:$0xff]  ;;  %v1324_v22 = vld [vmem:[#allocation4 + $0x340] sm:$0xff] }
  0xd6   : > { %2981 = vmatprep.subr.mxu0 %v928_v58  ;;  %3025 = vmatpush3.msra.mxu1 %v946_v23  ;;  %v1232_v58 = vld [vmem:[#allocation4 + $0x60] sm:$0xff] }
  0xd7   : > { %2982 = vmatpush3.msra.mxu0 %v912_v59  ;;  %3026 = vmatprep.subr.mxu1 %v961_v24  ;;  %v1229_v59 = vld [vmem:[#allocation4 + $0x48] sm:$0xff] }
  0xd8   : > { %3027 = vmatpush3.msra.mxu1 %v945_v25  ;;  %1476 = vmatprep.subr.mxu0 %v1281_v27  ;;  %v1321_v24 = vld [vmem:[#allocation4 + $0x328] sm:$0xff] }
  0xd9   : > { %3028 = vmatprep.subr.mxu1 %v960_v26 }
  0xda   : > { %3029 = vmatpush3.msra.mxu1 %v944_v30  ;;  %v1320_v30 = vld [vmem:[#allocation4 + $0x320] sm:$0xff] }
  0xdb   : > { %1571 = vmatprep.subr.mxu1 %v1409_v31 }
 0x126   : > { %v578_v34 = vpop.f32.mrf.mxu0 }
 0x127   : > { %v673_v63 = vpop.f32.mrf.mxu1 }
 0x128   : > { %v674_v1 = vadd.f32 %v673_v63, %v578_v34  ;;  %v580_v2 = vpop.f32.mrf.mxu0  ;;  %v1317_v34 = vld [vmem:[#allocation4 + $0x308] sm:$0xff] }
 0x129   : > { %v675_v3 = vpop.f32.mrf.mxu1 }
 0x12a   : > { %v676_v28 = vadd.f32 %v675_v3, %v580_v2  ;;  %v892_v32 = vmul.f32 %v674_v1, %v674_v1  ;;  %v1316_v2 = vld [vmem:[#allocation4 + $0x300] sm:$0xff] }
 0x12c   : > { %v893_v29 = vmul.f32 %v676_v28, %v676_v28  ;;  %v1313_v28 = vld [vmem:[#allocation4 + $0x2e8] sm:$0xff] }
 0x12e   : > { %1040 = vmatprep.mubr.f32.mxu0 %v893_v29 }
 0x12f   : > { %1041 = vmatmul.mubr.f32.vlgmr.msra.gmra.mxu0 %v892_v32  ;;  %v1312_v32 = vld [vmem:[#allocation4 + $0x2e0] sm:$0xff] }
 0x130   : > { %1477 = vmatpush1.msra.mxu0 %v1280_v33 }
 0x131   : > { %1478 = vmatprep.subr.mxu0 %v1277_v35  ;;  %v1309_v35 = vld [vmem:[#allocation4 + $0x2c8] sm:$0xff] }
 0x132   : > { %1479 = vmatpush1.msra.mxu0 %v1276_v36 }
 0x133   : > { %1480 = vmatprep.subr.mxu0 %v1273_v37 }
 0x134   : > { %1481 = vmatpush1.msra.mxu0 %v1272_v38  ;;  %v1308_v38 = vld [vmem:[#allocation4 + $0x2c0] sm:$0xff] }
 0x135   : > { %1482 = vmatprep.subr.mxu0 %v1269_v39 }
 0x136   : > { %1483 = vmatpush1.msra.mxu0 %v1268_v40  ;;  %v1305_v40 = vld [vmem:[#allocation4 + $0x2a8] sm:$0xff] }
 0x137   : > { %1484 = vmatprep.subr.mxu0 %v1265_v41 }
 0x138   : > { %1485 = vmatpush1.msra.mxu0 %v1264_v42 }
 0x139   : > { %1486 = vmatprep.subr.mxu0 %v1261_v43  ;;  %v1304_v43 = vld [vmem:[#allocation4 + $0x2a0] sm:$0xff] }
 0x13a   : > { %1487 = vmatpush1.msra.mxu0 %v1260_v44 }
 0x13b   : > { %1488 = vmatprep.subr.mxu0 %v1257_v45  ;;  %v1301_v45 = vld [vmem:[#allocation4 + $0x288] sm:$0xff] }
 0x13c   : > { %1489 = vmatpush1.msra.mxu0 %v1256_v46 }
 0x13d   : > { %1490 = vmatprep.subr.mxu0 %v1253_v47  ;;  %v1300_v47 = vld [vmem:[#allocation4 + $0x280] sm:$0xff] }
 0x13e   : > { %1491 = vmatpush1.msra.mxu0 %v1252_v48 }
 0x13f   : > { %1492 = vmatprep.subr.mxu0 %v1249_v49  ;;  %v1297_v49 = vld [vmem:[#allocation4 + $0x268] sm:$0xff] }
 0x140   : > { %1493 = vmatpush1.msra.mxu0 %v1248_v50 }
 0x141   : > { %1494 = vmatprep.subr.mxu0 %v1245_v51 }
 0x142   : > { %1495 = vmatpush1.msra.mxu0 %v1244_v52  ;;  %v1296_v52 = vld [vmem:[#allocation4 + $0x260] sm:$0xff] }
 0x143   : > { %1496 = vmatprep.subr.mxu0 %v1241_v53 }
 0x144   : > { %1497 = vmatpush1.msra.mxu0 %v1240_v54  ;;  %v1293_v54 = vld [vmem:[#allocation4 + $0x248] sm:$0xff] }
 0x145   : > { %1498 = vmatprep.subr.mxu0 %v1237_v55 }
 0x146   : > { %1499 = vmatpush1.msra.mxu0 %v1236_v56 }
 0x147   : > { %1500 = vmatprep.subr.mxu0 %v1233_v57  ;;  %v1292_v57 = vld [vmem:[#allocation4 + $0x240] sm:$0xff] }
 0x148   : > { %1501 = vmatpush1.msra.mxu0 %v1232_v58 }
 0x149   : > { %1502 = vmatprep.subr.mxu0 %v1229_v59  ;;  %v1289_v59 = vld [vmem:[#allocation4 + $0x228] sm:$0xff] }
 0x14a   : > { %1503 = vmatpush1.msra.mxu0 %v1228_v60 }
 0x14b   : > { %1504 = vmatprep.subr.mxu0 %v1225_v61  ;;  %v1288_v61 = vld [vmem:[#allocation4 + $0x220] sm:$0xff] }
 0x14c   : > { %1505 = vmatpush1.msra.mxu0 %v1224_v62 }
 0x14d   : > { %1506 = vmatprep.subr.mxu0 %v1221_v0  ;;  %v1285_v0 = vld [vmem:[#allocation4 + $0x208] sm:$0xff] }
 0x14e   : > { %1507 = vmatpush1.msra.mxu0 %v1220_v4  ;;  %v1284_v4 = vld [vmem:[#allocation4 + $0x200] sm:$0xff] }
 0x14f   : > { %1508 = vmatprep.subr.mxu0 %v1345_v5  ;;  %v3753_v5 = vld [vmem:[%s3750_s7 + $0x1] sm:$0xff] }
 0x150   : > { %1509 = vmatpush2.msra.mxu0 %v1344_v6  ;;  %v1283_v6 = vld [vmem:[#allocation4 + $0x1f8] sm:$0xff] }
 0x151   : > { %1510 = vmatprep.subr.mxu0 %v1341_v7  ;;  %v3757_v7 = vld [vmem:[%s3750_s7] sm:$0xff] }
 0x152   : > { %1511 = vmatpush2.msra.mxu0 %v1340_v8  ;;  %v1282_v8 = vld [vmem:[#allocation4 + $0x1f0] sm:$0xff] }
 0x153   : > { %1512 = vmatprep.subr.mxu0 %v1337_v9  ;;  %v584_v13 = vpop.f32.mrf.mxu0  ;;  %v3760_v9 = vld [vmem:[%s3750_s7 + $0x9] sm:$0xff] }
 0x154   : > { %v679_v14 = vpop.f32.mrf.mxu1  ;;  %1513 = vmatpush2.msra.mxu0 %v1336_v10 }
 0x155   : > { %v680_v16 = vadd.f32 %v679_v14, %v584_v13  ;;  %1514 = vmatprep.subr.mxu0 %v1333_v11  ;;  %v586_v18 = vpop.f32.mrf.mxu0  ;;  %v1278_v13 = vld [vmem:[#allocation4 + $0x1d0] sm:$0xff] }
 0x156   : > { %v681_v19 = vpop.f32.mrf.mxu1  ;;  %1515 = vmatpush2.msra.mxu0 %v1332_v12  ;;  %v1279_v12 = vld [vmem:[#allocation4 + $0x1d8] sm:$0xff] }
 0x157   : > { %v682_v21 = vadd.f32 %v681_v19, %v586_v18  ;;  %1516 = vmatprep.subr.mxu0 %v1329_v15  ;;  %v896_v23 = vmul.f32 %v680_v16, %v680_v16  ;;  %v3765_v18 = vld [vmem:[%s3750_s7 + $0x8] sm:$0xff] }
 0x158   : > { %1517 = vmatpush2.msra.mxu0 %v1328_v17  ;;  %v1275_v17 = vld [vmem:[#allocation4 + $0x1b8] sm:$0xff] }
 0x159   : > { %v897_v25 = vmul.f32 %v682_v21, %v682_v21  ;;  %1518 = vmatprep.subr.mxu0 %v1325_v20  ;;  %v590_v26 = vpop.f32.mrf.mxu0  ;;  %v1274_v20 = vld [vmem:[#allocation4 + $0x1b0] sm:$0xff]  ;;  %v3768_v21 = vld [vmem:[%s3750_s7 + $0x11] sm:$0xff] }
 0x15a   : > { %v685_v27 = vpop.f32.mrf.mxu1  ;;  %1519 = vmatpush2.msra.mxu0 %v1324_v22 }
 0x15b   : > { %v686_v31 = vadd.f32 %v685_v27, %v590_v26  ;;  %1045 = vmatprep.mubr.f32.mxu0 %v897_v25  ;;  %1520 = vmatprep.subr.mxu0 %v1321_v24  ;;  %v592_v63 = vpop.f32.mrf.mxu0  ;;  %v1271_v24 = vld [vmem:[#allocation4 + $0x198] sm:$0xff]  ;;  %v1270_v27 = vld [vmem:[#allocation4 + $0x190] sm:$0xff] }
 0x15c   : > { %v687_v1 = vpop.f32.mrf.mxu1  ;;  %1046 = vmatmul.mubr.f32.gmra.mxu0 %v896_v23 }
 0x15d   : > { %v688_v3 = vadd.f32 %v687_v1, %v592_v63  ;;  %1521 = vmatpush2.msra.mxu0 %v1320_v30  ;;  %v900_v29 = vmul.f32 %v686_v31, %v686_v31  ;;  %v1408_v63 = vld [vmem:[#allocation4 + $0x5e0] sm:$0xff]  ;;  %v1267_v1 = vld [vmem:[#allocation4 + $0x178] sm:$0xff] }
 0x15e   : > { %1522 = vmatprep.subr.mxu0 %v1317_v34 }
 0x15f   : > { %v901_v33 = vmul.f32 %v688_v3, %v688_v3  ;;  %1523 = vmatpush2.msra.mxu0 %v1316_v2  ;;  %v596_v36 = vpop.f32.mrf.mxu0  ;;  %v1405_v3 = vld [vmem:[#allocation4 + $0x5c8] sm:$0xff] }
 0x160   : > { %v691_v37 = vpop.f32.mrf.mxu1  ;;  %1524 = vmatprep.subr.mxu0 %v1313_v28  ;;  %v1266_v28 = vld [vmem:[#allocation4 + $0x170] sm:$0xff] }
 0x161   : > { %v692_v39 = vadd.f32 %v691_v37, %v596_v36  ;;  %1050 = vmatprep.mubr.f32.mxu0 %v901_v33  ;;  %1525 = vmatpush2.msra.mxu0 %v1312_v32  ;;  %v598_v41 = vpop.f32.mrf.mxu0 }
 0x162   : > { %v693_v42 = vpop.f32.mrf.mxu1  ;;  %1051 = vmatmul.mubr.f32.gmra.mxu0 %v900_v29  ;;  %1526 = vmatprep.subr.mxu0 %v1309_v35  ;;  %v1404_v35 = vld [vmem:[#allocation4 + $0x5c0] sm:$0xff] }
 0x163   : > { %v694_v44 = vadd.f32 %v693_v42, %v598_v41  ;;  %1527 = vmatpush2.msra.mxu0 %v1308_v38  ;;  %v904_v46 = vmul.f32 %v692_v39, %v692_v39  ;;  %v1401_v38 = vld [vmem:[#allocation4 + $0x5a8] sm:$0xff]  ;;  %v1400_v41 = vld [vmem:[#allocation4 + $0x5a0] sm:$0xff]  ;;  %v1263_v42 = vld [vmem:[#allocation4 + $0x158] sm:$0xff] }
 0x164   : > { %1528 = vmatprep.subr.mxu0 %v1305_v40 }
 0x165   : > { %v905_v48 = vmul.f32 %v694_v44, %v694_v44  ;;  %1529 = vmatpush2.msra.mxu0 %v1304_v43  ;;  %v602_v50 = vpop.f32.mrf.mxu0  ;;  %v1397_v44 = vld [vmem:[#allocation4 + $0x588] sm:$0xff] }
 0x166   : > { %v697_v51 = vpop.f32.mrf.mxu1  ;;  %1530 = vmatprep.subr.mxu0 %v1301_v45  ;;  %v1262_v45 = vld [vmem:[#allocation4 + $0x150] sm:$0xff] }
 0x167   : > { %v698_v53 = vadd.f32 %v697_v51, %v602_v50  ;;  %1055 = vmatprep.mubr.f32.mxu0 %v905_v48  ;;  %1531 = vmatpush2.msra.mxu0 %v1300_v47  ;;  %v604_v55 = vpop.f32.mrf.mxu0 }
 0x168   : > { %v699_v56 = vpop.f32.mrf.mxu1  ;;  %1056 = vmatmul.mubr.f32.gmra.mxu0 %v904_v46  ;;  %1532 = vmatprep.subr.mxu0 %v1297_v49  ;;  %v1396_v49 = vld [vmem:[#allocation4 + $0x580] sm:$0xff] }
 0x169   : > { %v700_v58 = vadd.f32 %v699_v56, %v604_v55  ;;  %1533 = vmatpush2.msra.mxu0 %v1296_v52  ;;  %v908_v60 = vmul.f32 %v698_v53, %v698_v53  ;;  %v1393_v52 = vld [vmem:[#allocation4 + $0x568] sm:$0xff]  ;;  %v1392_v55 = vld [vmem:[#allocation4 + $0x560] sm:$0xff]  ;;  %v1259_v56 = vld [vmem:[#allocation4 + $0x138] sm:$0xff] }
 0x16a   : > { %1534 = vmatprep.subr.mxu0 %v1293_v54 }
 0x16b   : > { %v909_v62 = vmul.f32 %v700_v58, %v700_v58  ;;  %1535 = vmatpush2.msra.mxu0 %v1292_v57  ;;  %v1389_v58 = vld [vmem:[#allocation4 + $0x548] sm:$0xff] }
 0x16c   : > { %1536 = vmatprep.subr.mxu0 %v1289_v59  ;;  %v1258_v59 = vld [vmem:[#allocation4 + $0x130] sm:$0xff] }
 0x16d   : > { %1060 = vmatprep.mubr.f32.mxu0 %v909_v62  ;;  %1537 = vmatpush2.msra.mxu0 %v1288_v61 }
 0x16e   : > { %1061 = vmatmul.mubr.f32.gmra.mxu0 %v908_v60  ;;  %1538 = vmatprep.subr.mxu0 %v1285_v0  ;;  %v1388_v0 = vld [vmem:[#allocation4 + $0x540] sm:$0xff] }
 0x16f   : > { %1539 = vmatpush2.msra.mxu0 %v1284_v4  ;;  %1540 = vmatprep.mubr.f32.mxu0 %v3753_v5 }
 0x170   : > { %1666 = vmatprep.subr.mxu0 %v1283_v6  ;;  %v768_v10 = vpop.f32.mrf.mxu0 }
 0x171   : > { %v863_v11 = vpop.f32.mrf.mxu1 }
 0x172   : > { %1541 = vmatmul.mubr.f32.vlgmr.msra.gmra.mxu0 %v3757_v7  ;;  %v864_v14 = vadd.f32 %v863_v11, %v768_v10  ;;  %v770_v15 = vpop.f32.mrf.mxu0 }
 0x173   : > { %v865_v16 = vpop.f32.mrf.mxu1  ;;  %1667 = vmatpush1.msra.mxu0 %v1282_v8  ;;  %1546 = vmatprep.mubr.f32.mxu0 %v3760_v9  ;;  %v1385_v8 = vld [vmem:[#allocation4 + $0x528] sm:$0xff] }
 0x174   : > { %v866_v19 = vadd.f32 %v865_v16, %v770_v15  ;;  %1668 = vmatprep.subr.mxu0 %v1279_v12  ;;  %v774_v22 = vpop.f32.mrf.mxu0  ;;  %v894_v30 = vmul.f32 %v864_v14, %v864_v14  ;;  %v1384_v12 = vld [vmem:[#allocation4 + $0x520] sm:$0xff]  ;;  %v1381_v15 = vld [vmem:[#allocation4 + $0x508] sm:$0xff]  ;;  %v1254_v16 = vld [vmem:[#allocation4 + $0x110] sm:$0xff] }
 0x175   : > { %v869_v23 = vpop.f32.mrf.mxu1  ;;  %1669 = vmatpush1.msra.mxu0 %v1278_v13  ;;  %v1255_v13 = vld [vmem:[#allocation4 + $0x118] sm:$0xff] }
 0x176   : > { %v895_v25 = vmul.f32 %v866_v19, %v866_v19  ;;  %v870_v26 = vadd.f32 %v869_v23, %v774_v22  ;;  %1670 = vmatprep.subr.mxu0 %v1275_v17  ;;  %1547 = vmatmul.mubr.f32.gmra.mxu0 %v3765_v18  ;;  %v776_v31 = vpop.f32.mrf.mxu0  ;;  %v1380_v19 = vld [vmem:[#allocation4 + $0x500] sm:$0xff]  ;;  %v1377_v22 = vld [vmem:[#allocation4 + $0x4e8] sm:$0xff] }
 0x177   : > { %v871_v34 = vpop.f32.mrf.mxu1  ;;  %1671 = vmatpush1.msra.mxu0 %v1274_v20  ;;  %1552 = vmatprep.mubr.f32.mxu0 %v3768_v21  ;;  %v1376_v23 = vld [vmem:[#allocation4 + $0x4e0] sm:$0xff] }
 0x178   : > { %v872_v2 = vadd.f32 %v871_v34, %v776_v31  ;;  %1130 = vmatprep.mubr.f32.mxu1 %v895_v25  ;;  %1672 = vmatprep.subr.mxu0 %v1271_v24  ;;  %v898_v29 = vmul.f32 %v870_v26, %v870_v26  ;;  %v780_v32 = vpop.f32.mrf.mxu0  ;;  %v3773_v24 = vld [vmem:[%s3750_s7 + $0x3] sm:$0xff]  ;;  %v1373_v25 = vld [vmem:[#allocation4 + $0x4c8] sm:$0xff] }
 0x179   : > { %v875_v33 = vpop.f32.mrf.mxu1  ;;  %1131 = vmatmul.mubr.f32.vlgmr.msra.gmra.mxu1 %v894_v30  ;;  %1673 = vmatpush1.msra.mxu0 %v1270_v27  ;;  %v1251_v26 = vld [vmem:[#allocation4 + $0xf8] sm:$0xff]  ;;  %v1372_v27 = vld [vmem:[#allocation4 + $0x4c0] sm:$0xff]  ;;  %v1250_v30 = vld [vmem:[#allocation4 + $0xf0] sm:$0xff] }
 0x17a   : > { %v899_v36 = vmul.f32 %v872_v2, %v872_v2  ;;  %v876_v37 = vadd.f32 %v875_v33, %v780_v32  ;;  %1572 = vmatpush1.msra.mxu1 %v1408_v63  ;;  %1674 = vmatprep.subr.mxu0 %v1267_v1  ;;  %v782_v39 = vpop.f32.mrf.mxu0  ;;  %v1369_v31 = vld [vmem:[#allocation4 + $0x4a8] sm:$0xff]  ;;  %v1247_v34 = vld [vmem:[#allocation4 + $0xd8] sm:$0xff]  ;;  %v1368_v63 = vld [vmem:[#allocation4 + $0x4a0] sm:$0xff] }
 0x17b   : > { %1573 = vmatprep.subr.mxu1 %v1405_v3  ;;  %v877_v40 = vpop.f32.mrf.mxu1  ;;  %1675 = vmatpush1.msra.mxu0 %v1266_v28  ;;  %v1246_v1 = vld [vmem:[#allocation4 + $0xd0] sm:$0xff]  ;;  %v1365_v2 = vld [vmem:[#allocation4 + $0x488] sm:$0xff]  ;;  %v1243_v3 = vld [vmem:[#allocation4 + $0xb8] sm:$0xff] }
 0x17c   : > { %v878_v43 = vadd.f32 %v877_v40, %v782_v39  ;;  %1574 = vmatpush1.msra.mxu1 %v1404_v35  ;;  %1135 = vmatprep.mubr.f32.mxu1 %v899_v36  ;;  %v902_v46 = vmul.f32 %v876_v37, %v876_v37  ;;  %v786_v47 = vpop.f32.mrf.mxu0  ;;  %v1364_v28 = vld [vmem:[#allocation4 + $0x480] sm:$0xff]  ;;  %v1361_v32 = vld [vmem:[#allocation4 + $0x468] sm:$0xff]  ;;  %v1239_v33 = vld [vmem:[#allocation4 + $0x98] sm:$0xff] }
 0x17d   : > { %1575 = vmatprep.subr.mxu1 %v1401_v38  ;;  %v881_v48 = vpop.f32.mrf.mxu1  ;;  %1136 = vmatmul.mubr.f32.gmra.mxu1 %v898_v29  ;;  %v1242_v29 = vld [vmem:[#allocation4 + $0xb0] sm:$0xff]  ;;  %v1360_v35 = vld [vmem:[#allocation4 + $0x460] sm:$0xff]  ;;  %v1357_v37 = vld [vmem:[#allocation4 + $0x448] sm:$0xff] }
 0x17e   : > { %v903_v50 = vmul.f32 %v878_v43, %v878_v43  ;;  %v882_v51 = vadd.f32 %v881_v48, %v786_v47  ;;  %1576 = vmatpush1.msra.mxu1 %v1400_v41  ;;  %1676 = vmatprep.subr.mxu0 %v1263_v42  ;;  %v788_v53 = vpop.f32.mrf.mxu0  ;;  %v1238_v36 = vld [vmem:[#allocation4 + $0x90] sm:$0xff]  ;;  %v1235_v38 = vld [vmem:[#allocation4 + $0x78] sm:$0xff]  ;;  %v1356_v39 = vld [vmem:[#allocation4 + $0x440] sm:$0xff] }
 0x17f   : > { %1577 = vmatprep.subr.mxu1 %v1397_v44  ;;  %v883_v54 = vpop.f32.mrf.mxu1  ;;  %1677 = vmatpush1.msra.mxu0 %v1262_v45  ;;  %v1234_v40 = vld [vmem:[#allocation4 + $0x70] sm:$0xff]  ;;  %v1353_v41 = vld [vmem:[#allocation4 + $0x428] sm:$0xff]  ;;  %v1231_v42 = vld [vmem:[#allocation4 + $0x58] sm:$0xff] }
 0x180   : > { %v884_v57 = vadd.f32 %v883_v54, %v788_v53  ;;  %1578 = vmatpush1.msra.mxu1 %v1396_v49  ;;  %1140 = vmatprep.mubr.f32.mxu1 %v903_v50  ;;  %v906_v60 = vmul.f32 %v882_v51, %v882_v51  ;;  %v792_v61 = vpop.f32.mrf.mxu0  ;;  %v1352_v43 = vld [vmem:[#allocation4 + $0x420] sm:$0xff]  ;;  %v1230_v44 = vld [vmem:[#allocation4 + $0x50] sm:$0xff]  ;;  %v1349_v45 = vld [vmem:[#allocation4 + $0x408] sm:$0xff] }
 0x181   : > { %1579 = vmatprep.subr.mxu1 %v1393_v52  ;;  %v887_v62 = vpop.f32.mrf.mxu1  ;;  %1141 = vmatmul.mubr.f32.gmra.mxu1 %v902_v46  ;;  %v1227_v46 = vld [vmem:[#allocation4 + $0x38] sm:$0xff]  ;;  %v1348_v47 = vld [vmem:[#allocation4 + $0x400] sm:$0xff]  ;;  %v1226_v48 = vld [vmem:[#allocation4 + $0x30] sm:$0xff] }
 0x182   : > { %v907_v4 = vmul.f32 %v884_v57, %v884_v57  ;;  %v888_v6 = vadd.f32 %v887_v62, %v792_v61  ;;  %1580 = vmatpush1.msra.mxu1 %v1392_v55  ;;  %1678 = vmatprep.subr.mxu0 %v1259_v56  ;;  %v794_v10 = vpop.f32.mrf.mxu0  ;;  %v1473_v49 = vld [vmem:[#allocation4 + $0x7e8] sm:$0xff]  ;;  %v1223_v50 = vld [vmem:[#allocation4 + $0x18] sm:$0xff]  ;;  %v1472_v51 = vld [vmem:[#allocation4 + $0x7e0] sm:$0xff] }
 0x183   : > { %1581 = vmatprep.subr.mxu1 %v1389_v58  ;;  %v889_v11 = vpop.f32.mrf.mxu1  ;;  %1679 = vmatpush1.msra.mxu0 %v1258_v59  ;;  %v1222_v52 = vld [vmem:[#allocation4 + $0x10] sm:$0xff]  ;;  %v1469_v53 = vld [vmem:[#allocation4 + $0x7c8] sm:$0xff]  ;;  %v1347_v54 = vld [vmem:[#allocation4 + $0x3f8] sm:$0xff] }
 0x184   : > { %v890_v14 = vadd.f32 %v889_v11, %v794_v10  ;;  %1582 = vmatpush1.msra.mxu1 %v1388_v0  ;;  %1145 = vmatprep.mubr.f32.mxu1 %v907_v4  ;;  %v910_v17 = vmul.f32 %v888_v6, %v888_v6  ;;  %v1468_v55 = vld [vmem:[#allocation4 + $0x7c0] sm:$0xff]  ;;  %v1346_v56 = vld [vmem:[#allocation4 + $0x3f0] sm:$0xff]  ;;  %v1465_v57 = vld [vmem:[#allocation4 + $0x7a8] sm:$0xff] }
 0x185   : > { %1583 = vmatprep.subr.mxu1 %v1385_v8  ;;  %1146 = vmatmul.mubr.f32.gmra.mxu1 %v906_v60  ;;  %v1343_v58 = vld [vmem:[#allocation4 + $0x3d8] sm:$0xff]  ;;  %v1464_v59 = vld [vmem:[#allocation4 + $0x7a0] sm:$0xff]  ;;  %v1342_v60 = vld [vmem:[#allocation4 + $0x3d0] sm:$0xff] }
 0x186   : > { %v911_v20 = vmul.f32 %v890_v14, %v890_v14  ;;  %1584 = vmatpush1.msra.mxu1 %v1384_v12  ;;  %1680 = vmatprep.subr.mxu0 %v1255_v13  ;;  %v1461_v61 = vld [vmem:[#allocation4 + $0x788] sm:$0xff]  ;;  %v1339_v62 = vld [vmem:[#allocation4 + $0x3b8] sm:$0xff]  ;;  %v1460_v0 = vld [vmem:[#allocation4 + $0x780] sm:$0xff] }
 0x187   : > { %1585 = vmatprep.subr.mxu1 %v1381_v15  ;;  %1681 = vmatpush1.msra.mxu0 %v1254_v16  ;;  %v1338_v4 = vld [vmem:[#allocation4 + $0x3b0] sm:$0xff]  ;;  %v1457_v6 = vld [vmem:[#allocation4 + $0x768] sm:$0xff]  ;;  %v1335_v8 = vld [vmem:[#allocation4 + $0x398] sm:$0xff] }
 0x188   : > { %1586 = vmatpush1.msra.mxu1 %v1380_v19  ;;  %1150 = vmatprep.mubr.f32.mxu1 %v911_v20  ;;  %v1456_v10 = vld [vmem:[#allocation4 + $0x760] sm:$0xff]  ;;  %v1334_v11 = vld [vmem:[#allocation4 + $0x390] sm:$0xff]  ;;  %v1453_v12 = vld [vmem:[#allocation4 + $0x748] sm:$0xff] }
 0x189   : > { %1587 = vmatprep.subr.mxu1 %v1377_v22  ;;  %1151 = vmatmul.mubr.f32.gmra.mxu1 %v910_v17  ;;  %v1331_v13 = vld [vmem:[#allocation4 + $0x378] sm:$0xff]  ;;  %v1452_v14 = vld [vmem:[#allocation4 + $0x740] sm:$0xff]  ;;  %v1330_v15 = vld [vmem:[#allocation4 + $0x370] sm:$0xff] }
 0x18a   : > { %1588 = vmatpush1.msra.mxu1 %v1376_v23  ;;  %1635 = vmatprep.mubr.f32.mxu1 %v3773_v24  ;;  %v1449_v16 = vld [vmem:[#allocation4 + $0x728] sm:$0xff]  ;;  %v1327_v17 = vld [vmem:[#allocation4 + $0x358] sm:$0xff]  ;;  %v1448_v19 = vld [vmem:[#allocation4 + $0x720] sm:$0xff] }
 0x18b   : > { %1589 = vmatprep.subr.mxu1 %v1373_v25  ;;  %1682 = vmatprep.subr.mxu0 %v1251_v26  ;;  %v1326_v20 = vld [vmem:[#allocation4 + $0x350] sm:$0xff]  ;;  %v1445_v22 = vld [vmem:[#allocation4 + $0x708] sm:$0xff]  ;;  %v1323_v23 = vld [vmem:[#allocation4 + $0x338] sm:$0xff] }
 0x18c   : > { %1590 = vmatpush1.msra.mxu1 %v1372_v27  ;;  %1683 = vmatpush1.msra.mxu0 %v1250_v30  ;;  %v1444_v25 = vld [vmem:[#allocation4 + $0x700] sm:$0xff]  ;;  %v1322_v26 = vld [vmem:[#allocation4 + $0x330] sm:$0xff]  ;;  %v1441_v27 = vld [vmem:[#allocation4 + $0x6e8] sm:$0xff] }
 0x18d   : > { %1591 = vmatprep.subr.mxu1 %v1369_v31  ;;  %1684 = vmatprep.subr.mxu0 %v1247_v34  ;;  %v1319_v30 = vld [vmem:[#allocation4 + $0x318] sm:$0xff]  ;;  %v1440_v31 = vld [vmem:[#allocation4 + $0x6e0] sm:$0xff]  ;;  %v1318_v34 = vld [vmem:[#allocation4 + $0x310] sm:$0xff] }
 0x18e   : > { %1592 = vmatpush1.msra.mxu1 %v1368_v63  ;;  %1685 = vmatpush1.msra.mxu0 %v1246_v1  ;;  %v1437_v63 = vld [vmem:[#allocation4 + $0x6c8] sm:$0xff]  ;;  %v1315_v1 = vld [vmem:[#allocation4 + $0x2f8] sm:$0xff] }
 0x18f   : > { %1593 = vmatprep.subr.mxu1 %v1365_v2  ;;  %1686 = vmatprep.subr.mxu0 %v1243_v3  ;;  %v1436_v2 = vld [vmem:[#allocation4 + $0x6c0] sm:$0xff] }
 0x190   : > { %1594 = vmatpush1.msra.mxu1 %v1364_v28  ;;  %1687 = vmatpush1.msra.mxu0 %v1242_v29  ;;  %v3777_v3 = vld [vmem:[%s3750_s7 + $0x10] sm:$0xff]  ;;  %v1433_v28 = vld [vmem:[#allocation4 + $0x6a8] sm:$0xff]  ;;  %v1314_v29 = vld [vmem:[#allocation4 + $0x2f0] sm:$0xff] }
 0x191   : > { %1595 = vmatprep.subr.mxu1 %v1361_v32  ;;  %1688 = vmatprep.subr.mxu0 %v1239_v33  ;;  %v1432_v32 = vld [vmem:[#allocation4 + $0x6a0] sm:$0xff]  ;;  %v1311_v33 = vld [vmem:[#allocation4 + $0x2d8] sm:$0xff] }
 0x192   : > { %1596 = vmatpush1.msra.mxu1 %v1360_v35  ;;  %1689 = vmatpush1.msra.mxu0 %v1238_v36  ;;  %v1429_v35 = vld [vmem:[#allocation4 + $0x688] sm:$0xff]  ;;  %v1310_v36 = vld [vmem:[#allocation4 + $0x2d0] sm:$0xff] }
 0x193   : > { %1597 = vmatprep.subr.mxu1 %v1357_v37  ;;  %1690 = vmatprep.subr.mxu0 %v1235_v38  ;;  %v1428_v37 = vld [vmem:[#allocation4 + $0x680] sm:$0xff]  ;;  %v3781_v38 = vld [vmem:[%s3750_s7 + $0x19] sm:$0xff] }
 0x194   : > { %1598 = vmatpush1.msra.mxu1 %v1356_v39  ;;  %1691 = vmatpush1.msra.mxu0 %v1234_v40  ;;  %v1425_v39 = vld [vmem:[#allocation4 + $0x668] sm:$0xff]  ;;  %v1307_v40 = vld [vmem:[#allocation4 + $0x2b8] sm:$0xff] }
 0x195   : > { %1599 = vmatprep.subr.mxu1 %v1353_v41  ;;  %1692 = vmatprep.subr.mxu0 %v1231_v42  ;;  %v1424_v41 = vld [vmem:[#allocation4 + $0x660] sm:$0xff]  ;;  %v3784_v42 = vld [vmem:[%s3750_s7 + $0x18] sm:$0xff] }
 0x196   : > { %1600 = vmatpush1.msra.mxu1 %v1352_v43  ;;  %1693 = vmatpush1.msra.mxu0 %v1230_v44  ;;  %v1421_v43 = vld [vmem:[#allocation4 + $0x648] sm:$0xff]  ;;  %v1306_v44 = vld [vmem:[#allocation4 + $0x2b0] sm:$0xff] }
 0x197   : > { %1601 = vmatprep.subr.mxu1 %v1349_v45  ;;  %1694 = vmatprep.subr.mxu0 %v1227_v46  ;;  %v1420_v45 = vld [vmem:[#allocation4 + $0x640] sm:$0xff]  ;;  %v1303_v46 = vld [vmem:[#allocation4 + $0x298] sm:$0xff] }
 0x198   : > { %1602 = vmatpush1.msra.mxu1 %v1348_v47  ;;  %1695 = vmatpush1.msra.mxu0 %v1226_v48  ;;  %v1417_v47 = vld [vmem:[#allocation4 + $0x628] sm:$0xff]  ;;  %v1302_v48 = vld [vmem:[#allocation4 + $0x290] sm:$0xff] }
 0x199   : > { %1603 = vmatprep.subr.mxu1 %v1473_v49  ;;  %1696 = vmatprep.subr.mxu0 %v1223_v50  ;;  %v1416_v49 = vld [vmem:[#allocation4 + $0x620] sm:$0xff]  ;;  %v3789_v50 = vld [vmem:[%s3750_s7 + $0x21] sm:$0xff] }
 0x19a   : > { %1604 = vmatpush2.msra.mxu1 %v1472_v51  ;;  %1697 = vmatpush1.msra.mxu0 %v1222_v52  ;;  %v1413_v51 = vld [vmem:[#allocation4 + $0x608] sm:$0xff]  ;;  %v1299_v52 = vld [vmem:[#allocation4 + $0x278] sm:$0xff] }
 0x19b   : > { %1605 = vmatprep.subr.mxu1 %v1469_v53  ;;  %1698 = vmatprep.subr.mxu0 %v1347_v54  ;;  %v1412_v53 = vld [vmem:[#allocation4 + $0x600] sm:$0xff]  ;;  %v3792_v54 = vld [vmem:[%s3750_s7 + $0x20] sm:$0xff] }
 0x19c   : > { %1606 = vmatpush2.msra.mxu1 %v1468_v55  ;;  %1699 = vmatpush2.msra.mxu0 %v1346_v56  ;;  %v3795_v55 = vld [vmem:[%s3750_s7 + $0x2] sm:$0xff] }
 0x19d   : > { %1607 = vmatprep.subr.mxu1 %v1465_v57  ;;  %1700 = vmatprep.subr.mxu0 %v1343_v58  ;;  %v1411_v56 = vld [vmem:[#allocation4 + $0x5f8] sm:$0xff]  ;;  %v1410_v57 = vld [vmem:[#allocation4 + $0x5f0] sm:$0xff] }
 0x19e   : > { %1608 = vmatpush2.msra.mxu1 %v1464_v59  ;;  %1701 = vmatpush2.msra.mxu0 %v1342_v60  ;;  %v3799_v58 = vld [vmem:[%s3750_s7 + $0xb] sm:$0xff]  ;;  %v1298_v60 = vld [vmem:[#allocation4 + $0x270] sm:$0xff] }
 0x19f   : > { %1609 = vmatprep.subr.mxu1 %v1461_v61  ;;  %1702 = vmatprep.subr.mxu0 %v1339_v62  ;;  %v1407_v59 = vld [vmem:[#allocation4 + $0x5d8] sm:$0xff]  ;;  %v1406_v61 = vld [vmem:[#allocation4 + $0x5d0] sm:$0xff] }
 0x1a0   : > { %1610 = vmatpush2.msra.mxu1 %v1460_v0  ;;  %1703 = vmatpush2.msra.mxu0 %v1338_v4  ;;  %v1295_v62 = vld [vmem:[#allocation4 + $0x258] sm:$0xff] }
 0x1a1   : > { %1611 = vmatprep.subr.mxu1 %v1457_v6  ;;  %1704 = vmatprep.subr.mxu0 %v1335_v8  ;;  %v1403_v0 = vld [vmem:[#allocation4 + $0x5b8] sm:$0xff]  ;;  %v1402_v6 = vld [vmem:[#allocation4 + $0x5b0] sm:$0xff]  ;;  %v3808_v8 = vld [vmem:[%s3750_s7 + $0x13] sm:$0xff] }
 0x1a2   : > { %1612 = vmatpush2.msra.mxu1 %v1456_v10  ;;  %1705 = vmatpush2.msra.mxu0 %v1334_v11  ;;  %v3805_v4 = vld [vmem:[%s3750_s7 + $0xa] sm:$0xff]  ;;  %v1294_v11 = vld [vmem:[#allocation4 + $0x250] sm:$0xff] }
 0x1a3   : > { %1613 = vmatprep.subr.mxu1 %v1453_v12  ;;  %1706 = vmatprep.subr.mxu0 %v1331_v13  ;;  %v1399_v10 = vld [vmem:[#allocation4 + $0x598] sm:$0xff]  ;;  %v1398_v12 = vld [vmem:[#allocation4 + $0x590] sm:$0xff] }
 0x1a4   : > { %1614 = vmatpush2.msra.mxu1 %v1452_v14  ;;  %1707 = vmatpush2.msra.mxu0 %v1330_v15  ;;  %v1291_v13 = vld [vmem:[#allocation4 + $0x238] sm:$0xff]  ;;  %v3813_v15 = vld [vmem:[%s3750_s7 + $0x12] sm:$0xff] }
 0x1a5   : > { %1615 = vmatprep.subr.mxu1 %v1449_v16  ;;  %1708 = vmatprep.subr.mxu0 %v1327_v17  ;;  %v1395_v14 = vld [vmem:[#allocation4 + $0x578] sm:$0xff]  ;;  %v1394_v16 = vld [vmem:[#allocation4 + $0x570] sm:$0xff] }
 0x1a6   : > { %1616 = vmatpush2.msra.mxu1 %v1448_v19  ;;  %1709 = vmatpush2.msra.mxu0 %v1326_v20  ;;  %v3816_v17 = vld [vmem:[%s3750_s7 + $0x1b] sm:$0xff]  ;;  %v1391_v19 = vld [vmem:[#allocation4 + $0x558] sm:$0xff] }
 0x1a7   : > { %1617 = vmatprep.subr.mxu1 %v1445_v22  ;;  %1710 = vmatprep.subr.mxu0 %v1323_v23  ;;  %v1290_v20 = vld [vmem:[#allocation4 + $0x230] sm:$0xff]  ;;  %v1287_v23 = vld [vmem:[#allocation4 + $0x218] sm:$0xff] }
 0x1a8   : > { %1618 = vmatpush2.msra.mxu1 %v1444_v25  ;;  %1711 = vmatpush2.msra.mxu0 %v1322_v26  ;;  %v1390_v22 = vld [vmem:[#allocation4 + $0x550] sm:$0xff]  ;;  %v1387_v25 = vld [vmem:[#allocation4 + $0x538] sm:$0xff] }
 0x1a9   : > { %1619 = vmatprep.subr.mxu1 %v1441_v27  ;;  %1712 = vmatprep.subr.mxu0 %v1319_v30  ;;  %v3821_v26 = vld [vmem:[%s3750_s7 + $0x1a] sm:$0xff]  ;;  %v3824_v30 = vld [vmem:[%s3750_s7 + $0x23] sm:$0xff] }
 0x1aa   : > { %1620 = vmatpush2.msra.mxu1 %v1440_v31  ;;  %1713 = vmatpush2.msra.mxu0 %v1318_v34  ;;  %v1386_v27 = vld [vmem:[#allocation4 + $0x530] sm:$0xff]  ;;  %v1383_v31 = vld [vmem:[#allocation4 + $0x518] sm:$0xff] }
 0x1ab   : > { %1621 = vmatprep.subr.mxu1 %v1437_v63  ;;  %1714 = vmatprep.subr.mxu0 %v1315_v1  ;;  %v1286_v34 = vld [vmem:[#allocation4 + $0x210] sm:$0xff]  ;;  %v1379_v1 = vld [vmem:[#allocation4 + $0x4f8] sm:$0xff] }
 0x1ac   : > { %1622 = vmatpush2.msra.mxu1 %v1436_v2  ;;  %1553 = vmatmul.mubr.f32.gmra.mxu0 %v3777_v3  ;;  %v1382_v63 = vld [vmem:[#allocation4 + $0x510] sm:$0xff] }
 0x1ad   : > { %1623 = vmatprep.subr.mxu1 %v1433_v28  ;;  %1715 = vmatpush2.msra.mxu0 %v1314_v29  ;;  %v3829_v2 = vld [vmem:[%s3750_s7 + $0x22] sm:$0xff]  ;;  %s2813_s7 = scalar_lea.sflag [#allocation6], %s218_s23 }
 0x1ae   : > { %1624 = vmatpush2.msra.mxu1 %v1432_v32  ;;  %1716 = vmatprep.subr.mxu0 %v1311_v33  ;;  %v1378_v28 = vld [vmem:[#allocation4 + $0x4f0] sm:$0xff]  ;;  %v1375_v29 = vld [vmem:[#allocation4 + $0x4d8] sm:$0xff] }
 0x1af   : > { %1625 = vmatprep.subr.mxu1 %v1429_v35  ;;  %1717 = vmatpush2.msra.mxu0 %v1310_v36  ;;  %v1374_v32 = vld [vmem:[#allocation4 + $0x4d0] sm:$0xff]  ;;  %v1371_v33 = vld [vmem:[#allocation4 + $0x4b8] sm:$0xff] }
 0x1b0   : > { %1626 = vmatpush2.msra.mxu1 %v1428_v37  ;;  %1558 = vmatprep.mubr.f32.mxu0 %v3781_v38  ;;  %v1370_v35 = vld [vmem:[#allocation4 + $0x4b0] sm:$0xff]  ;;  %v1367_v36 = vld [vmem:[#allocation4 + $0x498] sm:$0xff] }
 0x1b1   : > { %1627 = vmatprep.subr.mxu1 %v1425_v39  ;;  %1718 = vmatprep.subr.mxu0 %v1307_v40  ;;  %v1366_v37 = vld [vmem:[#allocation4 + $0x490] sm:$0xff] }
 0x1b2   : > { %1628 = vmatpush2.msra.mxu1 %v1424_v41  ;;  %1559 = vmatmul.mubr.f32.gmra.mxu0 %v3784_v42  ;;  %v1362_v39 = vld [vmem:[#allocation4 + $0x470] sm:$0xff]  ;;  %v1351_v41 = vld [vmem:[#allocation4 + $0x418] sm:$0xff] }
 0x1b3   : > { %1629 = vmatprep.subr.mxu1 %v1421_v43  ;;  %1719 = vmatpush2.msra.mxu0 %v1306_v44  ;;  %v1358_v40 = vld [vmem:[#allocation4 + $0x450] sm:$0xff]  ;;  %v1475_v43 = vld [vmem:[#allocation4 + $0x7f8] sm:$0xff] }
 0x1b4   : > { %1630 = vmatpush2.msra.mxu1 %v1420_v45  ;;  %1720 = vmatprep.subr.mxu0 %v1303_v46  ;;  %v1471_v44 = vld [vmem:[#allocation4 + $0x7d8] sm:$0xff] }
 0x1b5   : > { %1631 = vmatprep.subr.mxu1 %v1417_v47  ;;  %1721 = vmatpush2.msra.mxu0 %v1302_v48  ;;  %v1467_v45 = vld [vmem:[#allocation4 + $0x7b8] sm:$0xff]  ;;  %v1462_v47 = vld [vmem:[#allocation4 + $0x790] sm:$0xff] }
 0x1b6   : > { %1632 = vmatpush2.msra.mxu1 %v1416_v49  ;;  %1564 = vmatprep.mubr.f32.mxu0 %v3789_v50  ;;  %v1463_v46 = vld [vmem:[#allocation4 + $0x798] sm:$0xff]  ;;  %v1458_v48 = vld [vmem:[#allocation4 + $0x770] sm:$0xff] }
 0x1b7   : > { %1633 = vmatprep.subr.mxu1 %v1413_v51  ;;  %1722 = vmatprep.subr.mxu0 %v1299_v52  ;;  %v1455_v49 = vld [vmem:[#allocation4 + $0x758] sm:$0xff]  ;;  %v1454_v51 = vld [vmem:[#allocation4 + $0x750] sm:$0xff] }
 0x1b8   : > { %1634 = vmatpush2.msra.mxu1 %v1412_v53  ;;  %1565 = vmatmul.mubr.f32.gmra.mxu0 %v3792_v54  ;;  %v1451_v52 = vld [vmem:[#allocation4 + $0x738] sm:$0xff]  ;;  %v1891_v53 = vld [vmem:[%s4749_s3 + $0x78] sm:$0xff] }
 0x1b9   : > { %1636 = vmatmul.mubr.f32.vlgmr.msra.gmra.mxu1 %v3795_v55  ;;  %1761 = vmatprep.subr.mxu1 %v1411_v56  ;;  %v1890_v56 = vld [vmem:[%s4749_s3 + $0x70] sm:$0xff] }
 0x1ba   : > { %1762 = vmatpush1.msra.mxu1 %v1410_v57  ;;  %1641 = vmatprep.mubr.f32.mxu1 %v3799_v58  ;;  %v1905_v57 = vld [vmem:[%s4749_s3 + $0xe8] sm:$0xff] }
 0x1bb   : > { %1763 = vmatprep.subr.mxu1 %v1407_v59  ;;  %1723 = vmatpush2.msra.mxu0 %v1298_v60  ;;  %v1450_v59 = vld [vmem:[#allocation4 + $0x730] sm:$0xff]  ;;  %v1889_v60 = vld [vmem:[%s4749_s3 + $0x68] sm:$0xff] }
 0x1bc   : > { %1764 = vmatpush1.msra.mxu1 %v1406_v61  ;;  %1724 = vmatprep.subr.mxu0 %v1295_v62  ;;  %v1447_v61 = vld [vmem:[#allocation4 + $0x718] sm:$0xff]  ;;  %v1904_v62 = vld [vmem:[%s4749_s3 + $0xe0] sm:$0xff] }
 0x1bd   : > { %1765 = vmatprep.subr.mxu1 %v1403_v0  ;;  %1642 = vmatmul.mubr.f32.gmra.mxu1 %v3805_v4  ;;  %v1446_v0 = vld [vmem:[#allocation4 + $0x710] sm:$0xff] }
 0x1be   : > { %1766 = vmatpush1.msra.mxu1 %v1402_v6  ;;  %1647 = vmatprep.mubr.f32.mxu1 %v3808_v8  ;;  %v1888_v6 = vld [vmem:[%s4749_s3 + $0x60] sm:$0xff] }
 0x1bf   : > { %1767 = vmatprep.subr.mxu1 %v1399_v10  ;;  %1725 = vmatpush2.msra.mxu0 %v1294_v11  ;;  %v1443_v10 = vld [vmem:[#allocation4 + $0x6f8] sm:$0xff]  ;;  %v1903_v11 = vld [vmem:[%s4749_s3 + $0xd8] sm:$0xff] }
 0x1c0   : > { %1768 = vmatpush1.msra.mxu1 %v1398_v12  ;;  %1726 = vmatprep.subr.mxu0 %v1291_v13  ;;  %v1442_v12 = vld [vmem:[#allocation4 + $0x6f0] sm:$0xff]  ;;  %v1887_v13 = vld [vmem:[%s4749_s3 + $0x58] sm:$0xff] }
 0x1c1   : > { %1769 = vmatprep.subr.mxu1 %v1395_v14  ;;  %1648 = vmatmul.mubr.f32.gmra.mxu1 %v3813_v15  ;;  %v1439_v14 = vld [vmem:[#allocation4 + $0x6d8] sm:$0xff] }
 0x1c2   : > { %1770 = vmatpush1.msra.mxu1 %v1394_v16  ;;  %1653 = vmatprep.mubr.f32.mxu1 %v3816_v17  ;;  %v1902_v16 = vld [vmem:[%s4749_s3 + $0xd0] sm:$0xff] }
 0x1c3   : > { %1771 = vmatprep.subr.mxu1 %v1391_v19  ;;  %1727 = vmatpush2.msra.mxu0 %v1290_v20  ;;  %v1438_v19 = vld [vmem:[#allocation4 + $0x6d0] sm:$0xff]  ;;  %v1886_v20 = vld [vmem:[%s4749_s3 + $0x50] sm:$0xff] }
 0x1c4   : > { %1772 = vmatpush1.msra.mxu1 %v1390_v22  ;;  %1728 = vmatprep.subr.mxu0 %v1287_v23  ;;  %v1435_v22 = vld [vmem:[#allocation4 + $0x6b8] sm:$0xff] }
 0x1c5   : > { %1773 = vmatprep.subr.mxu1 %v1387_v25  ;;  %1654 = vmatmul.mubr.f32.gmra.mxu1 %v3821_v26  ;;  %v1901_v23 = vld [vmem:[%s4749_s3 + $0xc8] sm:$0xff]  ;;  %v1434_v25 = vld [vmem:[#allocation4 + $0x6b0] sm:$0xff] }
 0x1c6   : > { %1774 = vmatpush1.msra.mxu1 %v1386_v27  ;;  %1659 = vmatprep.mubr.f32.mxu1 %v3824_v30  ;;  %v1885_v27 = vld [vmem:[%s4749_s3 + $0x48] sm:$0xff] }
 0x1c7   : > { %1775 = vmatprep.subr.mxu1 %v1383_v31  ;;  %1729 = vmatpush2.msra.mxu0 %v1286_v34  ;;  %v1431_v31 = vld [vmem:[#allocation4 + $0x698] sm:$0xff]  ;;  %v1900_v34 = vld [vmem:[%s4749_s3 + $0xc0] sm:$0xff] }
 0x1c8   : > { %1776 = vmatpush1.msra.mxu1 %v1382_v63  ;;  %1730 = vmatprep.mubr.f32.mxu0 %v3753_v5  ;;  %v1363_v5 = vld [vmem:[#allocation4 + $0x478] sm:$0xff]  ;;  %v1430_v63 = vld [vmem:[#allocation4 + $0x690] sm:$0xff] }
 0x1c9   : > { %1777 = vmatprep.subr.mxu1 %v1379_v1  ;;  %1660 = vmatmul.mubr.f32.gmra.mxu1 %v3829_v2  ;;  %v1884_v1 = vld [vmem:[%s4749_s3 + $0x40] sm:$0xff] }
 0x1ca   : > { %1778 = vmatpush1.msra.mxu1 %v1378_v28  ;;  %1731 = vmatmul.mubr.f32.vlgmr.msra.gmra.mxu0 %v3757_v7  ;;  %v1359_v7 = vld [vmem:[#allocation4 + $0x458] sm:$0xff] }
 0x1cb   : > { %1779 = vmatprep.subr.mxu1 %v1375_v29  ;;  %1825 = vmatprep.mubr.f32.mxu1 %v3773_v24  ;;  %v1355_v24 = vld [vmem:[#allocation4 + $0x438] sm:$0xff]  ;;  %v1899_v29 = vld [vmem:[%s4749_s3 + $0xb8] sm:$0xff] }
 0x1cc   : > { %1780 = vmatpush1.msra.mxu1 %v1374_v32  ;;  %1736 = vmatprep.mubr.f32.mxu0 %v3760_v9  ;;  %v1354_v9 = vld [vmem:[#allocation4 + $0x430] sm:$0xff]  ;;  %v1427_v28 = vld [vmem:[#allocation4 + $0x678] sm:$0xff] }
 0x1cd   : > { %1781 = vmatprep.subr.mxu1 %v1371_v33  ;;  %v1426_v32 = vld [vmem:[#allocation4 + $0x670] sm:$0xff]  ;;  %v1883_v33 = vld [vmem:[%s4749_s3 + $0x38] sm:$0xff] }
 0x1ce   : > { %1782 = vmatpush1.msra.mxu1 %v1370_v35  ;;  %1737 = vmatmul.mubr.f32.gmra.mxu0 %v3765_v18  ;;  %v1350_v18 = vld [vmem:[#allocation4 + $0x410] sm:$0xff]  ;;  %v1423_v35 = vld [vmem:[#allocation4 + $0x658] sm:$0xff] }
 0x1cf   : > { %1783 = vmatprep.subr.mxu1 %v1367_v36  ;;  %1742 = vmatprep.mubr.f32.mxu0 %v3768_v21  ;;  %v1474_v21 = vld [vmem:[#allocation4 + $0x7f0] sm:$0xff]  ;;  %v1898_v36 = vld [vmem:[%s4749_s3 + $0xb0] sm:$0xff] }
 0x1d0   : > { %1784 = vmatpush1.msra.mxu1 %v1366_v37  ;;  %v1422_v37 = vld [vmem:[#allocation4 + $0x650] sm:$0xff] }
 0x1d1   : > { %1785 = vmatprep.subr.mxu1 %v1363_v5  ;;  %v1882_v5 = vld [vmem:[%s4749_s3 + $0x30] sm:$0xff] }
 0x1d2   : > { %1786 = vmatpush1.msra.mxu1 %v1362_v39  ;;  %1743 = vmatmul.mubr.f32.gmra.mxu0 %v3777_v3  ;;  %v1470_v3 = vld [vmem:[#allocation4 + $0x7d0] sm:$0xff]  ;;  %v1419_v39 = vld [vmem:[#allocation4 + $0x638] sm:$0xff] }
 0x1d3   : > { %1787 = vmatprep.subr.mxu1 %v1359_v7  ;;  %1748 = vmatprep.mubr.f32.mxu0 %v3781_v38  ;;  %v1466_v38 = vld [vmem:[#allocation4 + $0x7b0] sm:$0xff]  ;;  %v1897_v7 = vld [vmem:[%s4749_s3 + $0xa8] sm:$0xff] }
 0x1d4   : > { %1788 = vmatpush1.msra.mxu1 %v1358_v40  ;;  %v1418_v40 = vld [vmem:[#allocation4 + $0x630] sm:$0xff] }
 0x1d5   : > { %1789 = vmatprep.subr.mxu1 %v1355_v24  ;;  %v1881_v24 = vld [vmem:[%s4749_s3 + $0x28] sm:$0xff] }
 0x1d6   : > { %1790 = vmatpush1.msra.mxu1 %v1354_v9  ;;  %1749 = vmatmul.mubr.f32.gmra.mxu0 %v3784_v42  ;;  %v1459_v42 = vld [vmem:[#allocation4 + $0x778] sm:$0xff] }
 0x1d7   : > { %1791 = vmatprep.subr.mxu1 %v1351_v41  ;;  %1754 = vmatprep.mubr.f32.mxu0 %v3789_v50  ;;  %v1907_v50 = vld [vmem:[%s4749_s3 + $0xf8] sm:$0xff]  ;;  %v1415_v9 = vld [vmem:[#allocation4 + $0x618] sm:$0xff]  ;;  %v1896_v41 = vld [vmem:[%s4749_s3 + $0xa0] sm:$0xff] }
 0x1d8   : > { %1792 = vmatpush1.msra.mxu1 %v1350_v18  ;;  %3045 = vmatprep.subr.mxu0 %v1907_v50  ;;  %v1414_v18 = vld [vmem:[#allocation4 + $0x610] sm:$0xff]  ;;  %v1934_v50 = vld [vmem:[%s4749_s3 + $0x1d0] sm:$0xff] }
 0x1d9   : > { %1793 = vmatprep.subr.mxu1 %v1475_v43  ;;  %3046 = vmatpush3.msra.mxu0 %v1891_v53  ;;  %v1880_v43 = vld [vmem:[%s4749_s3 + $0x20] sm:$0xff] }
 0x1da   : > { %1794 = vmatpush2.msra.mxu1 %v1474_v21  ;;  %1755 = vmatmul.mubr.f32.gmra.mxu0 %v3792_v54  ;;  %v1906_v54 = vld [vmem:[%s4749_s3 + $0xf0] sm:$0xff]  ;;  %v1895_v21 = vld [vmem:[%s4749_s3 + $0x98] sm:$0xff]  ;;  %v1932_v53 = vld [vmem:[%s4749_s3 + $0x1c0] sm:$0xff] }
 0x1db   : > { %1795 = vmatprep.subr.mxu1 %v1471_v44  ;;  %3047 = vmatprep.subr.mxu0 %v1906_v54  ;;  %v1879_v44 = vld [vmem:[%s4749_s3 + $0x18] sm:$0xff]  ;;  %v1916_v54 = vld [vmem:[%s4749_s3 + $0x140] sm:$0xff] }
 0x1dc   : > { %1796 = vmatpush2.msra.mxu1 %v1470_v3  ;;  %3048 = vmatpush3.msra.mxu0 %v1890_v56  ;;  %v1894_v3 = vld [vmem:[%s4749_s3 + $0x90] sm:$0xff]  ;;  %v1931_v56 = vld [vmem:[%s4749_s3 + $0x1b8] sm:$0xff] }
 0x1dd   : > { %1797 = vmatprep.subr.mxu1 %v1467_v45  ;;  %3049 = vmatprep.subr.mxu0 %v1905_v57  ;;  %v1878_v45 = vld [vmem:[%s4749_s3 + $0x10] sm:$0xff]  ;;  %v1915_v57 = vld [vmem:[%s4749_s3 + $0x138] sm:$0xff] }
 0x1de   : > { %1798 = vmatpush2.msra.mxu1 %v1466_v38  ;;  %3050 = vmatpush3.msra.mxu0 %v1889_v60  ;;  %v1892_v38 = vld [vmem:[%s4749_s3 + $0x80] sm:$0xff]  ;;  %v1914_v60 = vld [vmem:[%s4749_s3 + $0x130] sm:$0xff] }
 0x1df   : > { %1799 = vmatprep.subr.mxu1 %v1463_v46  ;;  %3051 = vmatprep.subr.mxu0 %v1904_v62  ;;  %v1876_v46 = vld [vmem:[%s4749_s3] sm:$0xff]  ;;  %v1913_v62 = vld [vmem:[%s4749_s3 + $0x128] sm:$0xff] }
 0x1e0   : > { %1800 = vmatpush2.msra.mxu1 %v1462_v47  ;;  %3052 = vmatpush3.msra.mxu0 %v1888_v6  ;;  %v1938_v47 = vld [vmem:[%s4749_s3 + $0x1f0] sm:$0xff]  ;;  %v1912_v6 = vld [vmem:[%s4749_s3 + $0x120] sm:$0xff] }
 0x1e1   : > { %1801 = vmatprep.subr.mxu1 %v1459_v42  ;;  %3053 = vmatprep.subr.mxu0 %v1903_v11  ;;  %v1937_v42 = vld [vmem:[%s4749_s3 + $0x1e8] sm:$0xff] }
 0x1e2   : > { %1802 = vmatpush2.msra.mxu1 %v1458_v48  ;;  %3054 = vmatpush3.msra.mxu0 %v1887_v13  ;;  %v1921_v48 = vld [vmem:[%s4749_s3 + $0x168] sm:$0xff] }
 0x1e3   : > { %1803 = vmatprep.subr.mxu1 %v1455_v49  ;;  %3055 = vmatprep.subr.mxu0 %v1902_v16  ;;  %v1920_v49 = vld [vmem:[%s4749_s3 + $0x160] sm:$0xff]  ;;  %v1927_v16 = vld [vmem:[%s4749_s3 + $0x198] sm:$0xff] }
 0x1e4   : > { %1804 = vmatpush2.msra.mxu1 %v1454_v51  ;;  %3056 = vmatpush3.msra.mxu0 %v1886_v20  ;;  %v1918_v51 = vld [vmem:[%s4749_s3 + $0x150] sm:$0xff] }
 0x1e5   : > { %1805 = vmatprep.subr.mxu1 %v1451_v52  ;;  %3057 = vmatprep.subr.mxu0 %v1901_v23  ;;  %v1917_v52 = vld [vmem:[%s4749_s3 + $0x148] sm:$0xff]  ;;  %v1926_v23 = vld [vmem:[%s4749_s3 + $0x190] sm:$0xff] }
 0x1e6   : > { %1806 = vmatpush2.msra.mxu1 %v1450_v59  ;;  %3058 = vmatpush3.msra.mxu0 %v1885_v27  ;;  %v1930_v59 = vld [vmem:[%s4749_s3 + $0x1b0] sm:$0xff] }
 0x1e7   : > { %1807 = vmatprep.subr.mxu1 %v1447_v61  ;;  %3059 = vmatprep.subr.mxu0 %v1900_v34  ;;  %v1929_v61 = vld [vmem:[%s4749_s3 + $0x1a8] sm:$0xff]  ;;  %v1910_v27 = vld [vmem:[%s4749_s3 + $0x110] sm:$0xff] }
 0x1e8   : > { %1808 = vmatpush2.msra.mxu1 %v1446_v0  ;;  %3060 = vmatpush3.msra.mxu0 %v1884_v1  ;;  %v1928_v0 = vld [vmem:[%s4749_s3 + $0x1a0] sm:$0xff] }
 0x1e9   : > { %1809 = vmatprep.subr.mxu1 %v1443_v10  ;;  %3061 = vmatprep.subr.mxu0 %v1899_v29  ;;  %v1909_v29 = vld [vmem:[%s4749_s3 + $0x108] sm:$0xff] }
 0x1ea   : > { %1810 = vmatpush2.msra.mxu1 %v1442_v12  ;;  %3062 = vmatpush3.msra.mxu0 %v1883_v33  ;;  %v1924_v33 = vld [vmem:[%s4749_s3 + $0x180] sm:$0xff] }
 0x1eb   : > { %1811 = vmatprep.subr.mxu1 %v1439_v14  ;;  %3063 = vmatprep.subr.mxu0 %v1898_v36  ;;  %v1908_v36 = vld [vmem:[%s4749_s3 + $0x100] sm:$0xff] }
 0x1ec   : > { %1812 = vmatpush2.msra.mxu1 %v1438_v19  ;;  %3064 = vmatpush3.msra.mxu0 %v1882_v5 }
 0x1ed   : > { %1813 = vmatprep.subr.mxu1 %v1435_v22  ;;  %3065 = vmatprep.subr.mxu0 %v1897_v7  ;;  %v1911_v22 = vld [vmem:[%s4749_s3 + $0x118] sm:$0xff] }
 0x1ee   : > { %1814 = vmatpush2.msra.mxu1 %v1434_v25  ;;  %3066 = vmatpush3.msra.mxu0 %v1881_v24 }
 0x1ef   : > { %1815 = vmatprep.subr.mxu1 %v1431_v31  ;;  %3067 = vmatprep.subr.mxu0 %v1896_v41  ;;  %v2983_v10 = vpop.f32.mrf.mxu0 }
 0x1f0   : > { %1816 = vmatpush2.msra.mxu1 %v1430_v63  ;;  %3068 = vmatpush3.msra.mxu0 %v1880_v43  ;;  %v1925_v63 = vld [vmem:[%s4749_s3 + $0x188] sm:$0xff] }
 0x1f1   : > { %1817 = vmatprep.subr.mxu1 %v1427_v28  ;;  %3069 = vmatprep.subr.mxu0 %v1895_v21  ;;  %v2984_v11 = vpop.f32.mrf.mxu0 }
 0x1f2   : > { %1818 = vmatpush2.msra.mxu1 %v1426_v32  ;;  %3070 = vmatpush3.msra.mxu0 %v1879_v44  ;;  %v2985_v31 = vadd.f32 %v2984_v11, %v2983_v10 }
 0x1f3   : > { %1819 = vmatprep.subr.mxu1 %v1423_v35  ;;  %3071 = vmatprep.subr.mxu0 %v1894_v3 }
 0x1f4   : > { %1820 = vmatpush2.msra.mxu1 %v1422_v37  ;;  %3072 = vmatpush3.msra.mxu0 %v1878_v45 }
 0x1f5   : > { %1821 = vmatprep.subr.mxu1 %v1419_v39 }
 0x1f6   : > { %1822 = vmatpush2.msra.mxu1 %v1418_v40 }
 0x1f7   : > { %1823 = vmatprep.subr.mxu1 %v1415_v9 }
 0x1f8   : > { %1824 = vmatpush2.msra.mxu1 %v1414_v18 }
 0x1f9   : > { %1826 = vmatmul.mubr.f32.vlgmr.msra.gmra.mxu1 %v3795_v55  ;;  %v1893_v55 = vld [vmem:[%s4749_s3 + $0x88] sm:$0xff] }
 0x1fa   : > { %1831 = vmatprep.mubr.f32.mxu1 %v3799_v58  ;;  %3073 = vmatprep.subr.mxu0 %v1893_v55  ;;  %v1877_v58 = vld [vmem:[%s4749_s3 + $0x8] sm:$0xff] }
 0x1fb   : > { %3074 = vmatpush3.msra.mxu0 %v1877_v58 }
 0x1fc   : > { %3075 = vmatprep.subr.mxu0 %v1892_v38 }
 0x1fd   : > { %1832 = vmatmul.mubr.f32.gmra.mxu1 %v3805_v4  ;;  %3076 = vmatpush3.msra.mxu0 %v1876_v46  ;;  %v1939_v4 = vld [vmem:[%s4749_s3 + $0x1f8] sm:$0xff] }
 0x1fe   : > { %1837 = vmatprep.mubr.f32.mxu1 %v3808_v8  ;;  %v1923_v8 = vld [vmem:[%s4749_s3 + $0x178] sm:$0xff]  ;;  %3092 = vmatprep.subr.mxu1 %v1939_v4 }
 0x1ff   : > { %3093 = vmatpush3.msra.mxu1 %v1923_v8 }
 0x200   : > { %3094 = vmatprep.subr.mxu1 %v1938_v47 }
 0x201   : > { %1838 = vmatmul.mubr.f32.gmra.mxu1 %v3813_v15  ;;  %v1922_v15 = vld [vmem:[%s4749_s3 + $0x170] sm:$0xff] }
 0x202   : > { %1843 = vmatprep.mubr.f32.mxu1 %v3816_v17  ;;  %3095 = vmatpush3.msra.mxu1 %v1922_v15  ;;  %v1936_v17 = vld [vmem:[%s4749_s3 + $0x1e0] sm:$0xff] }
 0x203   : > { %3096 = vmatprep.subr.mxu1 %v1937_v42 }
 0x204   : > { %3097 = vmatpush3.msra.mxu1 %v1921_v48 }
 0x205   : > { %1844 = vmatmul.mubr.f32.gmra.mxu1 %v3821_v26  ;;  %v1935_v26 = vld [vmem:[%s4749_s3 + $0x1d8] sm:$0xff]  ;;  %3098 = vmatprep.subr.mxu1 %v1936_v17 }
 0x206   : > { %1849 = vmatprep.mubr.f32.mxu1 %v3824_v30  ;;  %v1919_v30 = vld [vmem:[%s4749_s3 + $0x158] sm:$0xff]  ;;  %3099 = vmatpush3.msra.mxu1 %v1920_v49 }
 0x207   : > { %3100 = vmatprep.subr.mxu1 %v1935_v26 }
 0x208   : > { %3101 = vmatpush3.msra.mxu1 %v1919_v30 }
 0x209   : > { %1850 = vmatmul.mubr.f32.gmra.mxu1 %v3829_v2  ;;  %v1933_v2 = vld [vmem:[%s4749_s3 + $0x1c8] sm:$0xff]  ;;  %3102 = vmatprep.subr.mxu1 %v1934_v50 }
 0x20a   : > { %3103 = vmatpush3.msra.mxu1 %v1918_v51 }
 0x20b   : > { %3104 = vmatprep.subr.mxu1 %v1933_v2 }
 0x20c   : > { %3105 = vmatpush3.msra.mxu1 %v1917_v52 }
 0x20d   : > { %3106 = vmatprep.subr.mxu1 %v1932_v53 }
 0x20e   : > { %3107 = vmatpush3.msra.mxu1 %v1916_v54 }
 0x20f   : > { %3108 = vmatprep.subr.mxu1 %v1931_v56 }
 0x210   : > { %3109 = vmatpush3.msra.mxu1 %v1915_v57 }
 0x211   : > { %3110 = vmatprep.subr.mxu1 %v1930_v59 }
 0x212   : > { %3111 = vmatpush3.msra.mxu1 %v1914_v60 }
 0x213   : > { %3112 = vmatprep.subr.mxu1 %v1929_v61 }
 0x214   : > { %3113 = vmatpush3.msra.mxu1 %v1913_v62 }
 0x215   : > { %3114 = vmatprep.subr.mxu1 %v1928_v0 }
 0x216   : > { %3115 = vmatpush3.msra.mxu1 %v1912_v6 }
 0x217   : > { %3116 = vmatprep.subr.mxu1 %v1927_v16 }
 0x218   : > { %3117 = vmatpush3.msra.mxu1 %v1911_v22 }
 0x219   : > { %3118 = vmatprep.subr.mxu1 %v1926_v23 }
 0x21a   : > { %3119 = vmatpush3.msra.mxu1 %v1910_v27 }
 0x21b   : > { %3120 = vmatprep.subr.mxu1 %v1925_v63 }
 0x21c   : > { %v2986_v12 = vpop.f32.mrf.mxu0  ;;  %3121 = vmatpush3.msra.mxu1 %v1909_v29 }
 0x21d   : > { %3122 = vmatprep.subr.mxu1 %v1924_v33 }
 0x21e   : > { %v2987_v13 = vpop.f32.mrf.mxu0  ;;  %3123 = vmatpush3.msra.mxu1 %v1908_v36 }
 0x21f   : > { %v2988_v37 = vadd.f32 %v2987_v13, %v2986_v12 }
 0x222   : > { %v2989_v14 = vpop.f32.mrf.mxu0 }
 0x224   : > { %v2990_v19 = vpop.f32.mrf.mxu0 }
 0x225   : > { %v2991_v9 = vadd.f32 %v2990_v19, %v2989_v14 }
 0x228   : > { %v2992_v1 = vpop.f32.mrf.mxu0 }
 0x22a   : > { %v2993_v5 = vpop.f32.mrf.mxu0 }
 0x22b   : > { %v2994_v3 = vadd.f32 %v2993_v5, %v2992_v1 }
 0x22e   : > { %v2995_v18 = vpop.f32.mrf.mxu0 }
 0x230   : > { %v2996_v45 = vpop.f32.mrf.mxu0 }
 0x231   : > { %v2997_v4 = vadd.f32 %v2996_v45, %v2995_v18 }
 0x232   : > { %v1542_v29 = vpop.f32.mrf.mxu0 }
 0x239   : > { %v3030_v20 = vpop.f32.mrf.mxu1 }
 0x23b   : > { %v3031_v25 = vpop.f32.mrf.mxu1 }
 0x23c   : > { %v3032_v34 = vadd.f32 %v3031_v25, %v3030_v20 }
 0x23d   : > { %v3033_v28 = vpop.f32.mrf.mxu1 }
 0x23e   : > { %v1133_v32 = vadd.f32 %v3032_v34, %v2985_v31 }
 0x23f   : > { %v3034_v35 = vpop.f32.mrf.mxu1 }
 0x240   : > { %3192 = vrsqrt.f32 %v1133_v32  ;;  %v3035_v39 = vadd.f32 %v3034_v35, %v3033_v28  ;;  %vm1158_vm0 = vcmp.eq.f32.partialorder %v1133_v32, inf  ;;  %v1161_v48 = vand.u32 2147483648, %v1133_v32 }
 0x241   : > { %v3036_v7 = vpop.f32.mrf.mxu1  ;;  %vm1160_vm2 = vcmp.eq.f32.partialorder %v1133_v32, 0.0 }
 0x242   : > { %v1138_v40 = vadd.f32 %v3035_v39, %v2988_v37 }
 0x243   : > { %v3037_v24 = vpop.f32.mrf.mxu1 }
 0x244   : > { %v3038_v41 = vadd.f32 %v3037_v24, %v3036_v7  ;;  %3194 = vrsqrt.f32 %v1138_v40  ;;  %vm1165_vm3 = vcmp.eq.f32.partialorder %v1138_v40, inf  ;;  %v1168_v50 = vand.u32 2147483648, %v1138_v40  ;;  %v1544_v7 = vpop.f32.mrf.mxu0 }
 0x245   : > { %v3039_v43 = vpop.f32.mrf.mxu1  ;;  %vm1167_vm4 = vcmp.eq.f32.partialorder %v1138_v40, 0.0 }
 0x246   : > { %v1143_v21 = vadd.f32 %v3038_v41, %v2991_v9  ;;  %v1548_v41 = vpop.f32.mrf.mxu0 }
 0x247   : > { %v3040_v44 = vpop.f32.mrf.mxu1 }
 0x248   : > { %3196 = vrsqrt.f32 %v1143_v21  ;;  %v3041_v55 = vadd.f32 %v3040_v44, %v3039_v43  ;;  %vm1172_vm5 = vcmp.eq.f32.partialorder %v1143_v21, inf  ;;  %v1175_v54 = vand.u32 2147483648, %v1143_v21  ;;  %v1550_v45 = vpop.f32.mrf.mxu0 }
 0x249   : > { %v3042_v58 = vpop.f32.mrf.mxu1  ;;  %vm1174_vm6 = vcmp.eq.f32.partialorder %v1143_v21, 0.0 }
 0x24a   : > { %v1148_v38 = vadd.f32 %v3041_v55, %v2994_v3 }
 0x24b   : > { %v3043_v46 = vpop.f32.mrf.mxu1 }
 0x24c   : > { %v3044_v8 = vadd.f32 %v3043_v46, %v3042_v58  ;;  %3198 = vrsqrt.f32 %v1148_v38  ;;  %vm1179_vm7 = vcmp.eq.f32.partialorder %v1148_v38, inf  ;;  %v1182_v61 = vand.u32 2147483648, %v1148_v38 }
 0x24d   : > { %v3193_v47 = vpop.eup %3192  ;;  %vm1181_vm8 = vcmp.eq.f32.partialorder %v1148_v38, 0.0 }
 0x24e   : > { %v1157_v15 = vmul.f32 %v3193_v47, %v1133_v32  ;;  %v1153_v42 = vadd.f32 %v3044_v8, %v2997_v4 }
 0x250   : > { %v1159_v17 = vsel %vm1158_vm0, %v1133_v32, %v1157_v15  ;;  %3200 = vrsqrt.f32 %v1153_v42  ;;  %vm1186_vm9 = vcmp.eq.f32.partialorder %v1153_v42, inf  ;;  %v1189_v12 = vand.u32 2147483648, %v1153_v42 }
 0x251   : > { %v1162_v49 = vsel %vm1160_vm2, %v1161_v48, %v1159_v17  ;;  %v3195_v26 = vpop.eup %3194  ;;  %vm1188_vm10 = vcmp.eq.f32.partialorder %v1153_v42, 0.0 }
 0x252   : > { %1192 = vst.msk [vmem:[#allocation2] sm:$0xff] %vm1191_vm1, %v1162_v49  ;;  %v1164_v30 = vmul.f32 %v3195_v26, %v1138_v40 }
 0x254   : > { %v1166_v2 = vsel %vm1165_vm3, %v1138_v40, %v1164_v30 }
 0x255   : > { %v3197_v51 = vpop.eup %3196  ;;  %v1169_v52 = vsel %vm1167_vm4, %v1168_v50, %v1166_v2 }
 0x256   : > { %v1171_v53 = vmul.f32 %v3197_v51, %v1143_v21  ;;  %1193 = vst.msk [vmem:[#allocation2 + $0x8] sm:$0xff] %vm1191_vm1, %v1169_v52 }
 0x258   : > { %v1173_v56 = vsel %vm1172_vm5, %v1143_v21, %v1171_v53 }
 0x259   : > { %v1176_v57 = vsel %vm1174_vm6, %v1175_v54, %v1173_v56  ;;  %v3199_v59 = vpop.eup %3198  ;;  %v4050_v14 = vld [vmem:[#allocation2] sm:$0xff] }
 0x25a   : > { %1194 = vst.msk [vmem:[#allocation2 + $0x10] sm:$0xff] %vm1191_vm1, %v1176_v57  ;;  %v1178_v60 = vmul.f32 %v3199_v59, %v1148_v38  ;;  %v2225_v22 = vsel %vm1191_vm1, %v4050_v14, 0.0 }
 0x25c   : > { %v1180_v0 = vsel %vm1179_vm7, %v1148_v38, %v1178_v60 }
 0x25d   : > { %v3201_v62 = vpop.eup %3200  ;;  %v1183_v6 = vsel %vm1181_vm8, %v1182_v61, %v1180_v0  ;;  %v4047_v11 = vld [vmem:[#allocation2 + $0x8] sm:$0xff] }
 0x25e   : > { %v1185_v10 = vmul.f32 %v3201_v62, %v1153_v42  ;;  %1195 = vst.msk [vmem:[#allocation2 + $0x18] sm:$0xff] %vm1191_vm1, %v1183_v6  ;;  %v2226_v20 = vsel %vm1191_vm1, %v4047_v11, 0.0  ;;  %v4063_v31 = vld [vmem:[#allocation2 + $0x1] sm:$0xff] }
 0x25f   : > { %v2227_v27 = vadd.f32 %v2226_v20, %v2225_v22  ;;  %v2388_v35 = vsel %vm1191_vm1, %v4063_v31, 0.0  ;;  %v4083_v38 = vld [vmem:[#allocation2 + $0x2] sm:$0xff] }
 0x260   : > { %v1187_v13 = vsel %vm1186_vm9, %v1153_v42, %v1185_v10  ;;  %v2550_v48 = vsel %vm1191_vm1, %v4083_v38, 0.0 }
 0x261   : > { %v1190_v16 = vsel %vm1188_vm10, %v1189_v12, %v1187_v13  ;;  %v4052_v19 = vld [vmem:[#allocation2 + $0x10] sm:$0xff] }
 0x262   : > { %1196 = vst.msk [vmem:[#allocation2 + $0x20] sm:$0xff] %vm1191_vm1, %v1190_v16  ;;  %v2228_v23 = vsel %vm1191_vm1, %v4052_v19, 0.0  ;;  %v4061_v25 = vld [vmem:[#allocation2 + $0x9] sm:$0xff] }
 0x263   : > { %v2229_v63 = vadd.f32 %v2228_v23, %v2227_v27  ;;  %v2389_v28 = vsel %vm1191_vm1, %v4061_v25, 0.0  ;;  %v4081_v3 = vld [vmem:[#allocation2 + $0xa] sm:$0xff] }
 0x264   : > { %v2390_v37 = vadd.f32 %v2389_v28, %v2388_v35  ;;  %v2551_v8 = vsel %vm1191_vm1, %v4081_v3, 0.0 }
 0x265   : > { %v4065_v34 = vld [vmem:[#allocation2 + $0x18] sm:$0x3f]  ;;  %v2552_v26 = vadd.f32 %v2551_v8, %v2550_v48 }
 0x266   : > { %v4067_v1 = vld [vmem:[#allocation2 + $0x11] sm:$0xff]  ;;  %v2230_v32 = vsel %vm2177_vm11, %v4065_v34, 0.0  ;;  %v4075_v36 = vld [vmem:[#allocation2 + $0x19] sm:$0x3f] }
 0x267   : > { %v2231_v33 = vadd.f32 %v2230_v32, %v2229_v63  ;;  %v2391_v5 = vsel %vm1191_vm1, %v4067_v1, 0.0  ;;  %v2393_v9 = vsel %vm2177_vm11, %v4075_v36, 0.0  ;;  %v4085_v46 = vld [vmem:[#allocation2 + $0x12] sm:$0xff]  ;;  %v4093_v50 = vld [vmem:[#allocation2 + $0x1a] sm:$0x3f] }
 0x268   : > { %v2392_v40 = vadd.f32 %v2391_v5, %v2390_v37  ;;  %v2553_v17 = vsel %vm1191_vm1, %v4085_v46, 0.0  ;;  %v2555_v60 = vsel %vm2177_vm11, %v4093_v50, 0.0 }
 0x269   : > { %v2232_v39 = vrot.slane %v2231_v33, 4  ;;  %v2554_v51 = vadd.f32 %v2553_v17, %v2552_v26 }
 0x26a   : > { %v2394_v18 = vadd.f32 %v2393_v9, %v2392_v40 }
 0x26b   : > { %v2233_v24 = vadd.f32 %v2232_v39, %v2231_v33  ;;  %v2556_v16 = vadd.f32 %v2555_v60, %v2554_v51 }
 0x26c   : > { %v2395_v21 = vrot.slane %v2394_v18, 4  ;;  %v1554_v15 = vpop.f32.mrf.mxu0 }
 0x26d   : > { %v2234_v43 = vrot.slane %v2233_v24, 2  ;;  %v2557_v40 = vrot.slane %v2556_v16, 4 }
 0x26e   : > { %v2396_v55 = vadd.f32 %v2395_v21, %v2394_v18  ;;  %v1556_v52 = vpop.f32.mrf.mxu0 }
 0x26f   : > { %v2235_v44 = vadd.f32 %v2234_v43, %v2233_v24 }
 0x270   : > { %v2397_v4 = vrot.slane %v2396_v55, 2 }
 0x271   : > { %v2236_v58 = vrot.slane %v2235_v44, 1 }
 0x272   : > { %v2398_v42 = vadd.f32 %v2397_v4, %v2396_v55  ;;  %v1560_v22 = vpop.f32.mrf.mxu0 }
 0x273   : > { %v2237_v47 = vadd.f32 %v2236_v58, %v2235_v44 }
 0x274   : > { %v2399_v30 = vrot.slane %v2398_v42, 1  ;;  %v1562_v18 = vpop.f32.mrf.mxu0 }
 0x275   : > { %v2239_v49 = vmul.f32 0.033333335, %v2237_v47 }
 0x276   : > { %v2400_v10 = vadd.f32 %v2399_v30, %v2398_v42 }
 0x277   : > { %v4096_v53 = vsub.f32 %v4050_v14, %v2239_v49  ;;  %v4099_v54 = vsub.f32 %v4047_v11, %v2239_v49  ;;  %v4102_v56 = vsub.f32 %v4052_v19, %v2239_v49  ;;  %v4105_v57 = vsub.f32 %v4065_v34, %v2239_v49 }
 0x278   : > { %v2401_v37 = vmul.f32 0.033333335, %v2400_v10 }
 0x279   : > { %v1637_v2 = vpop.f32.mrf.mxu1  ;;  %v2262_v62 = vmul.f32 %v4096_v53, %v4096_v53  ;;  %v2263_v0 = vmul.f32 %v4099_v54, %v4099_v54  ;;  %v2264_v6 = vmul.f32 %v4102_v56, %v4102_v56  ;;  %v2265_v13 = vmul.f32 %v4105_v57, %v4105_v57 }
 0x27a   : > { %v1638_v59 = vadd.f32 %v1637_v2, %v1542_v29  ;;  %v4122_v43 = vsub.f32 %v4063_v31, %v2401_v37  ;;  %v4128_v21 = vsub.f32 %v4067_v1, %v2401_v37  ;;  %v4131_v58 = vsub.f32 %v4075_v36, %v2401_v37 }
 0x27b   : > { %v1639_v61 = vpop.f32.mrf.mxu1  ;;  %v2266_v23 = vsel %vm1191_vm1, %v2262_v62, 0.0  ;;  %v2267_v27 = vsel %vm1191_vm1, %v2263_v0, 0.0  ;;  %v2269_v35 = vsel %vm1191_vm1, %v2264_v6, 0.0  ;;  %v2558_v2 = vadd.f32 %v2557_v40, %v2556_v16 }
 0x27c   : > { %v1640_v12 = vadd.f32 %v1639_v61, %v1544_v7  ;;  %v2268_v29 = vadd.f32 %v2267_v27, %v2266_v23  ;;  %v1856_v32 = vmul.f32 %v1638_v59, %v1638_v59  ;;  %v2271_v7 = vsel %vm2177_vm11, %v2265_v13, 0.0 }
 0x27d   : > { %v1643_v20 = vpop.f32.mrf.mxu1  ;;  %v2424_v8 = vmul.f32 %v4122_v43, %v4122_v43  ;;  %v2426_v17 = vmul.f32 %v4128_v21, %v4128_v21 }
 0x27e   : > { %v1857_v63 = vmul.f32 %v1640_v12, %v1640_v12  ;;  %v1644_v28 = vadd.f32 %v1643_v20, %v1548_v41  ;;  %v2270_v39 = vadd.f32 %v2269_v35, %v2268_v29  ;;  %v4125_v41 = vsub.f32 %v4061_v25, %v2401_v37 }
 0x27f   : > { %v1645_v33 = vpop.f32.mrf.mxu1  ;;  %v2428_v30 = vsel %vm1191_vm1, %v2424_v8, 0.0  ;;  %v2431_v12 = vsel %vm1191_vm1, %v2426_v17, 0.0  ;;  %v4151_v8 = vld [vmem:[#allocation2 + $0x1b] sm:$0x3f] }
 0x280   : > { %2004 = vmatprep.mubr.f32.mxu0 %v1857_v63  ;;  %v1646_v5 = vadd.f32 %v1645_v33, %v1550_v45  ;;  %v1860_v24 = vmul.f32 %v1644_v28, %v1644_v28  ;;  %v2272_v45 = vadd.f32 %v2271_v7, %v2270_v39  ;;  %v2425_v47 = vmul.f32 %v4125_v41, %v4125_v41 }
 0x281   : > { %2005 = vmatmul.mubr.f32.vlgmr.msra.gmra.mxu0 %v1856_v32  ;;  %v1649_v9 = vpop.f32.mrf.mxu1  ;;  %v2559_v63 = vrot.slane %v2558_v2, 2 }
 0x282   : > { %v1861_v44 = vmul.f32 %v1646_v5, %v1646_v5  ;;  %v1650_v55 = vadd.f32 %v1649_v9, %v1554_v15  ;;  %v2273_v48 = vrot.slane %v2272_v45, 4  ;;  %v1566_v15 = vpop.f32.mrf.mxu0  ;;  %v2429_v51 = vsel %vm1191_vm1, %v2425_v47, 0.0 }
 0x283   : > { %v1651_v4 = vpop.f32.mrf.mxu1  ;;  %v2430_v0 = vadd.f32 %v2429_v51, %v2428_v30  ;;  %v2560_v35 = vadd.f32 %v2559_v63, %v2558_v2 }
 0x284   : > { %v1652_v42 = vadd.f32 %v1651_v4, %v1556_v52  ;;  %2009 = vmatprep.mubr.f32.mxu0 %v1861_v44  ;;  %v1864_v49 = vmul.f32 %v1650_v55, %v1650_v55  ;;  %v2274_v61 = vadd.f32 %v2273_v48, %v2272_v45  ;;  %v2427_v52 = vmul.f32 %v4131_v58, %v4131_v58  ;;  %v1568_v23 = vpop.f32.mrf.mxu0  ;;  %v4147_v44 = vld [vmem:[#allocation2 + $0x3] sm:$0xff]  ;;  %v4149_v55 = vld [vmem:[#allocation2 + $0x13] sm:$0xff] }
 0x285   : > { %v1655_v26 = vpop.f32.mrf.mxu1  ;;  %2010 = vmatmul.mubr.f32.gmra.mxu0 %v1860_v24  ;;  %v2432_v27 = vadd.f32 %v2431_v12, %v2430_v0  ;;  %v2561_v40 = vrot.slane %v2560_v35, 1  ;;  %v4145_v24 = vld [vmem:[#allocation2 + $0xb] sm:$0xff]  ;;  %v2712_v17 = vsel %vm1191_vm1, %v4147_v44, 0.0 }
 0x286   : > { %v1865_v59 = vmul.f32 %v1652_v42, %v1652_v42  ;;  %v1656_v60 = vadd.f32 %v1655_v26, %v1560_v22  ;;  %v2275_v10 = vrot.slane %v2274_v61, 2  ;;  %v2433_v29 = vsel %vm2177_vm11, %v2427_v52, 0.0 }
 0x287   : > { %v1657_v62 = vpop.f32.mrf.mxu1  ;;  %v2434_v33 = vadd.f32 %v2433_v29, %v2432_v27  ;;  %v2562_v4 = vadd.f32 %v2561_v40, %v2560_v35  ;;  %v2713_v47 = vsel %vm1191_vm1, %v4145_v24, 0.0 }
 0x288   : > { %v1658_v6 = vadd.f32 %v1657_v62, %v1562_v18  ;;  %2014 = vmatprep.mubr.f32.mxu0 %v1865_v59  ;;  %v1868_v13 = vmul.f32 %v1656_v60, %v1656_v60  ;;  %v2276_v22 = vadd.f32 %v2275_v10, %v2274_v61  ;;  %v2714_v26 = vadd.f32 %v2713_v47, %v2712_v17 }
 0x289   : > { %v1661_v20 = vpop.f32.mrf.mxu1  ;;  %2015 = vmatmul.mubr.f32.gmra.mxu0 %v1864_v49  ;;  %v2435_v7 = vrot.slane %v2434_v33, 4  ;;  %v2563_v48 = vmul.f32 0.033333335, %v2562_v4  ;;  %v2715_v49 = vsel %vm1191_vm1, %v4149_v55, 0.0 }
 0x28a   : > { %v1869_v16 = vmul.f32 %v1658_v6, %v1658_v6  ;;  %v1662_v28 = vadd.f32 %v1661_v20, %v1566_v15  ;;  %v2277_v5 = vrot.slane %v2276_v22, 1  ;;  %v2717_v15 = vsel %vm2177_vm11, %v4151_v8, 0.0 }
 0x28b   : > { %v1663_v32 = vpop.f32.mrf.mxu1  ;;  %v2436_v45 = vadd.f32 %v2435_v7, %v2434_v33  ;;  %v4162_v51 = vsub.f32 %v4083_v38, %v2563_v48  ;;  %v4165_v2 = vsub.f32 %v4081_v3, %v2563_v48  ;;  %v4168_v59 = vsub.f32 %v4085_v46, %v2563_v48 }
 0x28c   : > { %v1664_v37 = vadd.f32 %v1663_v32, %v1568_v23  ;;  %2019 = vmatprep.mubr.f32.mxu0 %v1869_v16  ;;  %v1872_v39 = vmul.f32 %v1662_v28, %v1662_v28  ;;  %v2278_v18 = vadd.f32 %v2277_v5, %v2276_v22  ;;  %v4171_v60 = vsub.f32 %v4093_v50, %v2563_v48 }
 0x28d   : > { %2020 = vmatmul.mubr.f32.gmra.mxu0 %v1868_v13  ;;  %v2437_v42 = vrot.slane %v2436_v45, 2  ;;  %v2716_v61 = vadd.f32 %v2715_v49, %v2714_v26  ;;  %v2586_v62 = vmul.f32 %v4162_v51, %v4162_v51  ;;  %v2587_v0 = vmul.f32 %v4165_v2, %v4165_v2 }
 0x28e   : > { %v1873_v9 = vmul.f32 %v1664_v37, %v1664_v37  ;;  %3202 = vrsqrt.f32 %v2278_v18  ;;  %v2588_v6 = vmul.f32 %v4168_v59, %v4168_v59  ;;  %v2589_v13 = vmul.f32 %v4171_v60, %v4171_v60 }
 0x28f   : > { %v2438_v30 = vadd.f32 %v2437_v42, %v2436_v45  ;;  %v2718_v10 = vadd.f32 %v2717_v15, %v2716_v61  ;;  %v2590_v20 = vsel %vm1191_vm1, %v2586_v62, 0.0  ;;  %v2591_v23 = vsel %vm1191_vm1, %v2587_v0, 0.0 }
 0x290   : > { %2024 = vmatprep.mubr.f32.mxu0 %v1873_v9  ;;  %v2592_v27 = vadd.f32 %v2591_v23, %v2590_v20  ;;  %v2593_v63 = vsel %vm1191_vm1, %v2588_v6, 0.0  ;;  %v2595_v22 = vsel %vm2177_vm11, %v2589_v13, 0.0 }
 0x291   : > { %2025 = vmatmul.mubr.f32.gmra.mxu0 %v1872_v39  ;;  %v2439_v52 = vrot.slane %v2438_v30, 1  ;;  %v2719_v28 = vrot.slane %v2718_v10, 4 }
 0x292   : > { %v2594_v16 = vadd.f32 %v2593_v63, %v2592_v27 }
 0x293   : > { %v2440_v12 = vadd.f32 %v2439_v52, %v2438_v30  ;;  %v2720_v32 = vadd.f32 %v2719_v28, %v2718_v10 }
 0x294   : > { %v2596_v29 = vadd.f32 %v2595_v22, %v2594_v16 }
 0x295   : > { %3204 = vrsqrt.f32 %v2440_v12  ;;  %v2721_v40 = vrot.slane %v2720_v32, 2 }
 0x296   : > { %v2597_v7 = vrot.slane %v2596_v29, 4 }
 0x297   : > { %v2722_v18 = vadd.f32 %v2721_v40, %v2720_v32 }
 0x298   : > { %v2598_v9 = vadd.f32 %v2597_v7, %v2596_v29 }
 0x299   : > { %v2723_v4 = vrot.slane %v2722_v18, 1 }
 0x29a   : > { %v2599_v45 = vrot.slane %v2598_v9, 2 }
 0x29b   : > { %v3203_v33 = vpop.eup %3202  ;;  %v2724_v42 = vadd.f32 %v2723_v4, %v2722_v18 }
 0x29c   : > { %v4186_v35 = vmul.f32 %v3203_v33, %v4096_v53  ;;  %v4189_v37 = vmul.f32 %v3203_v33, %v4099_v54  ;;  %v4192_v5 = vmul.f32 %v3203_v33, %v4102_v56  ;;  %v4195_v39 = vmul.f32 %v3203_v33, %v4105_v57  ;;  %v1732_v53 = vpop.f32.mrf.mxu0 }
 0x29d   : > { %v2600_v47 = vadd.f32 %v2599_v45, %v2598_v9  ;;  %v2725_v26 = vmul.f32 0.033333335, %v2724_v42 }
 0x29f   : > { %v2601_v49 = vrot.slane %v2600_v47, 1  ;;  %v4210_v30 = vsub.f32 %v4147_v44, %v2725_v26  ;;  %v4213_v61 = vsub.f32 %v4145_v24, %v2725_v26  ;;  %v4219_v52 = vsub.f32 %v4151_v8, %v2725_v26 }
 0x2a1   : > { %v2602_v15 = vadd.f32 %v2601_v49, %v2600_v47  ;;  %4758 = vst [vmem:[#allocation10_spill] sm:$0xff] %v4210_v30  ;;  %4759 = vst [vmem:[#allocation11_spill] sm:$0xff] %v4213_v61  ;;  %v2751_v0 = vmul.f32 %v4219_v52, %v4219_v52 }
 0x2a2   : > { %v3205_v48 = vpop.eup %3204 }
 0x2a3   : > { %v4198_v17 = vmul.f32 %v3205_v48, %v4122_v43  ;;  %v4201_v54 = vmul.f32 %v3205_v48, %v4125_v41  ;;  %v4204_v56 = vmul.f32 %v3205_v48, %v4128_v21  ;;  %v4207_v57 = vmul.f32 %v3205_v48, %v4131_v58  ;;  %v1734_v41 = vpop.f32.mrf.mxu0 }
 0x2a4   : > { %v4216_v43 = vsub.f32 %v4149_v55, %v2725_v26  ;;  %3206 = vrsqrt.f32 %v2602_v15  ;;  %v2748_v21 = vmul.f32 %v4210_v30, %v4210_v30  ;;  %v2749_v58 = vmul.f32 %v4213_v61, %v4213_v61 }
 0x2a5   : > { %v1738_v12 = vpop.f32.mrf.mxu0  ;;  %v2757_v27 = vsel %vm2177_vm11, %v2751_v0, 0.0 }
 0x2a6   : > { %v2750_v62 = vmul.f32 %v4216_v43, %v4216_v43  ;;  %v2752_v6 = vsel %vm1191_vm1, %v2748_v21, 0.0  ;;  %v2753_v10 = vsel %vm1191_vm1, %v2749_v58, 0.0 }
 0x2a7   : > { %v2754_v13 = vadd.f32 %v2753_v10, %v2752_v6  ;;  %v1740_v63 = vpop.f32.mrf.mxu0 }
 0x2a8   : > { %v2755_v20 = vsel %vm1191_vm1, %v2750_v62, 0.0 }
 0x2a9   : > { %v2756_v23 = vadd.f32 %v2755_v20, %v2754_v13  ;;  %v1744_v22 = vpop.f32.mrf.mxu0 }
 0x2ab   : > { %v2758_v16 = vadd.f32 %v2757_v27, %v2756_v23  ;;  %v1746_v47 = vpop.f32.mrf.mxu0 }
 0x2ad   : > { %v2759_v28 = vrot.slane %v2758_v16, 4  ;;  %v1750_v0 = vpop.f32.mrf.mxu0 }
 0x2af   : > { %v2760_v29 = vadd.f32 %v2759_v28, %v2758_v16  ;;  %v1752_v20 = vpop.f32.mrf.mxu0 }
 0x2b1   : > { %v3207_v32 = vpop.eup %3206  ;;  %v2761_v7 = vrot.slane %v2760_v29, 2  ;;  %v1756_v27 = vpop.f32.mrf.mxu0 }
 0x2b2   : > { %v4234_v40 = vmul.f32 %v3207_v32, %v4162_v51  ;;  %v4237_v9 = vmul.f32 %v3207_v32, %v4165_v2  ;;  %v4240_v18 = vmul.f32 %v3207_v32, %v4168_v59  ;;  %v4243_v42 = vmul.f32 %v3207_v32, %v4171_v60 }
 0x2b3   : > { %v2762_v48 = vadd.f32 %v2761_v7, %v2760_v29 }
 0x2b4   : > { %4760 = vst [vmem:[#allocation12_spill] sm:$0xff] %v4237_v9  ;;  %4761 = vst [vmem:[#allocation13_spill] sm:$0xff] %v4240_v18 }
 0x2b5   : > { %4762 = vst [vmem:[#allocation14_spill] sm:$0xff] %v4243_v42  ;;  %v2763_v15 = vrot.slane %v2762_v48, 1 }
 0x2b7   : > { %v2764_v2 = vadd.f32 %v2763_v15, %v2762_v48 }
 0x2b9   : > { %v1827_v33 = vpop.f32.mrf.mxu1  ;;  %3208 = vrsqrt.f32 %v2764_v2 }
 0x2ba   : > { %v1828_v45 = vadd.f32 %v1827_v33, %v1732_v53  ;;  %v1758_v33 = vpop.f32.mrf.mxu0 }
 0x2bb   : > { %v1829_v4 = vpop.f32.mrf.mxu1 }
 0x2bc   : > { %v1830_v49 = vadd.f32 %v1829_v4, %v1734_v41  ;;  %v1858_v58 = vmul.f32 %v1828_v45, %v1828_v45 }
 0x2bd   : > { %v1833_v26 = vpop.f32.mrf.mxu1 }
 0x2be   : > { %v1859_v21 = vmul.f32 %v1830_v49, %v1830_v49  ;;  %v1834_v51 = vadd.f32 %v1833_v26, %v1738_v12 }
 0x2bf   : > { %v1835_v62 = vpop.f32.mrf.mxu1 }
 0x2c0   : > { %v1836_v6 = vadd.f32 %v1835_v62, %v1740_v63  ;;  %2094 = vmatprep.mubr.f32.mxu1 %v1859_v21  ;;  %v1862_v10 = vmul.f32 %v1834_v51, %v1834_v51 }
 0x2c1   : > { %v1839_v59 = vpop.f32.mrf.mxu1  ;;  %2095 = vmatmul.mubr.f32.vlgmr.msra.gmra.mxu1 %v1858_v58 }
 0x2c2   : > { %v1863_v53 = vmul.f32 %v1836_v6, %v1836_v6  ;;  %v1840_v13 = vadd.f32 %v1839_v59, %v1744_v22 }
 0x2c3   : > { %v1841_v60 = vpop.f32.mrf.mxu1 }
 0x2c4   : > { %v1842_v23 = vadd.f32 %v1841_v60, %v1746_v47  ;;  %2099 = vmatprep.mubr.f32.mxu1 %v1863_v53  ;;  %v1866_v12 = vmul.f32 %v1840_v13, %v1840_v13 }
 0x2c5   : > { %v1845_v41 = vpop.f32.mrf.mxu1  ;;  %2100 = vmatmul.mubr.f32.gmra.mxu1 %v1862_v10 }
 0x2c6   : > { %v1867_v16 = vmul.f32 %v1842_v23, %v1842_v23  ;;  %v1846_v28 = vadd.f32 %v1845_v41, %v1750_v0  ;;  %v4245_v49 = vpop.eup %3208  ;;  %v2169_v23 = vmul.f32 %v4047_v11, %v4047_v11 }
 0x2c7   : > { %v1847_v29 = vpop.f32.mrf.mxu1  ;;  %4763 = vst [vmem:[#allocation15_spill] sm:$0xff] %v4245_v49  ;;  %v4249_v15 = vmul.f32 %v4245_v49, %v4216_v43  ;;  %v4253_v21 = vmul.f32 %v4245_v49, %v4219_v52  ;;  %v2168_v52 = vmul.f32 %v4050_v14, %v4050_v14 }
 0x2c8   : > { %v1848_v32 = vadd.f32 %v1847_v29, %v1752_v20  ;;  %2104 = vmatprep.mubr.f32.mxu1 %v1867_v16  ;;  %v1870_v4 = vmul.f32 %v1846_v28, %v1846_v28  ;;  %v2173_v11 = vsel %vm1191_vm1, %v2169_v23, 0.0 }
 0x2c9   : > { %v1851_v63 = vpop.f32.mrf.mxu1  ;;  %2105 = vmatmul.mubr.f32.gmra.mxu1 %v1866_v12  ;;  %4764 = vst [vmem:[#allocation16_spill] sm:$0xff] %v4249_v15  ;;  %4765 = vst [vmem:[#allocation17_spill] sm:$0xff] %v4253_v21  ;;  %v2172_v14 = vsel %vm1191_vm1, %v2168_v52, 0.0 }
 0x2ca   : > { %v1871_v7 = vmul.f32 %v1848_v32, %v1848_v32  ;;  %v1852_v45 = vadd.f32 %v1851_v63, %v1756_v27  ;;  %v2170_v27 = vmul.f32 %v4052_v19, %v4052_v19  ;;  %v2333_v32 = vmul.f32 %v4061_v25, %v4061_v25 }
 0x2cb   : > { %v1853_v22 = vpop.f32.mrf.mxu1  ;;  %v2171_v63 = vmul.f32 %v4065_v34, %v4065_v34  ;;  %v2332_v19 = vmul.f32 %v4063_v31, %v4063_v31 }
 0x2cc   : > { %v1854_v48 = vadd.f32 %v1853_v22, %v1758_v33  ;;  %2109 = vmatprep.mubr.f32.mxu1 %v1871_v7  ;;  %v1874_v47 = vmul.f32 %v1852_v45, %v1852_v45  ;;  %v2334_v45 = vmul.f32 %v4067_v1, %v4067_v1  ;;  %v2175_v34 = vsel %vm1191_vm1, %v2170_v27, 0.0 }
 0x2cd   : > { %2110 = vmatmul.mubr.f32.gmra.mxu1 %v1870_v4  ;;  %v2495_v4 = vmul.f32 %v4081_v3, %v4081_v3  ;;  %v2337_v31 = vsel %vm1191_vm1, %v2333_v32, 0.0  ;;  %v2496_v1 = vmul.f32 %v4085_v46, %v4085_v46  ;;  %v2497_v32 = vmul.f32 %v4093_v50, %v4093_v50 }
 0x2ce   : > { %v1875_v26 = vmul.f32 %v1854_v48, %v1854_v48  ;;  %v2494_v48 = vmul.f32 %v4083_v38, %v4083_v38 }
 0x2d0   : > { %2114 = vmatprep.mubr.f32.mxu1 %v1875_v26 }
 0x2d1   : > { %2115 = vmatmul.mubr.f32.gmra.mxu1 %v1874_v47 }
 0x341   : > { %v3077_v58 = vpop.f32.mrf.mxu0 }
 0x343   : > { %v3078_v51 = vpop.f32.mrf.mxu0 }
 0x344   : > { %v3079_v10 = vadd.f32 %v3078_v51, %v3077_v58  ;;  %v2174_v58 = vadd.f32 %v2173_v11, %v2172_v14 }
 0x345   : > { %v3080_v62 = vpop.f32.mrf.mxu0 }
 0x347   : > { %v3081_v0 = vpop.f32.mrf.mxu0 }
 0x348   : > { %v3082_v16 = vadd.f32 %v3081_v0, %v3080_v62  ;;  %v2178_v62 = vsel %vm2177_vm11, %v2171_v63, 0.0 }
 0x349   : > { %v3083_v2 = vpop.f32.mrf.mxu0 }
 0x34b   : > { %v3084_v6 = vpop.f32.mrf.mxu0 }
 0x34c   : > { %v3085_v25 = vadd.f32 %v3084_v6, %v3083_v2  ;;  %v2176_v2 = vadd.f32 %v2175_v34, %v2174_v58  ;;  %v2336_v6 = vsel %vm1191_vm1, %v2332_v19, 0.0 }
 0x34d   : > { %v3086_v60 = vpop.f32.mrf.mxu0 }
 0x34f   : > { %v3087_v12 = vpop.f32.mrf.mxu0 }
 0x350   : > { %v3088_v52 = vadd.f32 %v3087_v12, %v3086_v60  ;;  %v2656_v12 = vmul.f32 %v4147_v44, %v4147_v44 }
 0x351   : > { %v3089_v47 = vpop.f32.mrf.mxu0 }
 0x353   : > { %v3090_v23 = vpop.f32.mrf.mxu0 }
 0x381   : > { %v3124_v59 = vpop.f32.mrf.mxu1 }
 0x383   : > { %v3125_v53 = vpop.f32.mrf.mxu1 }
 0x384   : > { %v3126_v13 = vadd.f32 %v3125_v53, %v3124_v59  ;;  %v2339_v59 = vsel %vm1191_vm1, %v2334_v45, 0.0  ;;  %v2499_v53 = vsel %vm1191_vm1, %v2495_v4, 0.0 }
 0x385   : > { %v3127_v20 = vpop.f32.mrf.mxu1 }
 0x386   : > { %v4255_v43 = vadd.f32 %v3126_v13, %v3079_v10  ;;  %v2335_v10 = vmul.f32 %v4075_v36, %v4075_v36  ;;  %v2338_v13 = vadd.f32 %v2337_v31, %v2336_v6  ;;  %v2657_v36 = vmul.f32 %v4145_v24, %v4145_v24 }
 0x387   : > { %v3128_v41 = vpop.f32.mrf.mxu1  ;;  %v2659_v31 = vmul.f32 %v4151_v8, %v4151_v8  ;;  %v2660_v6 = vsel %vm1191_vm1, %v2656_v12, 0.0 }
 0x388   : > { %3210 = vrsqrt.f32 %v4255_v43  ;;  %v3129_v28 = vadd.f32 %v3128_v41, %v3127_v20  ;;  %v2498_v20 = vsel %vm1191_vm1, %v2494_v48, 0.0  ;;  %vm2122_vm12 = vcmp.eq.f32.partialorder %v4255_v43, inf }
 0x389   : > { %v3130_v29 = vpop.f32.mrf.mxu1  ;;  %v2500_v63 = vadd.f32 %v2499_v53, %v2498_v20  ;;  %v2125_v58 = vand.u32 2147483648, %v4255_v43  ;;  %vm2124_vm13 = vcmp.eq.f32.partialorder %v4255_v43, 0.0 }
 0x38a   : > { %v4270_v33 = vadd.f32 %v3129_v28, %v3082_v16  ;;  %v2179_v16 = vadd.f32 %v2178_v62, %v2176_v2  ;;  %v2501_v28 = vsel %vm1191_vm1, %v2496_v1, 0.0  ;;  %v2661_v1 = vsel %vm1191_vm1, %v2657_v36, 0.0 }
 0x38b   : > { %v3131_v7 = vpop.f32.mrf.mxu1  ;;  %v2502_v60 = vadd.f32 %v2501_v28, %v2500_v63 }
 0x38c   : > { %v3132_v22 = vadd.f32 %v3131_v7, %v3130_v29  ;;  %3212 = vrsqrt.f32 %v4270_v33  ;;  %v2340_v29 = vadd.f32 %v2339_v59, %v2338_v13  ;;  %v3091_v7 = vadd.f32 %v3090_v23, %v3089_v47 }
 0x38d   : > { %v3133_v26 = vpop.f32.mrf.mxu1  ;;  %v2180_v4 = vrot.slane %v2179_v16, 4  ;;  %v2503_v47 = vsel %vm2177_vm11, %v2497_v32, 0.0  ;;  %v2662_v13 = vadd.f32 %v2661_v1, %v2660_v6  ;;  %v2665_v23 = vsel %vm2177_vm11, %v2659_v31, 0.0 }
 0x38e   : > { %v4285_v51 = vadd.f32 %v3132_v22, %v3085_v25  ;;  %v2341_v25 = vsel %vm2177_vm11, %v2335_v10, 0.0  ;;  %v2658_v22 = vmul.f32 %v4149_v55, %v4149_v55  ;;  %vm2129_vm14 = vcmp.eq.f32.partialorder %v4270_v33, inf }
 0x38f   : > { %v3134_v0 = vpop.f32.mrf.mxu1  ;;  %v2181_v10 = vadd.f32 %v2180_v4, %v2179_v16  ;;  %vm2131_vm15 = vcmp.eq.f32.partialorder %v4270_v33, 0.0 }
 0x390   : > { %3214 = vrsqrt.f32 %v4285_v51  ;;  %v3135_v41 = vadd.f32 %v3134_v0, %v3133_v26  ;;  %v2342_v26 = vadd.f32 %v2341_v25, %v2340_v29  ;;  %v2504_v0 = vadd.f32 %v2503_v47, %v2502_v60 }
 0x391   : > { %v3136_v27 = vpop.f32.mrf.mxu1  ;;  %v2663_v59 = vsel %vm1191_vm1, %v2658_v22, 0.0  ;;  %v2182_v63 = vrot.slane %v2181_v10, 2  ;;  %vm2136_vm0 = vcmp.eq.f32.partialorder %v4285_v51, inf  ;;  %v2139_v36 = vand.u32 2147483648, %v4285_v51 }
 0x392   : > { %v4298_v14 = vadd.f32 %v3135_v41, %v3088_v52  ;;  %v2343_v52 = vrot.slane %v2342_v26, 4  ;;  %v2505_v41 = vrot.slane %v2504_v0, 4  ;;  %vm2138_vm2 = vcmp.eq.f32.partialorder %v4285_v51, 0.0 }
 0x393   : > { %v3137_v11 = vpop.f32.mrf.mxu1 }
 0x394   : > { %v3138_v19 = vadd.f32 %v3137_v11, %v3136_v27  ;;  %3216 = vrsqrt.f32 %v4298_v14  ;;  %v2664_v27 = vadd.f32 %v2663_v59, %v2662_v13  ;;  %v2506_v60 = vadd.f32 %v2505_v41, %v2504_v0 }
 0x395   : > { %v3211_v45 = vpop.eup %3210  ;;  %vm2143_vm3 = vcmp.eq.f32.partialorder %v4298_v14, inf  ;;  %v2146_v22 = vand.u32 2147483648, %v4298_v14  ;;  %vm2145_vm4 = vcmp.eq.f32.partialorder %v4298_v14, 0.0 }
 0x396   : > { %v2121_v34 = vmul.f32 %v3211_v45, %v4255_v43  ;;  %v4309_v48 = vadd.f32 %v3138_v19, %v3091_v7  ;;  %v2666_v11 = vadd.f32 %v2665_v23, %v2664_v27  ;;  %v2344_v19 = vadd.f32 %v2343_v52, %v2342_v26 }
 0x398   : > { %v2123_v62 = vsel %vm2122_vm12, %v4255_v43, %v2121_v34  ;;  %3218 = vrsqrt.f32 %v4309_v48  ;;  %v2132_v43 = vand.u32 2147483648, %v4270_v33  ;;  %v2667_v4 = vrot.slane %v2666_v11, 4 }
 0x399   : > { %v2126_v2 = vsel %vm2124_vm13, %v2125_v58, %v2123_v62  ;;  %v3213_v53 = vpop.eup %3212  ;;  %v2345_v47 = vrot.slane %v2344_v19, 2  ;;  %v2507_v58 = vrot.slane %v2506_v60, 2  ;;  %vm2150_vm5 = vcmp.eq.f32.partialorder %v4309_v48, inf }
 0x39a   : > { %2155 = vst.msk [vmem:[#allocation3] sm:$0xff] %vm1191_vm1, %v2126_v2  ;;  %v2128_v20 = vmul.f32 %v3213_v53, %v4270_v33  ;;  %v2668_v59 = vadd.f32 %v2667_v4, %v2666_v11  ;;  %v2153_v53 = vand.u32 2147483648, %v4309_v48  ;;  %vm2152_vm6 = vcmp.eq.f32.partialorder %v4309_v48, 0.0 }
 0x39b   : > { %v4359_v52 = vadd.f32 %v2507_v58, %v2506_v60 }
 0x39c   : > { %v2130_v29 = vsel %vm2129_vm14, %v4270_v33, %v2128_v20  ;;  %v2183_v33 = vadd.f32 %v2182_v63, %v2181_v10  ;;  %v2346_v20 = vadd.f32 %v2345_v47, %v2344_v19 }
 0x39d   : > { %v3215_v28 = vpop.eup %3214  ;;  %v2133_v32 = vsel %vm2131_vm15, %v2132_v43, %v2130_v29 }
 0x39e   : > { %v2135_v16 = vmul.f32 %v3215_v28, %v4285_v51  ;;  %2156 = vst.msk [vmem:[#allocation3 + $0x8] sm:$0xff] %vm1191_vm1, %v2133_v32  ;;  %v2184_v0 = vrot.slane %v2183_v33, 1  ;;  %v2347_v4 = vrot.slane %v2346_v20, 1 }
 0x3a0   : > { %v2137_v7 = vsel %vm2136_vm0, %v4285_v51, %v2135_v16  ;;  %v4432_v9 = vadd.f32 %v2347_v4, %v2346_v20 }
 0x3a1   : > { %v2140_v12 = vsel %vm2138_vm2, %v2139_v36, %v2137_v7  ;;  %v3217_v45 = vpop.eup %3216  ;;  %v4339_v34 = vld [vmem:[#allocation3] sm:$0xff]  ;;  %v2669_v7 = vrot.slane %v2668_v59, 2 }
 0x3a2   : > { %2157 = vst.msk [vmem:[#allocation3 + $0x10] sm:$0xff] %vm1191_vm1, %v2140_v12  ;;  %v2142_v25 = vmul.f32 %v3217_v45, %v4298_v14  ;;  %vm2368_vm8 = vcmp.eq.f32.partialorder %v4432_v9, inf  ;;  %vm2370_vm12 = vcmp.eq.f32.partialorder %v4432_v9, 0.0 }
 0x3a4   : > { %v2144_v51 = vsel %vm2143_vm3, %v4298_v14, %v2142_v25  ;;  %v2186_v14 = vmul.f32 %v4339_v34, %v4339_v34  ;;  %v2509_v25 = vrot.slane %v4359_v52, 1 }
 0x3a5   : > { %v3219_v31 = vpop.eup %3218  ;;  %v2147_v26 = vsel %vm2145_vm4, %v2146_v22, %v2144_v51  ;;  %v4344_v62 = vld [vmem:[#allocation3 + $0x8] sm:$0xff] }
 0x3a6   : > { %v2149_v1 = vmul.f32 %v3219_v31, %v4309_v48  ;;  %v4346_v2 = vld [vmem:[#allocation3 + $0x1] sm:$0xff]  ;;  %2158 = vst.msk [vmem:[#allocation3 + $0x18] sm:$0xff] %vm1191_vm1, %v2147_v26  ;;  %v2187_v10 = vmul.f32 %v4344_v62, %v4344_v62  ;;  %v2190_v19 = vsel %vm1191_vm1, %v2186_v14, 0.0  ;;  %v4395_v26 = vadd.f32 %v2184_v0, %v2183_v33 }
 0x3a7   : > { %v4348_v6 = vld [vmem:[#allocation3 + $0x2] sm:$0xff]  ;;  %v2349_v28 = vmul.f32 %v4346_v2, %v4346_v2 }
 0x3a8   : > { %v2151_v13 = vsel %vm2150_vm5, %v4309_v48, %v2149_v1  ;;  %v2191_v41 = vsel %vm1191_vm1, %v2187_v10, 0.0  ;;  %v2511_v32 = vmul.f32 %v4348_v6, %v4348_v6  ;;  %v4379_v11 = vld [vmem:[#allocation3 + $0x3] sm:$0xff]  ;;  %3220 = vrsqrt.f32 %v4395_v26 }
 0x3a9   : > { %v2154_v23 = vsel %vm2152_vm6, %v2153_v53, %v2151_v13  ;;  %v4361_v43 = vld [vmem:[#allocation3 + $0x10] sm:$0xff]  ;;  %v2192_v12 = vadd.f32 %v2191_v41, %v2190_v19  ;;  %v2353_v22 = vsel %vm1191_vm1, %v2349_v28, 0.0  ;;  %v2673_v31 = vmul.f32 %v4379_v11, %v4379_v11 }
 0x3aa   : > { %v4364_v27 = vld [vmem:[#allocation3 + $0x9] sm:$0xff]  ;;  %2159 = vst.msk [vmem:[#allocation3 + $0x20] sm:$0xff] %vm1191_vm1, %v2154_v23  ;;  %v2188_v48 = vmul.f32 %v4361_v43, %v4361_v43  ;;  %v2515_v58 = vsel %vm1191_vm1, %v2511_v32, 0.0  ;;  %v2670_v13 = vadd.f32 %v2669_v7, %v2668_v59  ;;  %3222 = vrsqrt.f32 %v4432_v9 }
 0x3ab   : > { %v4368_v29 = vld [vmem:[#allocation3 + $0xa] sm:$0xff]  ;;  %v2350_v16 = vmul.f32 %v4364_v27, %v4364_v27  ;;  %v2677_v15 = vsel %vm1191_vm1, %v2673_v31, 0.0  ;;  %vm2205_vm7 = vcmp.eq.f32.partialorder %v4395_v26, inf  ;;  %vm2207_vm10 = vcmp.eq.f32.partialorder %v4395_v26, 0.0 }
 0x3ac   : > { %v2512_v63 = vmul.f32 %v4368_v29, %v4368_v29  ;;  %v4381_v36 = vld [vmem:[#allocation3 + $0xb] sm:$0xff]  ;;  %v2193_v45 = vsel %vm1191_vm1, %v2188_v48, 0.0 }
 0x3ad   : > { %v2674_v60 = vmul.f32 %v4381_v36, %v4381_v36  ;;  %v2354_v47 = vsel %vm1191_vm1, %v2350_v16, 0.0  ;;  %v4393_v51 = vld [vmem:[#allocation3 + $0x18] sm:$0x3f]  ;;  %v2194_v1 = vadd.f32 %v2193_v45, %v2192_v12 }
 0x3ae   : > { %v4397_v53 = vld [vmem:[#allocation3 + $0x11] sm:$0xff]  ;;  %v4399_v14 = vld [vmem:[#allocation3 + $0x19] sm:$0x3f]  ;;  %v2516_v10 = vsel %vm1191_vm1, %v2512_v63, 0.0  ;;  %v2189_v23 = vmul.f32 %v4393_v51, %v4393_v51  ;;  %v2355_v16 = vadd.f32 %v2354_v47, %v2353_v22 }
 0x3af   : > { %v2351_v41 = vmul.f32 %v4397_v53, %v4397_v53  ;;  %v2352_v28 = vmul.f32 %v4399_v14, %v4399_v14  ;;  %v4408_v32 = vld [vmem:[#allocation3 + $0x12] sm:$0xff]  ;;  %v4410_v33 = vld [vmem:[#allocation3 + $0x1a] sm:$0x3f]  ;;  %v2678_v48 = vsel %vm1191_vm1, %v2674_v60, 0.0  ;;  %v2517_v45 = vadd.f32 %v2516_v10, %v2515_v58 }
 0x3b0   : > { %v4412_v0 = vld [vmem:[#allocation3 + $0x13] sm:$0xff]  ;;  %v2513_v59 = vmul.f32 %v4408_v32, %v4408_v32  ;;  %v2514_v63 = vmul.f32 %v4410_v33, %v4410_v33  ;;  %v2195_v19 = vsel %vm2177_vm11, %v2189_v23, 0.0  ;;  %v2679_v61 = vadd.f32 %v2678_v48, %v2677_v15 }
 0x3b1   : > { %v2675_v7 = vmul.f32 %v4412_v0, %v4412_v0  ;;  %v2356_v12 = vsel %vm1191_vm1, %v2351_v41, 0.0  ;;  %v4423_v21 = vld [vmem:[#allocation3 + $0x1b] sm:$0x3f]  ;;  %v2196_v60 = vadd.f32 %v2195_v19, %v2194_v1  ;;  %v2358_v49 = vsel %vm2177_vm11, %v2352_v28, 0.0 }
 0x3b2   : > { %v2357_v22 = vadd.f32 %v2356_v12, %v2355_v16  ;;  %v2518_v47 = vsel %vm1191_vm1, %v2513_v59, 0.0  ;;  %v2676_v42 = vmul.f32 %v4423_v21, %v4423_v21  ;;  %v2520_v58 = vsel %vm2177_vm11, %v2514_v63, 0.0 }
 0x3b3   : > { %v2519_v30 = vadd.f32 %v2518_v47, %v2517_v45  ;;  %v2680_v23 = vsel %vm1191_vm1, %v2675_v7, 0.0  ;;  %v2197_v18 = vrot.slane %v2196_v60, 4  ;;  %v4436_v28 = vadd.f32 %v2509_v25, %v4359_v52 }
 0x3b4   : > { %v2359_v41 = vadd.f32 %v2358_v49, %v2357_v22  ;;  %v2681_v10 = vadd.f32 %v2680_v23, %v2679_v61  ;;  %v2682_v1 = vsel %vm2177_vm11, %v2676_v42, 0.0  ;;  %v2671_v19 = vrot.slane %v2670_v13, 1 }
 0x3b5   : > { %v2521_v31 = vadd.f32 %v2520_v58, %v2519_v30  ;;  %v2198_v16 = vadd.f32 %v2197_v18, %v2196_v60  ;;  %3224 = vrsqrt.f32 %v4436_v28  ;;  %vm2530_vm9 = vcmp.eq.f32.partialorder %v4436_v28, inf }
 0x3b6   : > { %v2360_v15 = vrot.slane %v2359_v41, 4  ;;  %v2683_v48 = vadd.f32 %v2682_v1, %v2681_v10  ;;  %v4441_v4 = vadd.f32 %v2671_v19, %v2670_v13  ;;  %v3221_v13 = vpop.eup %3220  ;;  %vm2532_vm13 = vcmp.eq.f32.partialorder %v4436_v28, 0.0 }
 0x3b7   : > { %v2522_v59 = vrot.slane %v2521_v31, 4  ;;  %v2199_v12 = vrot.slane %v2198_v16, 2 }
 0x3b8   : > { %v2361_v49 = vadd.f32 %v2360_v15, %v2359_v41  ;;  %v2684_v7 = vrot.slane %v2683_v48, 4  ;;  %3226 = vrsqrt.f32 %v4441_v4  ;;  %vm2692_vm14 = vcmp.eq.f32.partialorder %v4441_v4, inf }
 0x3b9   : > { %v2523_v61 = vadd.f32 %v2522_v59, %v2521_v31  ;;  %v2200_v20 = vadd.f32 %v2199_v12, %v2198_v16  ;;  %v2204_v12 = vmul.f32 %v3221_v13, %v4395_v26  ;;  %vm2694_vm15 = vcmp.eq.f32.partialorder %v4441_v4, 0.0 }
 0x3ba   : > { %v2362_v30 = vrot.slane %v2361_v49, 2  ;;  %v2685_v18 = vadd.f32 %v2684_v7, %v2683_v48  ;;  %v3223_v48 = vpop.eup %3222 }
 0x3bb   : > { %v2524_v42 = vrot.slane %v2523_v61, 2  ;;  %v2201_v52 = vrot.slane %v2200_v20, 1 }
 0x3bc   : > { %v2363_v25 = vadd.f32 %v2362_v30, %v2361_v49  ;;  %v2686_v63 = vrot.slane %v2685_v18, 2  ;;  %v3244_v49 = vld [vmem:[#allocation2] sm:$0xff]  ;;  %v2367_v30 = vmul.f32 %v3223_v48, %v4432_v9  ;;  %v2544_v48 = vmul.f32 6.623413, %v4085_v46 }
 0x3bd   : > { %v2525_v45 = vadd.f32 %v2524_v42, %v2523_v61  ;;  %v2202_v60 = vadd.f32 %v2201_v52, %v2200_v20  ;;  %v2217_v7 = vmul.f32 6.623413, %v3244_v49  ;;  %v3245_v61 = vld [vmem:[#allocation2 + $0x8] sm:$0xff]  ;;  %v3247_v52 = vld [vmem:[#allocation2 + $0x10] sm:$0xff]  ;;  %v4471_v46 = vmul.f32 6.623413, %v4147_v44 }
 0x3be   : > { %v2364_v22 = vrot.slane %v2363_v25, 1  ;;  %v2687_v47 = vadd.f32 %v2686_v63, %v2685_v18  ;;  %v2218_v20 = vmul.f32 6.623413, %v3245_v61  ;;  %v3246_v18 = vld [vmem:[#allocation2 + $0x1] sm:$0xff]  ;;  %v3248_v63 = vld [vmem:[#allocation2 + $0x9] sm:$0xff]  ;;  %v2369_v13 = vsel %vm2368_vm8, %v4432_v9, %v2367_v30 }
 0x3bf   : > { %v2526_v23 = vrot.slane %v2525_v45, 1  ;;  %v2210_v41 = vadd.f32 1e-07, %v2202_v60  ;;  %v4446_v42 = vmul.f32 6.623413, %v3246_v18  ;;  %v2533_v61 = vand.u32 2147483648, %v4436_v28 }
 0x3c0   : > { %v2365_v58 = vadd.f32 %v2364_v22, %v2363_v25  ;;  %v2688_v10 = vrot.slane %v2687_v47, 1  ;;  %v2219_v25 = vmul.f32 6.623413, %v3247_v52  ;;  %v4450_v22 = vmul.f32 6.623413, %v4083_v38 }
 0x3c1   : > { %v2527_v31 = vadd.f32 %v2526_v23, %v2525_v45  ;;  %3228 = vrsqrt.f32 %v2210_v41  ;;  %v2381_v45 = vmul.f32 6.623413, %v3248_v63  ;;  %v4454_v41 = vmul.f32 6.623413, %v4081_v3 }
 0x3c2   : > { %v2373_v1 = vadd.f32 1e-07, %v2365_v58  ;;  %v2689_v15 = vadd.f32 %v2688_v10, %v2687_v47  ;;  %v3225_v59 = vpop.eup %3224  ;;  %v3249_v47 = vld [vmem:[#allocation2 + $0x18] sm:$0x3f]  ;;  %v2206_v10 = vsel %vm2205_vm7, %v4395_v26, %v2204_v12  ;;  %v2208_v38 = vand.u32 2147483648, %v4395_v26 }
 0x3c3   : > { %v2535_v16 = vadd.f32 1e-07, %v2527_v31  ;;  %v2529_v60 = vmul.f32 %v3225_v59, %v4436_v28  ;;  %v2220_v23 = vmul.f32 6.623413, %v3249_v47  ;;  %v3250_v31 = vld [vmem:[#allocation2 + $0x11] sm:$0xff]  ;;  %v2371_v3 = vand.u32 2147483648, %v4432_v9 }
 0x3c4   : > { %3230 = vrsqrt.f32 %v2373_v1  ;;  %v2697_v19 = vadd.f32 1e-07, %v2689_v15  ;;  %v2382_v1 = vmul.f32 6.623413, %v3250_v31  ;;  %v2209_v49 = vsel %vm2207_vm10, %v2208_v38, %v2206_v10 }
 0x3c5   : > { %3232 = vrsqrt.f32 %v2535_v16  ;;  %v3227_v58 = vpop.eup %3226  ;;  %v3251_v16 = vld [vmem:[#allocation2 + $0x19] sm:$0x3f]  ;;  %v2531_v59 = vsel %vm2530_vm9, %v4436_v28, %v2529_v60  ;;  %v2372_v52 = vsel %vm2370_vm12, %v2371_v3, %v2369_v13 }
 0x3c6   : > { %3234 = vrsqrt.f32 %v2697_v19  ;;  %v2383_v15 = vmul.f32 6.623413, %v3251_v16  ;;  %v2545_v19 = vmul.f32 6.623413, %v4093_v50  ;;  %v2691_v30 = vmul.f32 %v3227_v58, %v4441_v4 }
 0x3c7   : > { %v2534_v63 = vsel %vm2532_vm13, %v2533_v61, %v2531_v59  ;;  %v2705_v50 = vmul.f32 6.623413, %v4145_v24  ;;  %v2695_v16 = vand.u32 2147483648, %v4441_v4 }
 0x3c8   : > { %v2693_v31 = vsel %vm2692_vm14, %v4441_v4, %v2691_v30 }
 0x3ce   : > { %v3229_v12 = vpop.eup %3228 }
 0x3cf   : > { %v2212_v18 = vmul.f32 %v3229_v12, %v2209_v49 }
 0x3d1   : > { %v3231_v26 = vpop.eup %3230  ;;  %v2213_v60 = vmul.f32 %v2212_v18, %v4339_v34  ;;  %v2214_v47 = vmul.f32 %v2212_v18, %v4344_v62  ;;  %v2215_v58 = vmul.f32 %v2212_v18, %v4361_v43  ;;  %v2216_v28 = vmul.f32 %v2212_v18, %v4393_v51 }
 0x3d2   : > { %v3233_v9 = vpop.eup %3232  ;;  %v2375_v10 = vmul.f32 %v3231_v26, %v2372_v52 }
 0x3d3   : > { %v2537_v44 = vmul.f32 %v3233_v9, %v2534_v63  ;;  %v4482_v38 = vmin.f32 %v2213_v60, %v2217_v7  ;;  %v4484_v13 = vmin.f32 %v2214_v47, %v2218_v20  ;;  %v4486_v24 = vmin.f32 %v2215_v58, %v2219_v25 }
 0x3d4   : > { %v4488_v3 = vmin.f32 %v2216_v28, %v2220_v23  ;;  %v2376_v34 = vmul.f32 %v2375_v10, %v4346_v2  ;;  %v2377_v62 = vmul.f32 %v2375_v10, %v4364_v27  ;;  %v2378_v43 = vmul.f32 %v2375_v10, %v4397_v53 }
 0x3d5   : > { %v2379_v51 = vmul.f32 %v2375_v10, %v4399_v14  ;;  %v2244_v59 = vsel %vm1191_vm1, %v4482_v38, 0.0  ;;  %v2245_v7 = vsel %vm1191_vm1, %v4484_v13, 0.0  ;;  %v2247_v20 = vsel %vm1191_vm1, %v4486_v24, 0.0  ;;  %v3235_v14 = vpop.eup %3234 }
 0x3d6   : > { %v2696_v25 = vsel %vm2694_vm15, %v2695_v16, %v2693_v31  ;;  %v2246_v23 = vadd.f32 %v2245_v7, %v2244_v59  ;;  %v4503_v2 = vmin.f32 %v2376_v34, %v4446_v42  ;;  %v4505_v27 = vmin.f32 %v2377_v62, %v2381_v45 }
 0x3d7   : > { %v4507_v53 = vmin.f32 %v2378_v43, %v2382_v1  ;;  %v4509_v12 = vmin.f32 %v2379_v51, %v2383_v15  ;;  %v2538_v49 = vmul.f32 %v2537_v44, %v4348_v6  ;;  %v2539_v61 = vmul.f32 %v2537_v44, %v4368_v29 }
 0x3d8   : > { %v2540_v30 = vmul.f32 %v2537_v44, %v4408_v32  ;;  %v2248_v18 = vadd.f32 %v2247_v20, %v2246_v23  ;;  %v2249_v4 = vsel %vm2177_vm11, %v4488_v3, 0.0  ;;  %v2406_v42 = vsel %vm1191_vm1, %v4503_v2, 0.0 }
 0x3d9   : > { %v2407_v45 = vsel %vm1191_vm1, %v4505_v27, 0.0  ;;  %v2409_v15 = vsel %vm1191_vm1, %v4507_v53, 0.0  ;;  %v2541_v6 = vmul.f32 %v2537_v44, %v4410_v33  ;;  %v4524_v29 = vmin.f32 %v2538_v49, %v4450_v22 }
 0x3da   : > { %v2408_v1 = vadd.f32 %v2407_v45, %v2406_v42  ;;  %v2250_v32 = vadd.f32 %v2249_v4, %v2248_v18  ;;  %v4527_v52 = vmin.f32 %v2539_v61, %v4454_v41  ;;  %v4529_v26 = vmin.f32 %v2540_v30, %v2544_v48 }
 0x3db   : > { %v2699_v63 = vmul.f32 %v3235_v14, %v2696_v25  ;;  %v2411_v60 = vsel %vm2177_vm11, %v4509_v12, 0.0  ;;  %v2568_v47 = vsel %vm1191_vm1, %v4524_v29, 0.0  ;;  %v2706_v58 = vmul.f32 6.623413, %v4149_v55 }
 0x3dc   : > { %v2410_v9 = vadd.f32 %v2409_v15, %v2408_v1  ;;  %v2251_v33 = vrot.slane %v2250_v32, 4  ;;  %v4536_v28 = vmin.f32 %v2541_v6, %v2545_v19  ;;  %v2569_v22 = vsel %vm1191_vm1, %v4527_v52, 0.0 }
 0x3dd   : > { %v2700_v41 = vmul.f32 %v2699_v63, %v4379_v11  ;;  %v2570_v10 = vadd.f32 %v2569_v22, %v2568_v47  ;;  %v2571_v44 = vsel %vm1191_vm1, %v4529_v26, 0.0  ;;  %v2701_v31 = vmul.f32 %v2699_v63, %v4381_v36 }
 0x3de   : > { %v2412_v48 = vadd.f32 %v2411_v60, %v2410_v9  ;;  %v2252_v16 = vadd.f32 %v2251_v33, %v2250_v32  ;;  %v2702_v34 = vmul.f32 %v2699_v63, %v4412_v0  ;;  %v2703_v55 = vmul.f32 %v2699_v63, %v4423_v21 }
 0x3df   : > { %v4547_v19 = vmin.f32 %v2700_v41, %v4471_v46  ;;  %v2572_v43 = vadd.f32 %v2571_v44, %v2570_v10  ;;  %v2707_v51 = vmul.f32 6.623413, %v4151_v8  ;;  %v4550_v11 = vmin.f32 %v2701_v31, %v2705_v50 }
 0x3e0   : > { %v2413_v62 = vrot.slane %v2412_v48, 4  ;;  %v2253_v59 = vrot.slane %v2252_v16, 2  ;;  %v2573_v7 = vsel %vm2177_vm11, %v4536_v28, 0.0  ;;  %v4554_v20 = vmin.f32 %v2702_v34, %v2706_v58 }
 0x3e1   : > { %v2730_v36 = vsel %vm1191_vm1, %v4547_v19, 0.0  ;;  %v2574_v21 = vadd.f32 %v2573_v7, %v2572_v43  ;;  %v4558_v25 = vmin.f32 %v2703_v55, %v2707_v51  ;;  %v2731_v46 = vsel %vm1191_vm1, %v4550_v11, 0.0 }
 0x3e2   : > { %v2414_v0 = vadd.f32 %v2413_v62, %v2412_v48  ;;  %v2254_v23 = vadd.f32 %v2253_v59, %v2252_v16  ;;  %v2732_v8 = vadd.f32 %v2731_v46, %v2730_v36  ;;  %v2733_v49 = vsel %vm1191_vm1, %v4554_v20, 0.0 }
 0x3e3   : > { %v2575_v14 = vrot.slane %v2574_v21, 4  ;;  %v2735_v42 = vsel %vm2177_vm11, %v4558_v25, 0.0 }
 0x3e4   : > { %v2415_v50 = vrot.slane %v2414_v0, 2  ;;  %v2255_v61 = vrot.slane %v2254_v23, 1  ;;  %v2734_v30 = vadd.f32 %v2733_v49, %v2732_v8 }
 0x3e5   : > { %v2576_v4 = vadd.f32 %v2575_v14, %v2574_v21 }
 0x3e6   : > { %v2416_v18 = vadd.f32 %v2415_v50, %v2414_v0  ;;  %v2256_v45 = vadd.f32 %v2255_v61, %v2254_v23  ;;  %v2736_v1 = vadd.f32 %v2735_v42, %v2734_v30 }
 0x3e7   : > { %v2577_v6 = vrot.slane %v2576_v4, 2 }
 0x3e8   : > { %v2417_v15 = vrot.slane %v2416_v18, 1  ;;  %v2257_v32 = vmul.f32 0.033333335, %v2256_v45  ;;  %v2737_v63 = vrot.slane %v2736_v1, 4 }
 0x3e9   : > { %v2578_v60 = vadd.f32 %v2577_v6, %v2576_v4 }
 0x3ea   : > { %v2418_v9 = vadd.f32 %v2417_v15, %v2416_v18  ;;  %v4567_v47 = vsub.f32 %v4482_v38, %v2257_v32  ;;  %v4570_v58 = vsub.f32 %v4484_v13, %v2257_v32  ;;  %v4573_v33 = vsub.f32 %v4486_v24, %v2257_v32 }
 0x3eb   : > { %v4576_v22 = vsub.f32 %v4488_v3, %v2257_v32  ;;  %v2579_v48 = vrot.slane %v2578_v60, 1  ;;  %v2738_v31 = vadd.f32 %v2737_v63, %v2736_v1 }
 0x3ec   : > { %v2419_v41 = vmul.f32 0.033333335, %v2418_v9  ;;  %v2284_v10 = vmul.f32 %v4567_v47, %v4567_v47  ;;  %v2285_v44 = vmul.f32 %v4570_v58, %v4570_v58  ;;  %v2286_v38 = vmul.f32 %v4573_v33, %v4573_v33 }
 0x3ed   : > { %v2287_v34 = vmul.f32 %v4576_v22, %v4576_v22  ;;  %v2580_v51 = vadd.f32 %v2579_v48, %v2578_v60  ;;  %v2739_v59 = vrot.slane %v2738_v31, 2 }
 0x3ee   : > { %v4585_v13 = vsub.f32 %v4503_v2, %v2419_v41  ;;  %v4588_v24 = vsub.f32 %v4505_v27, %v2419_v41  ;;  %v4591_v3 = vsub.f32 %v4507_v53, %v2419_v41  ;;  %v4594_v16 = vsub.f32 %v4509_v12, %v2419_v41 }
 0x3ef   : > { %v2288_v55 = vsel %vm1191_vm1, %v2284_v10, 0.0  ;;  %v2289_v62 = vsel %vm1191_vm1, %v2285_v44, 0.0  ;;  %v2291_v12 = vsel %vm1191_vm1, %v2286_v38, 0.0  ;;  %v2293_v46 = vsel %vm2177_vm11, %v2287_v34, 0.0 }
 0x3f0   : > { %v2290_v43 = vadd.f32 %v2289_v62, %v2288_v55  ;;  %v2446_v2 = vmul.f32 %v4585_v13, %v4585_v13  ;;  %v2447_v27 = vmul.f32 %v4588_v24, %v4588_v24  ;;  %v2448_v53 = vmul.f32 %v4591_v3, %v4591_v3 }
 0x3f1   : > { %v2449_v36 = vmul.f32 %v4594_v16, %v4594_v16  ;;  %v2581_v8 = vmul.f32 0.033333335, %v2580_v51  ;;  %v2740_v50 = vadd.f32 %v2739_v59, %v2738_v31 }
 0x3f2   : > { %v2292_v7 = vadd.f32 %v2291_v12, %v2290_v43  ;;  %v2450_v0 = vsel %vm1191_vm1, %v2446_v2, 0.0  ;;  %v2451_v21 = vsel %vm1191_vm1, %v2447_v27, 0.0  ;;  %v2453_v49 = vsel %vm1191_vm1, %v2448_v53, 0.0 }
 0x3f3   : > { %v2452_v23 = vadd.f32 %v2451_v21, %v2450_v0  ;;  %v4614_v30 = vsub.f32 %v4524_v29, %v2581_v8  ;;  %v4617_v18 = vsub.f32 %v4527_v52, %v2581_v8  ;;  %v4620_v4 = vsub.f32 %v4529_v26, %v2581_v8 }
 0x3f4   : > { %v2294_v14 = vadd.f32 %v2293_v46, %v2292_v7  ;;  %v2455_v45 = vsel %vm2177_vm11, %v2449_v36, 0.0  ;;  %v4624_v1 = vsub.f32 %v4536_v28, %v2581_v8  ;;  %v2741_v15 = vrot.slane %v2740_v50, 1 }
 0x3f5   : > { %v2454_v61 = vadd.f32 %v2453_v49, %v2452_v23  ;;  %v2608_v32 = vmul.f32 %v4614_v30, %v4614_v30  ;;  %v2609_v29 = vmul.f32 %v4617_v18, %v4617_v18  ;;  %v2610_v52 = vmul.f32 %v4620_v4, %v4620_v4 }
 0x3f6   : > { %v2295_v42 = vrot.slane %v2294_v14, 4  ;;  %v2742_v26 = vadd.f32 %v2741_v15, %v2740_v50  ;;  %v2611_v60 = vmul.f32 %v4624_v1, %v4624_v1 }
 0x3f7   : > { %v2456_v6 = vadd.f32 %v2455_v45, %v2454_v61  ;;  %v2612_v28 = vsel %vm1191_vm1, %v2608_v32, 0.0  ;;  %v2613_v41 = vsel %vm1191_vm1, %v2609_v29, 0.0  ;;  %v2615_v31 = vsel %vm1191_vm1, %v2610_v52, 0.0 }
 0x3f8   : > { %v2296_v63 = vadd.f32 %v2295_v42, %v2294_v14  ;;  %v2614_v10 = vadd.f32 %v2613_v41, %v2612_v28  ;;  %v2743_v44 = vmul.f32 0.033333335, %v2742_v26  ;;  %v2617_v27 = vsel %vm2177_vm11, %v2611_v60, 0.0 }
 0x3f9   : > { %v2457_v9 = vrot.slane %v2456_v6, 4 }
 0x3fa   : > { %v2297_v48 = vrot.slane %v2296_v63, 2  ;;  %v2616_v55 = vadd.f32 %v2615_v31, %v2614_v10  ;;  %v4638_v62 = vsub.f32 %v4547_v19, %v2743_v44  ;;  %v4641_v43 = vsub.f32 %v4550_v11, %v2743_v44 }
 0x3fb   : > { %v2458_v38 = vadd.f32 %v2457_v9, %v2456_v6  ;;  %v4645_v53 = vsub.f32 %v4554_v20, %v2743_v44  ;;  %v4648_v12 = vsub.f32 %v4558_v25, %v2743_v44 }
 0x3fc   : > { %v2298_v34 = vadd.f32 %v2297_v48, %v2296_v63  ;;  %v2618_v59 = vadd.f32 %v2617_v27, %v2616_v55  ;;  %v2770_v7 = vmul.f32 %v4638_v62, %v4638_v62  ;;  %v2771_v19 = vmul.f32 %v4641_v43, %v4641_v43 }
 0x3fd   : > { %v2459_v2 = vrot.slane %v2458_v38, 2  ;;  %v2772_v11 = vmul.f32 %v4645_v53, %v4645_v53  ;;  %v2773_v0 = vmul.f32 %v4648_v12, %v4648_v12 }
 0x3fe   : > { %v2299_v51 = vrot.slane %v2298_v34, 1  ;;  %v2619_v21 = vrot.slane %v2618_v59, 4  ;;  %v2774_v25 = vsel %vm1191_vm1, %v2770_v7, 0.0  ;;  %v2775_v46 = vsel %vm1191_vm1, %v2771_v19, 0.0 }
 0x3ff   : > { %v2460_v36 = vadd.f32 %v2459_v2, %v2458_v38  ;;  %v2776_v8 = vadd.f32 %v2775_v46, %v2774_v25  ;;  %v2777_v14 = vsel %vm1191_vm1, %v2772_v11, 0.0  ;;  %v2779_v45 = vsel %vm2177_vm11, %v2773_v0, 0.0 }
 0x400   : > { %v2300_v20 = vadd.f32 %v2299_v51, %v2298_v34  ;;  %v2620_v50 = vadd.f32 %v2619_v21, %v2618_v59 }
 0x401   : > { %v2461_v23 = vrot.slane %v2460_v36, 1  ;;  %v2778_v61 = vadd.f32 %v2777_v14, %v2776_v8 }
 0x402   : > { %3236 = vrsqrt.f32 %v2300_v20  ;;  %v2621_v42 = vrot.slane %v2620_v50, 2 }
 0x403   : > { %v2462_v49 = vadd.f32 %v2461_v23, %v2460_v36  ;;  %v2780_v15 = vadd.f32 %v2779_v45, %v2778_v61 }
 0x404   : > { %v2622_v6 = vadd.f32 %v2621_v42, %v2620_v50  ;;  %v4766_v50 = vld [vmem:[#allocation12_spill] sm:$0xff] }
 0x405   : > { %3238 = vrsqrt.f32 %v2462_v49  ;;  %v2781_v32 = vrot.slane %v2780_v15, 4  ;;  %v4767_v49 = vld [vmem:[#allocation13_spill] sm:$0xff] }
 0x406   : > { %v2623_v29 = vrot.slane %v2622_v6, 1 }
 0x407   : > { %v2782_v52 = vadd.f32 %v2781_v32, %v2780_v15  ;;  %v4768_v15 = vld [vmem:[#allocation14_spill] sm:$0xff] }
 0x408   : > { %v2624_v63 = vadd.f32 %v2623_v29, %v2622_v6 }
 0x409   : > { %v2783_v26 = vrot.slane %v2782_v52, 2 }
 0x40a   : > { %3240 = vrsqrt.f32 %v2624_v63 }
 0x40b   : > { %v2784_v9 = vadd.f32 %v2783_v26, %v2782_v52 }
 0x40d   : > { %v2785_v28 = vrot.slane %v2784_v9, 1 }
 0x40f   : > { %v3237_v60 = vpop.eup %3236  ;;  %v2786_v2 = vadd.f32 %v2785_v28, %v2784_v9 }
 0x410   : > { %v2302_v41 = vmul.f32 %v3237_v60, %v4567_v47  ;;  %v2303_v48 = vmul.f32 %v3237_v60, %v4570_v58  ;;  %v2304_v10 = vmul.f32 %v3237_v60, %v4573_v33  ;;  %v2305_v44 = vmul.f32 %v3237_v60, %v4576_v22 }
 0x411   : > { %3242 = vrsqrt.f32 %v2786_v2 }
 0x412   : > { %v3239_v38 = vpop.eup %3238  ;;  %v2306_v31 = vmul.f32 %v2302_v41, %v4186_v35  ;;  %v2307_v34 = vmul.f32 %v2303_v48, %v4189_v37  ;;  %v2308_v55 = vmul.f32 %v2304_v10, %v4192_v5  ;;  %v2309_v33 = vmul.f32 %v2305_v44, %v4195_v39  ;;  %v4769_v41 = vld [vmem:[#allocation10_spill] sm:$0xff]  ;;  %v4770_v48 = vld [vmem:[#allocation15_spill] sm:$0xff] }
 0x413   : > { %v2464_v27 = vmul.f32 %v3239_v38, %v4585_v13  ;;  %v2465_v51 = vmul.f32 %v3239_v38, %v4588_v24  ;;  %v2466_v47 = vmul.f32 %v3239_v38, %v4591_v3  ;;  %v2467_v58 = vmul.f32 %v3239_v38, %v4594_v16  ;;  %v4771_v44 = vld [vmem:[#allocation11_spill] sm:$0xff] }
 0x414   : > { %v2310_v22 = vsel %vm1191_vm1, %v2306_v31, 0.0  ;;  %v2311_v59 = vsel %vm1191_vm1, %v2307_v34, 0.0  ;;  %v2313_v13 = vsel %vm1191_vm1, %v2308_v55, 0.0  ;;  %v2315_v19 = vsel %vm2177_vm11, %v2309_v33, 0.0 }
 0x415   : > { %v2312_v35 = vadd.f32 %v2311_v59, %v2310_v22  ;;  %v2468_v37 = vmul.f32 %v2464_v27, %v4198_v17  ;;  %v2469_v5 = vmul.f32 %v2465_v51, %v4201_v54  ;;  %v2470_v7 = vmul.f32 %v2466_v47, %v4204_v56  ;;  %v4772_v22 = vld [vmem:[#allocation16_spill] sm:$0xff] }
 0x416   : > { %v2471_v3 = vmul.f32 %v2467_v58, %v4207_v57  ;;  %v2766_v10 = vmul.f32 %v4770_v48, %v4769_v41  ;;  %v2767_v38 = vmul.f32 %v4770_v48, %v4771_v44 }
 0x417   : > { %v2314_v24 = vadd.f32 %v2313_v13, %v2312_v35  ;;  %v2472_v16 = vsel %vm1191_vm1, %v2468_v37, 0.0  ;;  %v2473_v39 = vsel %vm1191_vm1, %v2469_v5, 0.0  ;;  %v3241_v11 = vpop.eup %3240  ;;  %v2475_v17 = vsel %vm1191_vm1, %v2470_v7, 0.0  ;;  %v4773_v7 = vld [vmem:[#allocation17_spill] sm:$0xff] }
 0x418   : > { %v2474_v36 = vadd.f32 %v2473_v39, %v2472_v16  ;;  %v2626_v56 = vmul.f32 %v3241_v11, %v4614_v30  ;;  %v2627_v20 = vmul.f32 %v3241_v11, %v4617_v18  ;;  %v2628_v21 = vmul.f32 %v3241_v11, %v4620_v4 }
 0x419   : > { %v2316_v0 = vadd.f32 %v2315_v19, %v2314_v24  ;;  %v2477_v57 = vsel %vm2177_vm11, %v2471_v3, 0.0  ;;  %v2629_v46 = vmul.f32 %v3241_v11, %v4624_v1 }
 0x41a   : > { %v2476_v54 = vadd.f32 %v2475_v17, %v2474_v36  ;;  %v2630_v8 = vmul.f32 %v2626_v56, %v4234_v40  ;;  %v2631_v14 = vmul.f32 %v2627_v20, %v4766_v50  ;;  %v2632_v61 = vmul.f32 %v2628_v21, %v4767_v49 }
 0x41b   : > { %v2317_v25 = vrot.slane %v2316_v0, 4  ;;  %v2633_v30 = vmul.f32 %v2629_v46, %v4768_v15 }
 0x41c   : > { %v2478_v23 = vadd.f32 %v2477_v57, %v2476_v54  ;;  %v2634_v18 = vsel %vm1191_vm1, %v2630_v8, 0.0  ;;  %v2635_v4 = vsel %vm1191_vm1, %v2631_v14, 0.0  ;;  %v2637_v1 = vsel %vm1191_vm1, %v2632_v61, 0.0 }
 0x41d   : > { %v2318_v42 = vadd.f32 %v2317_v25, %v2316_v0  ;;  %v2636_v32 = vadd.f32 %v2635_v4, %v2634_v18  ;;  %v2639_v26 = vsel %vm2177_vm11, %v2633_v30, 0.0 }
 0x41e   : > { %v2479_v45 = vrot.slane %v2478_v23, 4  ;;  %v3243_v9 = vpop.eup %3242 }
 0x41f   : > { %v2319_v6 = vrot.slane %v2318_v42, 2  ;;  %v2638_v63 = vadd.f32 %v2637_v1, %v2636_v32  ;;  %v2788_v34 = vmul.f32 %v3243_v9, %v4638_v62  ;;  %v2789_v55 = vmul.f32 %v3243_v9, %v4641_v43 }
 0x420   : > { %v2480_v29 = vadd.f32 %v2479_v45, %v2478_v23  ;;  %v2790_v2 = vmul.f32 %v3243_v9, %v4645_v53  ;;  %v2791_v51 = vmul.f32 %v3243_v9, %v4648_v12 }
 0x421   : > { %v2320_v52 = vadd.f32 %v2319_v6, %v2318_v42  ;;  %v2640_v28 = vadd.f32 %v2639_v26, %v2638_v63  ;;  %v2792_v58 = vmul.f32 %v2788_v34, %v2766_v10  ;;  %v2793_v33 = vmul.f32 %v2789_v55, %v2767_v38 }
 0x422   : > { %v2481_v40 = vrot.slane %v2480_v29, 2  ;;  %v2794_v59 = vmul.f32 %v2790_v2, %v4772_v22  ;;  %v2795_v13 = vmul.f32 %v2791_v51, %v4773_v7 }
 0x423   : > { %v2321_v60 = vrot.slane %v2320_v52, 1  ;;  %v2641_v27 = vrot.slane %v2640_v28, 4  ;;  %v2796_v62 = vsel %vm1191_vm1, %v2792_v58, 0.0  ;;  %v2797_v43 = vsel %vm1191_vm1, %v2793_v33, 0.0 }
 0x424   : > { %v2482_v31 = vadd.f32 %v2481_v40, %v2480_v29  ;;  %v2798_v53 = vadd.f32 %v2797_v43, %v2796_v62  ;;  %v2799_v12 = vsel %vm1191_vm1, %v2794_v59, 0.0  ;;  %v2801_v19 = vsel %vm2177_vm11, %v2795_v13, 0.0 }
 0x425   : > { %v2322_v35 = vadd.f32 %v2321_v60, %v2320_v52  ;;  %v2642_v37 = vadd.f32 %v2641_v27, %v2640_v28  ;;  %vm2810_vm1 = vcmask 114688  }
 0x426   : > { %v2483_v47 = vrot.slane %v2482_v31, 1  ;;  %v2800_v39 = vadd.f32 %v2799_v12, %v2798_v53 }
 0x427   : > { %v2643_v24 = vrot.slane %v2642_v37, 2 }
 0x428   : > { %v2484_v5 = vadd.f32 %v2483_v47, %v2482_v31  ;;  %v2802_v11 = vadd.f32 %v2801_v19, %v2800_v39 }
 0x429   : > { %v2644_v16 = vadd.f32 %v2643_v24, %v2642_v37 }
 0x42a   : > { %v2485_v3 = vadd.f32 %v2484_v5, %v2322_v35  ;;  %v2803_v17 = vrot.slane %v2802_v11, 4 }
 0x42b   : > { %v2645_v36 = vrot.slane %v2644_v16, 1 }
 0x42c   : > { %v2804_v56 = vadd.f32 %v2803_v17, %v2802_v11 }
 0x42d   : > { %v2646_v0 = vadd.f32 %v2645_v36, %v2644_v16 }
 0x42e   : > { %v2805_v20 = vrot.slane %v2804_v56, 2 }
 0x42f   : > { %v2647_v54 = vadd.f32 %v2646_v0, %v2485_v3 }
 0x430   : > { %v2806_v21 = vadd.f32 %v2805_v20, %v2804_v56 }
 0x432   : > { %v2807_v25 = vrot.slane %v2806_v21, 1 }
 0x434   : > { %v2808_v57 = vadd.f32 %v2807_v25, %v2806_v21 }
 0x436   : > { %v2809_v46 = vadd.f32 %v2808_v57, %v2647_v54 }
 0x438   : > { %2811 = vst.msk [vmem:[%s219_s28] sm:$0x1] %vm2810_vm1, %v2809_v46 }
 0x439   : > { %3291 = shalt.err (!%p3288_p0)
}
 0x43a   : > { %s3292_s11 = scalar_lea.hbm %s2823_s6, 16  ;;  %s3296_s14 = scalar_lea.hbm %s4750_s4, 32 }
 0x43b   : > { %p3293_p1 = scmp.ne.s32.totalorder %s2823_s6, %s3292_s11  ;;  %p3297_p4 = scmp.lt.s32.totalorder %s2823_s6, %s4750_s4 }
 0x43c   : > { %p3298_p7 = scmp.lt.s32.totalorder %s3296_s14, %s3292_s11 }
 0x43d   : > { %p3294_p2 = pnand %p3293_p1, %p3411_p5 }
 0x43e   : > { %p3299_p6 = por %p3298_p7, %p3297_p4 }
 0x43f   : > { %p3295_p3 = pneg %p3294_p2 }
 0x441   : > { %p3300_p8 = pnand %p3299_p6, %p3295_p3 }
 0x443   : > { %3303 = shalt.err (!%p3300_p8)
}
 0x444   : > { %3144 = dma.vmem_to_hbm [thread:$0]  (%p3411_p5), %s2826_s29, 16, %s2823_s6, %s2813_s7  }
 0x445 PF: > { %p3156_p9 = scmp.ge.s32.totalorder %s3342_s18, 2  ;;  %s2837_s23 = sand.u32 1, %s3330_s15  }
 0x446   : > { %p4774_p10 = scmp.ne.s32.totalorder %s4756_s26, 0  ;;  %s2838_s27 = scalar_lea.sflag [#allocation6], %s2837_s23 }
 0x448   : > { %p3151_p11 = pnand %p3156_p9, %p4774_p10 }
 0x44a   : > { %p3152_p12 = pneg %p3151_p11 }
 0x44c   : > { %3325 = dma.done.wait (%p3152_p12), %s2838_s27, 16  }
 0x44d   : > { %3327 = vsyncadd (%p3152_p12), %s2838_s27, 4294967280  ;;  %p15_p13 = scmp.ge.s32.totalorder %s3398_s21, 4   ;;  %s4775_s15 = smov %s3334_s16 }
 0x44e   : > { %s4776_s16 = smov %s3338_s17  ;;  %s4777_s17 = smov %s3409_s24 }
 0x44f   : > { %s4778_s18 = smov %s3398_s21  ;;  %17 = sbr.rel (!%p15_p13) target bundleno = 4 (0x4), region = 85 }
 0x454   :  { %2842 = vsyncpa [#allocation5], 1 }
 0x455   :  { %2844 = vsyncpa [#allocation5 + $0x1], 1 }
 0x456   :  { %2845 = vsyncpa [#allocation6], 1 }
 0x457   :  { %2847 = vsyncpa [#allocation6 + $0x1], 1 }

</bundles_post_ra>
